<compile_context>
chip_gen: v5e
topology: v5e:2x2
jax: 0.10.0
libtpu: 0.0.40
codegen_flags: <defaults>
</compile_context>

<pallas_src>
import functools

import jax
import jax.numpy as jnp
from jax.experimental import pallas as pl
from jax.experimental.pallas import tpu as pltpu

LANE = 128          # TPU lane width; fused head output padded to this
NEG_BIG = -1.0e30   # "minus infinity" for masked softmax columns


def actor_critic_kernel(x_ref, w1_ref, b1_ref, w2_ref, b2_ref, wh_ref, bh_ref,
                        out_ref, *, action_size):
    # Shared body: Linear -> ReLU -> Linear -> ReLU  (f32 MXU matmuls)
    x = x_ref[...]                                                    # (TM, S)
    h = jnp.dot(x, w1_ref[...], preferred_element_type=jnp.float32) + b1_ref[...]
    h = jnp.maximum(h, 0.0)
    h = jnp.dot(h, w2_ref[...], preferred_element_type=jnp.float32) + b2_ref[...]
    h = jnp.maximum(h, 0.0)                                           # (TM, H)

    # Fused actor+critic head: one lane-dense (TM, 128) matmul.
    head = jnp.dot(h, wh_ref[...], preferred_element_type=jnp.float32) + bh_ref[...]

    col = jax.lax.broadcasted_iota(jnp.int32, head.shape, 1)
    is_actor = col < action_size

    # Softmax restricted to the actor columns (masked columns -> prob 0).
    logits = jnp.where(is_actor, head, NEG_BIG)
    logits = logits - jnp.max(logits, axis=-1, keepdims=True)
    e = jnp.exp(logits)
    # Exact reciprocal: one divide on a (TM, 1) column, probs sum to 1 exactly.
    inv = pl.reciprocal(jnp.sum(e, axis=-1, keepdims=True), approx=False)
    probs = e * inv

    # Single unmasked lane-dense store: [probs | value | zeros].
    out_ref[...] = jnp.where(is_actor, probs,
                             jnp.where(col == action_size, head, 0.0))


# ---------------------------------------------------------------------------
# Wrapper / tiling heuristics
# ---------------------------------------------------------------------------

def _round_up(x, m):
    return (x + m - 1) // m * m


def _tensorcores_per_chip():
    """v7x has 2 TensorCores per chip; v5e/v6e have 1. Defaults to 1 safely."""
    try:
        kind = jax.devices()[0].device_kind.lower()
        return 2 if "v7" in kind else 1
    except Exception:  # pragma: no cover - any query failure -> conservative
        return 1


def _choose_tm(batch, n_cores):
    """One tile per TensorCore for small rollouts (grid=(1,) on 1-TC chips);
    cap tiles at 1024 rows for large rollouts."""
    b8 = _round_up(max(batch, 8), 8)
    return min(_round_up(pl.cdiv(b8, n_cores), 8), 1024)


def pack_params(params):
    """Build the kernel-ready parameter tuple ONCE (hoisted out of forward)."""
    w1, b1, w2, b2, wa, ba, wc, bc = params
    H = w1.shape[1]
    A = wa.shape[1]
    assert A + 1 <= LANE, "fused head layout assumes action_size + 1 <= 128"
    wh = jnp.zeros((H, LANE), jnp.float32).at[:, :A].set(wa).at[:, A:A + 1].set(wc)
    bh = jnp.zeros((1, LANE), jnp.float32).at[:, :A].set(ba).at[:, A:A + 1].set(bc)
    return (w1, b1, w2, b2, wh, bh), A


@functools.partial(jax.jit, static_argnames=("action_size", "tm"))
def _forward_jit(state, packed, *, action_size, tm):
    w1, b1, w2, b2, wh, bh = packed
    B, S = state.shape

    n_tiles = pl.cdiv(B, tm)
    b_pad = n_tiles * tm
    if b_pad != B:
        # Pad stays inside the jit so it fuses with callers; padded rows are
        # zero-filled, compute cleanly, and are sliced away below.
        state = jnp.pad(state, ((0, b_pad - B), (0, 0)))

    kernel = functools.partial(actor_critic_kernel, action_size=action_size)
    # Weights/biases: full blocks with constant index_map -> resident in VMEM.
    resident = lambda arr: pl.BlockSpec(arr.shape, lambda i: (0, 0))

    out = pl.pallas_call(
        kernel,
        out_shape=jax.ShapeDtypeStruct((b_pad, LANE), jnp.float32),
        grid=(n_tiles,),
        in_specs=[pl.BlockSpec((tm, S), lambda i: (i, 0)),
                  resident(w1), resident(b1),
                  resident(w2), resident(b2),
                  resident(wh), resident(bh)],
        out_specs=pl.BlockSpec((tm, LANE), lambda i: (i, 0)),
        compiler_params=pltpu.CompilerParams(
            dimension_semantics=("parallel",),
            vmem_limit_bytes=32 << 20),
    )(state, w1, b1, w2, b2, wh, bh)

    # One slice of the slab, then split: probs (B, A) and value (B, 1).
    head = out[:B, :action_size + 1]
    return head[:, :action_size], head[:, action_size:action_size + 1]


def actor_critic_forward(state, packed, action_size, *, tm=None):
    """state: (B, state_size) f32. Returns (action_probs (B, A), value (B, 1))."""
    if tm is None:
        tm = _choose_tm(state.shape[0], _tensorcores_per_chip())
    return _forward_jit(state, packed, action_size=action_size, tm=tm)


# ---------------------------------------------------------------------------
# Synthetic init + pure-JAX reference (mirrors the PyTorch module)
# ---------------------------------------------------------------------------

def init_params(key, state_size, action_size, hidden_size):
    """Deterministic synthetic init (PyTorch-style uniform fan-in bounds)."""
    ks = jax.random.split(key, 8)

    def lin(kw, kb, fan_in, fan_out):
        bound = 1.0 / jnp.sqrt(fan_in)
        w = jax.random.uniform(kw, (fan_in, fan_out), jnp.float32, -bound, bound)
        b = jax.random.uniform(kb, (1, fan_out), jnp.float32, -bound, bound)
        return w, b

    w1, b1 = lin(ks[0], ks[1], state_size, hidden_size)
    w2, b2 = lin(ks[2], ks[3], hidden_size, hidden_size)
    wa, ba = lin(ks[4], ks[5], hidden_size, action_size)
    wc, bc = lin(ks[6], ks[7], hidden_size, 1)
    return (w1, b1, w2, b2, wa, ba, wc, bc)


def reference_forward(state, params):
    w1, b1, w2, b2, wa, ba, wc, bc = params
    h = jnp.maximum(state @ w1 + b1, 0.0)
    h = jnp.maximum(h @ w2 + b2, 0.0)
    probs = jax.nn.softmax(h @ wa + ba, axis=-1)
    value = h @ wc + bc
    return probs, value


if __name__ == "__main__":
    STATE_SIZE, ACTION_SIZE, HIDDEN = 8, 4, 128
    BATCH = 500   # batched rollout; exercises row padding (504 or 512 rows)

    key = jax.random.PRNGKey(0)
    k_state, k_params = jax.random.split(key)
    state = jax.random.normal(k_state, (BATCH, STATE_SIZE), jnp.float32)
    raw_params = init_params(k_params, STATE_SIZE, ACTION_SIZE, HIDDEN)

    # Hoisted, one-time packing of the fused head slab.
    packed, A = pack_params(raw_params)
    packed = jax.block_until_ready(packed)

    probs, value = actor_critic_forward(state, packed, A)
    jax.block_until_ready((probs, value))

    # Sanity check against the pure-JAX reference.
    ref_probs, ref_value = reference_forward(state, raw_params)
    assert probs.shape == (BATCH, ACTION_SIZE)
    assert value.shape == (BATCH, 1)
    assert jnp.allclose(probs, ref_probs, atol=1e-5, rtol=1e-5)
    assert jnp.allclose(value, ref_value, atol=1e-5, rtol=1e-5)
    assert jnp.allclose(jnp.sum(probs, axis=-1), 1.0, atol=1e-5)

    # Also exercise a tiny batch (single 8-row tile) to cover the other grid path.
    small = state[:3]
    p2, v2 = actor_critic_forward(small, packed, A)
    jax.block_until_ready((p2, v2))
    rp2, rv2 = reference_forward(small, raw_params)
    assert jnp.allclose(p2, rp2, atol=1e-5, rtol=1e-5)
    assert jnp.allclose(v2, rv2, atol=1e-5, rtol=1e-5)

    print("KERNEL_OK")
</pallas_src>

<mosaic_0001>
module attributes {stable_mosaic.version = 11 : i64} {
  func.func @actor_critic_kernel(%arg0: i32, %arg1: memref<504x8xf32, #tpu.memory_space<vmem>>, %arg2: memref<8x128xf32, #tpu.memory_space<vmem>>, %arg3: memref<1x128xf32, #tpu.memory_space<vmem>>, %arg4: memref<128x128xf32, #tpu.memory_space<vmem>>, %arg5: memref<1x128xf32, #tpu.memory_space<vmem>>, %arg6: memref<128x128xf32, #tpu.memory_space<vmem>>, %arg7: memref<1x128xf32, #tpu.memory_space<vmem>>, %arg8: memref<504x128xf32, #tpu.memory_space<vmem>>) attributes {dimension_semantics = [#tpu.dimension_semantics<parallel>], iteration_bounds = array<i64: 1>, scalar_prefetch = 0 : i64, scratch_operands = 0 : i64, tpu.core_type = #tpu.core_type<tc>, window_params = [{transform_indices = @transform_0, window_bounds = array<i64: 504, 8>}, {pipeline_mode = #tpu.pipeline_mode<synchronous>, transform_indices = @transform_1, window_bounds = array<i64: 8, 128>}, {pipeline_mode = #tpu.pipeline_mode<synchronous>, transform_indices = @transform_2, window_bounds = array<i64: 1, 128>}, {pipeline_mode = #tpu.pipeline_mode<synchronous>, transform_indices = @transform_3, window_bounds = array<i64: 128, 128>}, {pipeline_mode = #tpu.pipeline_mode<synchronous>, transform_indices = @transform_4, window_bounds = array<i64: 1, 128>}, {pipeline_mode = #tpu.pipeline_mode<synchronous>, transform_indices = @transform_5, window_bounds = array<i64: 128, 128>}, {pipeline_mode = #tpu.pipeline_mode<synchronous>, transform_indices = @transform_6, window_bounds = array<i64: 1, 128>}, {transform_indices = @transform_7, window_bounds = array<i64: 504, 128>}]} {
    %c0 = arith.constant 0 : index
    %c0_0 = arith.constant 0 : index
    %0 = vector.load %arg1[%c0, %c0_0] : memref<504x8xf32, #tpu.memory_space<vmem>>, vector<504x8xf32>
    %c0_1 = arith.constant 0 : index
    %c0_2 = arith.constant 0 : index
    %1 = vector.load %arg2[%c0_1, %c0_2] : memref<8x128xf32, #tpu.memory_space<vmem>>, vector<8x128xf32>
    %cst = arith.constant dense<0.000000e+00> : vector<504x128xf32>
    %2 = tpu.matmul %0, %1, %cst {dimension_numbers = #tpu.dot_dimension_numbers<[1], [0], [0], [1], [0, 0, 1, 1], [], []>} : vector<504x8xf32>, vector<8x128xf32>, vector<504x128xf32> -> vector<504x128xf32>
    %c0_3 = arith.constant 0 : index
    %c0_4 = arith.constant 0 : index
    %3 = vector.load %arg3[%c0_3, %c0_4] : memref<1x128xf32, #tpu.memory_space<vmem>>, vector<1x128xf32>
    %4 = vector.broadcast %3 : vector<1x128xf32> to vector<504x128xf32>
    %5 = arith.addf %2, %4 : vector<504x128xf32>
    %cst_5 = arith.constant 0.000000e+00 : f32
    %6 = vector.broadcast %cst_5 : f32 to vector<504x128xf32>
    %7 = arith.maximumf %5, %6 : vector<504x128xf32>
    %c0_6 = arith.constant 0 : index
    %c0_7 = arith.constant 0 : index
    %8 = vector.load %arg4[%c0_6, %c0_7] : memref<128x128xf32, #tpu.memory_space<vmem>>, vector<128x128xf32>
    %cst_8 = arith.constant dense<0.000000e+00> : vector<504x128xf32>
    %9 = tpu.matmul %7, %8, %cst_8 {dimension_numbers = #tpu.dot_dimension_numbers<[1], [0], [0], [1], [0, 0, 1, 1], [], []>} : vector<504x128xf32>, vector<128x128xf32>, vector<504x128xf32> -> vector<504x128xf32>
    %c0_9 = arith.constant 0 : index
    %c0_10 = arith.constant 0 : index
    %10 = vector.load %arg5[%c0_9, %c0_10] : memref<1x128xf32, #tpu.memory_space<vmem>>, vector<1x128xf32>
    %11 = vector.broadcast %10 : vector<1x128xf32> to vector<504x128xf32>
    %12 = arith.addf %9, %11 : vector<504x128xf32>
    %cst_11 = arith.constant 0.000000e+00 : f32
    %13 = vector.broadcast %cst_11 : f32 to vector<504x128xf32>
    %14 = arith.maximumf %12, %13 : vector<504x128xf32>
    %c0_12 = arith.constant 0 : index
    %c0_13 = arith.constant 0 : index
    %15 = vector.load %arg6[%c0_12, %c0_13] : memref<128x128xf32, #tpu.memory_space<vmem>>, vector<128x128xf32>
    %cst_14 = arith.constant dense<0.000000e+00> : vector<504x128xf32>
    %16 = tpu.matmul %14, %15, %cst_14 {dimension_numbers = #tpu.dot_dimension_numbers<[1], [0], [0], [1], [0, 0, 1, 1], [], []>} : vector<504x128xf32>, vector<128x128xf32>, vector<504x128xf32> -> vector<504x128xf32>
    %c0_15 = arith.constant 0 : index
    %c0_16 = arith.constant 0 : index
    %17 = vector.load %arg7[%c0_15, %c0_16] : memref<1x128xf32, #tpu.memory_space<vmem>>, vector<1x128xf32>
    %18 = vector.broadcast %17 : vector<1x128xf32> to vector<504x128xf32>
    %19 = arith.addf %16, %18 : vector<504x128xf32>
    %20 = tpu.iota {dimensions = array<i32: 1>} : vector<504x128xi32>
    %c4_i32 = arith.constant 4 : i32
    %21 = vector.broadcast %c4_i32 : i32 to vector<504x128xi32>
    %22 = arith.cmpi slt, %20, %21 : vector<504x128xi32>
    %cst_17 = arith.constant -1.000000e+30 : f32
    %23 = vector.broadcast %cst_17 : f32 to vector<504x128xf32>
    %24 = arith.select %22, %19, %23 : vector<504x128xi1>, vector<504x128xf32>
    %cst_18 = arith.constant dense<0xFF800000> : vector<504xf32>
    %25 = vector.multi_reduction <maximumf>, %24, %cst_18 [1] : vector<504x128xf32> to vector<504xf32>
    %26 = vector.shape_cast %25 : vector<504xf32> to vector<504x1xf32>
    %27 = vector.broadcast %26 : vector<504x1xf32> to vector<504x128xf32>
    %28 = arith.subf %24, %27 : vector<504x128xf32>
    %29 = math.exp %28 : vector<504x128xf32>
    %cst_19 = arith.constant dense<0.000000e+00> : vector<504xf32>
    %30 = vector.multi_reduction <add>, %29, %cst_19 [1] : vector<504x128xf32> to vector<504xf32>
    %31 = vector.shape_cast %30 : vector<504xf32> to vector<504x1xf32>
    %32 = tpu.reciprocal %31 : vector<504x1xf32> -> vector<504x1xf32>
    %33 = vector.broadcast %32 : vector<504x1xf32> to vector<504x128xf32>
    %34 = arith.mulf %29, %33 : vector<504x128xf32>
    %c4_i32_20 = arith.constant 4 : i32
    %35 = vector.broadcast %c4_i32_20 : i32 to vector<504x128xi32>
    %36 = arith.cmpi eq, %20, %35 : vector<504x128xi32>
    %cst_21 = arith.constant 0.000000e+00 : f32
    %37 = vector.broadcast %cst_21 : f32 to vector<504x128xf32>
    %38 = arith.select %36, %19, %37 : vector<504x128xi1>, vector<504x128xf32>
    %39 = arith.select %22, %34, %38 : vector<504x128xi1>, vector<504x128xf32>
    %c0_22 = arith.constant 0 : index
    %c0_23 = arith.constant 0 : index
    %40 = vector.load %arg8[%c0_22, %c0_23] : memref<504x128xf32, #tpu.memory_space<vmem>>, vector<504x128xf32>
    tpu.vector_store %arg8[%c0_22, %c0_23], %39 {strides = array<i32>} : memref<504x128xf32, #tpu.memory_space<vmem>>, vector<504x128xf32>,
    return
  }
  func.func @transform_0(%arg0: i32) -> (i32, i32) {
    %c0_i32 = arith.constant 0 : i32
    %c0_i32_0 = arith.constant 0 : i32
    return %arg0, %c0_i32 : i32, i32
  }
  func.func @transform_1(%arg0: i32) -> (i32, i32) {
    %c0_i32 = arith.constant 0 : i32
    %c0_i32_0 = arith.constant 0 : i32
    %c0_i32_1 = arith.constant 0 : i32
    return %c0_i32, %c0_i32_0 : i32, i32
  }
  func.func @transform_2(%arg0: i32) -> (i32, i32) {
    %c0_i32 = arith.constant 0 : i32
    %c0_i32_0 = arith.constant 0 : i32
    %c0_i32_1 = arith.constant 0 : i32
    return %c0_i32, %c0_i32_0 : i32, i32
  }
  func.func @transform_3(%arg0: i32) -> (i32, i32) {
    %c0_i32 = arith.constant 0 : i32
    %c0_i32_0 = arith.constant 0 : i32
    %c0_i32_1 = arith.constant 0 : i32
    return %c0_i32, %c0_i32_0 : i32, i32
  }
  func.func @transform_4(%arg0: i32) -> (i32, i32) {
    %c0_i32 = arith.constant 0 : i32
    %c0_i32_0 = arith.constant 0 : i32
    %c0_i32_1 = arith.constant 0 : i32
    return %c0_i32, %c0_i32_0 : i32, i32
  }
  func.func @transform_5(%arg0: i32) -> (i32, i32) {
    %c0_i32 = arith.constant 0 : i32
    %c0_i32_0 = arith.constant 0 : i32
    %c0_i32_1 = arith.constant 0 : i32
    return %c0_i32, %c0_i32_0 : i32, i32
  }
  func.func @transform_6(%arg0: i32) -> (i32, i32) {
    %c0_i32 = arith.constant 0 : i32
    %c0_i32_0 = arith.constant 0 : i32
    %c0_i32_1 = arith.constant 0 : i32
    return %c0_i32, %c0_i32_0 : i32, i32
  }
  func.func @transform_7(%arg0: i32) -> (i32, i32) {
    %c0_i32 = arith.constant 0 : i32
    %c0_i32_0 = arith.constant 0 : i32
    return %arg0, %c0_i32 : i32, i32
  }
}

</mosaic_0001>

<bundles_post_ra>
// kernel: _forward_jit.1
= control target key start
LH: loop header
LB: loop body
LE: loop exit
PB: predicated region body
PF: predicated region fallthrough
CT: control target
= control target key end

     0   :  { %vm94_vm0 = vcmask 64512   ;;  %s5276_s1 = inlined_call_operand.vmem [shape: f32[8,128], index: 1, kind: input, shape index: {}]   ;;  %s5277_s0 = inlined_call_operand.vmem [shape: f32[504,8], index: 0, kind: input, shape index: {}]   ;;  %s5278_s2 = inlined_call_operand.vmem [shape: f32[1,128], index: 2, kind: input, shape index: {}]   ;;  %s5279_s3 = inlined_call_operand.vmem [shape: f32[128,128], index: 3, kind: input, shape index: {}]   ;;  %s5280_s4 = inlined_call_operand.vmem [shape: f32[1,128], index: 4, kind: input, shape index: {}]   ;;  %s5281_s5 = inlined_call_operand.vmem [shape: f32[128,128], index: 5, kind: input, shape index: {}]   ;;  %s5282_s6 = inlined_call_operand.vmem [shape: f32[1,128], index: 6, kind: input, shape index: {}]   ;;  %s5283_s7 = inlined_call_operand.vmem [shape: f32[504,128], index: 7, kind: output, shape index: {}]  }
   0x1   :  { %v89_v0 = vld [vmem:[%s5276_s1] sm:$0xff]  ;;  %v27_v2 = vld [vmem:[%s5277_s0 + $0x8] sm:$0xff]  ;;  %v28_v3 = vld [vmem:[%s5277_s0 + $0x10] sm:$0xff] }
   0x2   :  { %v26_v1 = vld [vmem:[%s5277_s0] sm:$0xff]  ;;  %299 = vmatpush.msra.mxu0 %v89_v0  ;;  %2777 = vmatpush.msra.mxu3 %v89_v0  ;;  %v29_v4 = vld [vmem:[%s5277_s0 + $0x18] sm:$0xff]  ;;  %v31_v6 = vld [vmem:[%s5277_s0 + $0x28] sm:$0xff] }
   0x3   :  { %2714 = vmatmul.msk.f32.vlgmr.msra.gmra.mxu0 %vm94_vm0, %v26_v1  ;;  %v30_v5 = vld [vmem:[%s5277_s0 + $0x20] sm:$0xff]  ;;  %v32_v7 = vld [vmem:[%s5277_s0 + $0x30] sm:$0xff]  ;;  %v33_v8 = vld [vmem:[%s5277_s0 + $0x38] sm:$0xff] }
   0x4   :  { %v34_v9 = vld [vmem:[%s5277_s0 + $0x40] sm:$0xff]  ;;  %v568_v10 = vld [vmem:[%s5279_s3 + $0x78] sm:$0xff]  ;;  %v567_v11 = vld [vmem:[%s5279_s3 + $0x70] sm:$0xff] }
   0x5   :  { %573 = vmatpush.msra.mxu1 %v568_v10  ;;  %2778 = vmatpush.msrb.mxu3 %v568_v10  ;;  %v566_v12 = vld [vmem:[%s5279_s3 + $0x68] sm:$0xff]  ;;  %v565_v14 = vld [vmem:[%s5279_s3 + $0x60] sm:$0xff]  ;;  %v564_v15 = vld [vmem:[%s5279_s3 + $0x58] sm:$0xff] }
   0x6   :  { %v35_v13 = vld [vmem:[%s5277_s0 + $0x48] sm:$0xff]  ;;  %v563_v16 = vld [vmem:[%s5279_s3 + $0x50] sm:$0xff]  ;;  %v561_v19 = vld [vmem:[%s5279_s3 + $0x40] sm:$0xff] }
   0x7   :  { %574 = vmatpush.msra.mxu1 %v567_v11  ;;  %2779 = vmatpush.msrb.mxu3 %v567_v11  ;;  %v562_v17 = vld [vmem:[%s5279_s3 + $0x48] sm:$0xff]  ;;  %v36_v18 = vld [vmem:[%s5277_s0 + $0x50] sm:$0xff]  ;;  %v560_v20 = vld [vmem:[%s5279_s3 + $0x38] sm:$0xff] }
   0x8   :  { %v559_v21 = vld [vmem:[%s5279_s3 + $0x30] sm:$0xff]  ;;  %v558_v22 = vld [vmem:[%s5279_s3 + $0x28] sm:$0xff]  ;;  %v37_v23 = vld [vmem:[%s5277_s0 + $0x58] sm:$0xff] }
   0x9   :  { %575 = vmatpush.msra.mxu1 %v566_v12  ;;  %2780 = vmatpush.msrb.mxu3 %v566_v12  ;;  %v557_v24 = vld [vmem:[%s5279_s3 + $0x20] sm:$0xff]  ;;  %v556_v25 = vld [vmem:[%s5279_s3 + $0x18] sm:$0xff]  ;;  %v555_v26 = vld [vmem:[%s5279_s3 + $0x10] sm:$0xff] }
   0xa   :  { %v38_v27 = vld [vmem:[%s5277_s0 + $0x60] sm:$0xff]  ;;  %v554_v28 = vld [vmem:[%s5279_s3 + $0x8] sm:$0xff]  ;;  %v40_v31 = vld [vmem:[%s5277_s0 + $0x70] sm:$0xff] }
   0xb   :  { %2715 = vmatmul.msk.f32.gmra.mxu0 %vm94_vm0, %v27_v2  ;;  %576 = vmatpush.msra.mxu1 %v565_v14  ;;  %v553_v29 = vld [vmem:[%s5279_s3] sm:$0xff]  ;;  %v39_v30 = vld [vmem:[%s5277_s0 + $0x68] sm:$0xff]  ;;  %v41_v32 = vld [vmem:[%s5277_s0 + $0x78] sm:$0xff] }
   0xc   :  { %2781 = vmatpush.msrb.mxu3 %v565_v14  ;;  %v3228_v33 = vld [vmem:[%s5278_s2] ss:$0 sm:$0xff]  ;;  %v43_v39 = vld [vmem:[%s5277_s0 + $0x88] sm:$0xff]  ;;  %v44_v43 = vld [vmem:[%s5277_s0 + $0x90] sm:$0xff] }
   0xd   :  { %577 = vmatpush.msra.mxu1 %v564_v15  ;;  %v42_v35 = vld [vmem:[%s5277_s0 + $0x80] sm:$0xff]  ;;  %v45_v47 = vld [vmem:[%s5277_s0 + $0x98] sm:$0xff]  ;;  %v47_v55 = vld [vmem:[%s5277_s0 + $0xa8] sm:$0xff] }
   0xe   :  { %2782 = vmatpush.msrb.mxu3 %v564_v15  ;;  %v46_v51 = vld [vmem:[%s5277_s0 + $0xa0] sm:$0xff]  ;;  %v48_v59 = vld [vmem:[%s5277_s0 + $0xb0] sm:$0xff]  ;;  %v49_v63 = vld [vmem:[%s5277_s0 + $0xb8] sm:$0xff] }
   0xf   :  { %578 = vmatpush.msra.mxu1 %v563_v16  ;;  %v3288_v10 = vld [vmem:[%s5281_s5 + $0x70] sm:$0xff]  ;;  %v3295_v12 = vld [vmem:[%s5281_s5 + $0x68] sm:$0xff]  ;;  %v3307_v14 = vld [vmem:[%s5281_s5 + $0x58] sm:$0xff] }
  0x10   :  { %2783 = vmatpush.msrb.mxu3 %v563_v16  ;;  %v52_v16 = vld [vmem:[%s5277_s0 + $0xd0] sm:$0xff] }
  0x11   :  { %579 = vmatpush.msra.mxu1 %v562_v17 }
  0x12   :  { %2784 = vmatpush.msrb.mxu3 %v562_v17 }
  0x13   :  { %2716 = vmatmul.msk.f32.gmra.mxu0 %vm94_vm0, %v28_v3  ;;  %580 = vmatpush.msra.mxu1 %v561_v19  ;;  %v50_v3 = vld [vmem:[%s5277_s0 + $0xc0] sm:$0xff] }
  0x14   :  { %2785 = vmatpush.msrb.mxu3 %v561_v19 }
  0x15   :  { %581 = vmatpush.msra.mxu1 %v560_v20 }
  0x16   :  { %2786 = vmatpush.msrb.mxu3 %v560_v20  ;;  %v3324_v20 = vld [vmem:[%s5281_s5 + $0x48] sm:$0xff] }
  0x17   :  { %582 = vmatpush.msra.mxu1 %v559_v21 }
  0x18   :  { %2787 = vmatpush.msrb.mxu3 %v559_v21  ;;  %v3330_v21 = vld [vmem:[%s5281_s5 + $0x40] sm:$0xff] }
  0x19   :  { %583 = vmatpush.msra.mxu1 %v558_v22 }
  0x1a   :  { %2788 = vmatpush.msrb.mxu3 %v558_v22  ;;  %v3336_v22 = vld [vmem:[%s5281_s5 + $0x38] sm:$0xff] }
  0x1b   :  { %2717 = vmatmul.msk.f32.gmra.mxu0 %vm94_vm0, %v29_v4  ;;  %584 = vmatpush.msra.mxu1 %v557_v24 }
  0x1c   :  { %2789 = vmatpush.msrb.mxu3 %v557_v24  ;;  %v53_v24 = vld [vmem:[%s5277_s0 + $0xd8] sm:$0xff] }
  0x1d   :  { %585 = vmatpush.msra.mxu1 %v556_v25 }
  0x1e   :  { %2790 = vmatpush.msrb.mxu3 %v556_v25 }
  0x1f   :  { %586 = vmatpush.msra.mxu1 %v555_v26 }
  0x20   :  { %2791 = vmatpush.msrb.mxu3 %v555_v26  ;;  %v3346_v26 = vld [vmem:[%s5281_s5 + $0x30] sm:$0xff] }
  0x21   :  { %587 = vmatpush.msra.mxu1 %v554_v28 }
  0x22   :  { %2792 = vmatpush.msrb.mxu3 %v554_v28  ;;  %v3353_v28 = vld [vmem:[%s5281_s5 + $0x28] sm:$0xff] }
  0x23   :  { %2718 = vmatmul.msk.f32.gmra.mxu0 %vm94_vm0, %v30_v5  ;;  %588 = vmatpush.msra.mxu1 %v553_v29 }
  0x24   :  { %2793 = vmatpush.msrb.mxu3 %v553_v29  ;;  %v3359_v29 = vld [vmem:[%s5281_s5 + $0x20] sm:$0xff] }
  0x2b   :  { %2719 = vmatmul.msk.f32.gmra.mxu0 %vm94_vm0, %v31_v6  ;;  %v3278_v6 = vld [vmem:[%s5281_s5 + $0x78] sm:$0xff] }
  0x2c   :  { %862 = vmatpush.msra.mxu2 %v3278_v6 }
  0x2e   :  { %863 = vmatpush.msra.mxu2 %v3288_v10 }
  0x30   :  { %864 = vmatpush.msra.mxu2 %v3295_v12 }
  0x33   :  { %2720 = vmatmul.msk.f32.gmra.mxu0 %vm94_vm0, %v32_v7 }
  0x3b   :  { %2721 = vmatmul.msk.f32.gmra.mxu0 %vm94_vm0, %v33_v8  ;;  %v51_v8 = vld [vmem:[%s5277_s0 + $0xc8] sm:$0xff] }
  0x43   :  { %2722 = vmatmul.msk.f32.gmra.mxu0 %vm94_vm0, %v34_v9 }
  0x4b   :  { %2723 = vmatmul.msk.f32.gmra.mxu0 %vm94_vm0, %v35_v13  ;;  %v3301_v13 = vld [vmem:[%s5281_s5 + $0x60] sm:$0xff] }
  0x4c   :  { %865 = vmatpush.msra.mxu2 %v3301_v13 }
  0x4e   :  { %866 = vmatpush.msra.mxu2 %v3307_v14 }
  0x53   :  { %2724 = vmatmul.msk.f32.gmra.mxu0 %vm94_vm0, %v36_v18  ;;  %v3317_v18 = vld [vmem:[%s5281_s5 + $0x50] sm:$0xff] }
  0x54   :  { %867 = vmatpush.msra.mxu2 %v3317_v18 }
  0x56   :  { %868 = vmatpush.msra.mxu2 %v3324_v20 }
  0x58   :  { %869 = vmatpush.msra.mxu2 %v3330_v21 }
  0x5a   :  { %870 = vmatpush.msra.mxu2 %v3336_v22 }
  0x5b   :  { %2725 = vmatmul.msk.f32.gmra.mxu0 %vm94_vm0, %v37_v23 }
  0x5c   :  { %871 = vmatpush.msra.mxu2 %v3346_v26 }
  0x5e   :  { %872 = vmatpush.msra.mxu2 %v3353_v28 }
  0x60   :  { %873 = vmatpush.msra.mxu2 %v3359_v29 }
  0x63   :  { %2726 = vmatmul.msk.f32.gmra.mxu0 %vm94_vm0, %v38_v27 }
  0x6b   :  { %2727 = vmatmul.msk.f32.gmra.mxu0 %vm94_vm0, %v39_v30  ;;  %v3365_v30 = vld [vmem:[%s5281_s5 + $0x18] sm:$0xff] }
  0x6c   :  { %874 = vmatpush.msra.mxu2 %v3365_v30 }
  0x73   :  { %2728 = vmatmul.msk.f32.gmra.mxu0 %vm94_vm0, %v40_v31 }
  0x7b   :  { %2729 = vmatmul.msk.f32.gmra.mxu0 %vm94_vm0, %v41_v32  ;;  %v54_v32 = vld [vmem:[%s5277_s0 + $0xe0] sm:$0xff] }
  0x80   :  { %v301_v34 = vpop.f32.mrf.mxu0 }
  0x81   :  { %v302_v36 = vadd.f32 %v3228_v33, %v301_v34 }
  0x83   :  { %2730 = vmatmul.msk.f32.gmra.mxu0 %vm94_vm0, %v42_v35  ;;  %v490_v37 = vmax.f32 %v302_v36, 0.0  ;;  %v3375_v35 = vld [vmem:[%s5281_s5 + $0x10] sm:$0xff] }
  0x84   :  { %875 = vmatpush.msra.mxu2 %v3375_v35 }
  0x85   :  { %589 = vmatmul.f32.vlgmr.msra.gmra.mxu1 %v490_v37  ;;  %v3382_v37 = vld [vmem:[%s5281_s5 + $0x8] sm:$0xff] }
  0x86   :  { %876 = vmatpush.msra.mxu2 %v3382_v37 }
  0x88   :  { %v304_v38 = vpop.f32.mrf.mxu0 }
  0x89   :  { %v305_v40 = vadd.f32 %v3228_v33, %v304_v38  ;;  %v3388_v38 = vld [vmem:[%s5281_s5] sm:$0xff] }
  0x8a   :  { %877 = vmatpush.msra.mxu2 %v3388_v38 }
  0x8b   :  { %2731 = vmatmul.msk.f32.gmra.mxu0 %vm94_vm0, %v43_v39  ;;  %v491_v41 = vmax.f32 %v305_v40, 0.0  ;;  %v55_v40 = vld [vmem:[%s5277_s0 + $0xe8] sm:$0xff] }
  0x8d   :  { %592 = vmatmul.f32.gmra.mxu1 %v491_v41 }
  0x90   :  { %v307_v42 = vpop.f32.mrf.mxu0 }
  0x91   :  { %v308_v44 = vadd.f32 %v3228_v33, %v307_v42 }
  0x93   :  { %2732 = vmatmul.msk.f32.gmra.mxu0 %vm94_vm0, %v44_v43  ;;  %v492_v45 = vmax.f32 %v308_v44, 0.0  ;;  %v56_v44 = vld [vmem:[%s5277_s0 + $0xf0] sm:$0xff] }
  0x95   :  { %595 = vmatmul.f32.gmra.mxu1 %v492_v45 }
  0x98   :  { %v310_v46 = vpop.f32.mrf.mxu0 }
  0x99   :  { %v311_v48 = vadd.f32 %v3228_v33, %v310_v46 }
  0x9b   :  { %2733 = vmatmul.msk.f32.gmra.mxu0 %vm94_vm0, %v45_v47  ;;  %v493_v49 = vmax.f32 %v311_v48, 0.0  ;;  %v57_v48 = vld [vmem:[%s5277_s0 + $0xf8] sm:$0xff] }
  0x9d   :  { %598 = vmatmul.f32.gmra.mxu1 %v493_v49 }
  0xa0   :  { %v313_v50 = vpop.f32.mrf.mxu0 }
  0xa1   :  { %v314_v52 = vadd.f32 %v3228_v33, %v313_v50 }
  0xa3   :  { %2734 = vmatmul.msk.f32.gmra.mxu0 %vm94_vm0, %v46_v51  ;;  %v494_v53 = vmax.f32 %v314_v52, 0.0  ;;  %v3409_v51 = vld [vmem:[%s5280_s4] ss:$0 sm:$0xff] }
  0xa5   :  { %601 = vmatmul.f32.gmra.mxu1 %v494_v53  ;;  %v58_v53 = vld [vmem:[%s5277_s0 + $0x100] sm:$0xff] }
  0xa8   :  { %v316_v54 = vpop.f32.mrf.mxu0 }
  0xa9   :  { %v317_v56 = vadd.f32 %v3228_v33, %v316_v54 }
  0xab   :  { %2735 = vmatmul.msk.f32.gmra.mxu0 %vm94_vm0, %v47_v55  ;;  %v495_v57 = vmax.f32 %v317_v56, 0.0 }
  0xad   :  { %604 = vmatmul.f32.gmra.mxu1 %v495_v57 }
  0xb0   :  { %v319_v58 = vpop.f32.mrf.mxu0 }
  0xb1   :  { %v320_v60 = vadd.f32 %v3228_v33, %v319_v58 }
  0xb3   :  { %2736 = vmatmul.msk.f32.gmra.mxu0 %vm94_vm0, %v48_v59  ;;  %v496_v61 = vmax.f32 %v320_v60, 0.0  ;;  %v59_v60 = vld [vmem:[%s5277_s0 + $0x108] sm:$0xff] }
  0xb5   :  { %607 = vmatmul.f32.gmra.mxu1 %v496_v61 }
  0xb8   :  { %v322_v62 = vpop.f32.mrf.mxu0 }
  0xb9   :  { %v323_v0 = vadd.f32 %v3228_v33, %v322_v62 }
  0xbb   :  { %2737 = vmatmul.msk.f32.gmra.mxu0 %vm94_vm0, %v49_v63  ;;  %v497_v1 = vmax.f32 %v323_v0, 0.0 }
  0xbd   :  { %610 = vmatmul.f32.gmra.mxu1 %v497_v1 }
  0xc0   :  { %v325_v2 = vpop.f32.mrf.mxu0 }
  0xc1   :  { %v326_v4 = vadd.f32 %v3228_v33, %v325_v2 }
  0xc3   :  { %2738 = vmatmul.msk.f32.gmra.mxu0 %vm94_vm0, %v50_v3  ;;  %v498_v5 = vmax.f32 %v326_v4, 0.0  ;;  %v60_v3 = vld [vmem:[%s5277_s0 + $0x110] sm:$0xff] }
  0xc5   :  { %613 = vmatmul.f32.gmra.mxu1 %v498_v5 }
  0xc8   :  { %v328_v7 = vpop.f32.mrf.mxu0 }
  0xc9   :  { %v329_v9 = vadd.f32 %v3228_v33, %v328_v7 }
  0xcb   :  { %2739 = vmatmul.msk.f32.gmra.mxu0 %vm94_vm0, %v51_v8  ;;  %v499_v11 = vmax.f32 %v329_v9, 0.0 }
  0xcd   :  { %616 = vmatmul.f32.gmra.mxu1 %v499_v11 }
  0xd0   :  { %v331_v15 = vpop.f32.mrf.mxu0 }
  0xd1   :  { %v332_v17 = vadd.f32 %v3228_v33, %v331_v15  ;;  %v61_v15 = vld [vmem:[%s5277_s0 + $0x118] sm:$0xff] }
  0xd3   :  { %2740 = vmatmul.msk.f32.gmra.mxu0 %vm94_vm0, %v52_v16  ;;  %v500_v19 = vmax.f32 %v332_v17, 0.0 }
  0xd5   :  { %619 = vmatmul.f32.gmra.mxu1 %v500_v19 }
  0xd8   :  { %v334_v23 = vpop.f32.mrf.mxu0 }
  0xd9   :  { %v335_v25 = vadd.f32 %v3228_v33, %v334_v23 }
  0xdb   :  { %2741 = vmatmul.msk.f32.gmra.mxu0 %vm94_vm0, %v53_v24  ;;  %v501_v27 = vmax.f32 %v335_v25, 0.0 }
  0xdd   :  { %622 = vmatmul.f32.gmra.mxu1 %v501_v27  ;;  %v62_v27 = vld [vmem:[%s5277_s0 + $0x120] sm:$0xff] }
  0xe0   :  { %v337_v31 = vpop.f32.mrf.mxu0 }
  0xe1   :  { %v338_v34 = vadd.f32 %v3228_v33, %v337_v31 }
  0xe3   :  { %2742 = vmatmul.msk.f32.gmra.mxu0 %vm94_vm0, %v54_v32  ;;  %v502_v36 = vmax.f32 %v338_v34, 0.0 }
  0xe5   :  { %625 = vmatmul.f32.gmra.mxu1 %v502_v36 }
  0xe8   :  { %v340_v39 = vpop.f32.mrf.mxu0 }
  0xe9   :  { %v341_v41 = vadd.f32 %v3228_v33, %v340_v39 }
  0xeb   :  { %2743 = vmatmul.msk.f32.gmra.mxu0 %vm94_vm0, %v55_v40  ;;  %v503_v42 = vmax.f32 %v341_v41, 0.0  ;;  %v63_v41 = vld [vmem:[%s5277_s0 + $0x128] sm:$0xff] }
  0xed   :  { %628 = vmatmul.f32.gmra.mxu1 %v503_v42 }
  0xf0   :  { %v343_v43 = vpop.f32.mrf.mxu0 }
  0xf1   :  { %v344_v45 = vadd.f32 %v3228_v33, %v343_v43 }
  0xf3   :  { %2744 = vmatmul.msk.f32.gmra.mxu0 %vm94_vm0, %v56_v44  ;;  %v504_v46 = vmax.f32 %v344_v45, 0.0 }
  0xf5   :  { %631 = vmatmul.f32.gmra.mxu1 %v504_v46 }
  0xf8   :  { %v346_v47 = vpop.f32.mrf.mxu0 }
  0xf9   :  { %v347_v49 = vadd.f32 %v3228_v33, %v346_v47 }
  0xfb   :  { %2745 = vmatmul.msk.f32.gmra.mxu0 %vm94_vm0, %v57_v48  ;;  %v505_v50 = vmax.f32 %v347_v49, 0.0  ;;  %v64_v48 = vld [vmem:[%s5277_s0 + $0x130] sm:$0xff] }
  0xfd   :  { %634 = vmatmul.f32.gmra.mxu1 %v505_v50 }
 0x100   :  { %v349_v52 = vpop.f32.mrf.mxu0 }
 0x101   :  { %v350_v54 = vadd.f32 %v3228_v33, %v349_v52 }
 0x102   :  { %v590_v55 = vpop.f32.mrf.mxu1 }
 0x103   :  { %v591_v56 = vadd.f32 %v3409_v51, %v590_v55  ;;  %2746 = vmatmul.msk.f32.gmra.mxu0 %vm94_vm0, %v58_v53  ;;  %v506_v57 = vmax.f32 %v350_v54, 0.0 }
 0x105   :  { %637 = vmatmul.f32.gmra.mxu1 %v506_v57  ;;  %v779_v58 = vmax.f32 %v591_v56, 0.0  ;;  %v65_v56 = vld [vmem:[%s5277_s0 + $0x138] sm:$0xff] }
 0x107   :  { %878 = vmatmul.f32.vlgmr.msra.gmra.mxu2 %v779_v58 }
 0x108   :  { %v352_v59 = vpop.f32.mrf.mxu0 }
 0x109   :  { %v353_v61 = vadd.f32 %v3228_v33, %v352_v59 }
 0x10a   :  { %v593_v62 = vpop.f32.mrf.mxu1 }
 0x10b   :  { %v594_v63 = vadd.f32 %v3409_v51, %v593_v62  ;;  %2747 = vmatmul.msk.f32.gmra.mxu0 %vm94_vm0, %v59_v60  ;;  %v507_v0 = vmax.f32 %v353_v61, 0.0 }
 0x10d   :  { %640 = vmatmul.f32.gmra.mxu1 %v507_v0  ;;  %v780_v1 = vmax.f32 %v594_v63, 0.0  ;;  %v66_v63 = vld [vmem:[%s5277_s0 + $0x140] sm:$0xff] }
 0x10f   :  { %881 = vmatmul.f32.gmra.mxu2 %v780_v1 }
 0x110   :  { %v355_v2 = vpop.f32.mrf.mxu0 }
 0x111   :  { %v356_v4 = vadd.f32 %v3228_v33, %v355_v2 }
 0x112   :  { %v596_v5 = vpop.f32.mrf.mxu1 }
 0x113   :  { %v597_v7 = vadd.f32 %v3409_v51, %v596_v5  ;;  %2748 = vmatmul.msk.f32.gmra.mxu0 %vm94_vm0, %v60_v3  ;;  %v508_v8 = vmax.f32 %v356_v4, 0.0 }
 0x115   :  { %643 = vmatmul.f32.gmra.mxu1 %v508_v8  ;;  %v781_v9 = vmax.f32 %v597_v7, 0.0  ;;  %v67_v7 = vld [vmem:[%s5277_s0 + $0x148] sm:$0xff] }
 0x117   :  { %884 = vmatmul.f32.gmra.mxu2 %v781_v9 }
 0x118   :  { %v358_v11 = vpop.f32.mrf.mxu0 }
 0x119   :  { %v359_v16 = vadd.f32 %v3228_v33, %v358_v11 }
 0x11a   :  { %v599_v17 = vpop.f32.mrf.mxu1 }
 0x11b   :  { %v600_v19 = vadd.f32 %v3409_v51, %v599_v17  ;;  %2749 = vmatmul.msk.f32.gmra.mxu0 %vm94_vm0, %v61_v15  ;;  %v509_v23 = vmax.f32 %v359_v16, 0.0 }
 0x11d   :  { %646 = vmatmul.f32.gmra.mxu1 %v509_v23  ;;  %v782_v24 = vmax.f32 %v600_v19, 0.0  ;;  %v68_v19 = vld [vmem:[%s5277_s0 + $0x150] sm:$0xff] }
 0x11f   :  { %887 = vmatmul.f32.gmra.mxu2 %v782_v24 }
 0x120   :  { %v361_v25 = vpop.f32.mrf.mxu0 }
 0x121   :  { %v362_v31 = vadd.f32 %v3228_v33, %v361_v25 }
 0x122   :  { %v602_v32 = vpop.f32.mrf.mxu1 }
 0x123   :  { %v603_v34 = vadd.f32 %v3409_v51, %v602_v32  ;;  %2750 = vmatmul.msk.f32.gmra.mxu0 %vm94_vm0, %v62_v27  ;;  %v510_v36 = vmax.f32 %v362_v31, 0.0 }
 0x125   :  { %649 = vmatmul.f32.gmra.mxu1 %v510_v36  ;;  %v783_v39 = vmax.f32 %v603_v34, 0.0  ;;  %v69_v34 = vld [vmem:[%s5277_s0 + $0x158] sm:$0xff] }
 0x127   :  { %890 = vmatmul.f32.gmra.mxu2 %v783_v39 }
 0x128   :  { %v364_v40 = vpop.f32.mrf.mxu0 }
 0x129   :  { %v365_v42 = vadd.f32 %v3228_v33, %v364_v40 }
 0x12a   :  { %v605_v43 = vpop.f32.mrf.mxu1 }
 0x12b   :  { %v606_v44 = vadd.f32 %v3409_v51, %v605_v43  ;;  %2751 = vmatmul.msk.f32.gmra.mxu0 %vm94_vm0, %v63_v41  ;;  %v511_v45 = vmax.f32 %v365_v42, 0.0 }
 0x12d   :  { %652 = vmatmul.f32.gmra.mxu1 %v511_v45  ;;  %v784_v46 = vmax.f32 %v606_v44, 0.0  ;;  %v70_v44 = vld [vmem:[%s5277_s0 + $0x160] sm:$0xff] }
 0x12f   :  { %893 = vmatmul.f32.gmra.mxu2 %v784_v46 }
 0x130   :  { %v367_v47 = vpop.f32.mrf.mxu0 }
 0x131   :  { %v368_v49 = vadd.f32 %v3228_v33, %v367_v47 }
 0x132   :  { %v608_v50 = vpop.f32.mrf.mxu1 }
 0x133   :  { %v609_v52 = vadd.f32 %v3409_v51, %v608_v50  ;;  %2752 = vmatmul.msk.f32.gmra.mxu0 %vm94_vm0, %v64_v48  ;;  %v512_v53 = vmax.f32 %v368_v49, 0.0 }
 0x135   :  { %655 = vmatmul.f32.gmra.mxu1 %v512_v53  ;;  %v785_v54 = vmax.f32 %v609_v52, 0.0  ;;  %v71_v52 = vld [vmem:[%s5277_s0 + $0x168] sm:$0xff] }
 0x137   :  { %896 = vmatmul.f32.gmra.mxu2 %v785_v54 }
 0x138   :  { %v370_v55 = vpop.f32.mrf.mxu0 }
 0x139   :  { %v371_v57 = vadd.f32 %v3228_v33, %v370_v55 }
 0x13a   :  { %v611_v58 = vpop.f32.mrf.mxu1 }
 0x13b   :  { %v612_v59 = vadd.f32 %v3409_v51, %v611_v58  ;;  %2753 = vmatmul.msk.f32.gmra.mxu0 %vm94_vm0, %v65_v56  ;;  %v513_v60 = vmax.f32 %v371_v57, 0.0  ;;  %v76_v57 = vld [vmem:[%s5277_s0 + $0x190] sm:$0xff] }
 0x13c   :  { %2764 = vmatmul.msk.f32.vlgmr.msra.gmra.mxu3 %vm94_vm0, %v76_v57 }
 0x13d   :  { %658 = vmatmul.f32.gmra.mxu1 %v513_v60  ;;  %v786_v61 = vmax.f32 %v612_v59, 0.0  ;;  %2794 = vmatpush.msra.mxu3 %v3278_v6  ;;  %v72_v60 = vld [vmem:[%s5277_s0 + $0x170] sm:$0xff]  ;;  %v77_v6 = vld [vmem:[%s5277_s0 + $0x198] sm:$0xff] }
 0x13f   :  { %899 = vmatmul.f32.gmra.mxu2 %v786_v61  ;;  %2795 = vmatpush.msra.mxu3 %v3288_v10 }
 0x140   :  { %v373_v62 = vpop.f32.mrf.mxu0 }
 0x141   :  { %v374_v0 = vadd.f32 %v3228_v33, %v373_v62  ;;  %2796 = vmatpush.msra.mxu3 %v3295_v12  ;;  %v73_v12 = vld [vmem:[%s5277_s0 + $0x178] sm:$0xff] }
 0x142   :  { %v614_v1 = vpop.f32.mrf.mxu1 }
 0x143   :  { %v514_v2 = vmax.f32 %v374_v0, 0.0  ;;  %v615_v3 = vadd.f32 %v3409_v51, %v614_v1  ;;  %2754 = vmatmul.msk.f32.gmra.mxu0 %vm94_vm0, %v66_v63  ;;  %2797 = vmatpush.msra.mxu3 %v3301_v13 }
 0x144   :  { %2765 = vmatmul.msk.f32.gmra.mxu3 %vm94_vm0, %v77_v6 }
 0x145   :  { %661 = vmatmul.f32.gmra.mxu1 %v514_v2  ;;  %v787_v4 = vmax.f32 %v615_v3, 0.0  ;;  %2798 = vmatpush.msra.mxu3 %v3307_v14  ;;  %v78_v14 = vld [vmem:[%s5277_s0 + $0x1a0] sm:$0xff] }
 0x147   :  { %902 = vmatmul.f32.gmra.mxu2 %v787_v4  ;;  %2799 = vmatpush.msra.mxu3 %v3317_v18 }
 0x148   :  { %v376_v5 = vpop.f32.mrf.mxu0 }
 0x149   :  { %v377_v8 = vadd.f32 %v3228_v33, %v376_v5  ;;  %2800 = vmatpush.msra.mxu3 %v3324_v20  ;;  %v74_v20 = vld [vmem:[%s5277_s0 + $0x180] sm:$0xff] }
 0x14a   :  { %v617_v9 = vpop.f32.mrf.mxu1 }
 0x14b   :  { %v515_v11 = vmax.f32 %v377_v8, 0.0  ;;  %v618_v15 = vadd.f32 %v3409_v51, %v617_v9  ;;  %2755 = vmatmul.msk.f32.gmra.mxu0 %vm94_vm0, %v67_v7  ;;  %2801 = vmatpush.msra.mxu3 %v3330_v21  ;;  %v1068_v9 = vlaneseq }
 0x14c   :  { %2766 = vmatmul.msk.f32.gmra.mxu3 %vm94_vm0, %v78_v14 }
 0x14d   :  { %664 = vmatmul.f32.gmra.mxu1 %v515_v11  ;;  %v788_v16 = vmax.f32 %v618_v15, 0.0  ;;  %2802 = vmatpush.msra.mxu3 %v3336_v22  ;;  %v79_v22 = vld [vmem:[%s5277_s0 + $0x1a8] sm:$0xff] }
 0x14f   :  { %905 = vmatmul.f32.gmra.mxu2 %v788_v16  ;;  %2803 = vmatpush.msra.mxu3 %v3346_v26  ;;  %v3541_v26 = vand.u32 127, %v1068_v9 }
 0x150   :  { %v379_v17 = vpop.f32.mrf.mxu0 }
 0x151   :  { %v380_v23 = vadd.f32 %v3228_v33, %v379_v17  ;;  %2804 = vmatpush.msra.mxu3 %v3353_v28  ;;  %v3547_v28 = vld [vmem:[%s5282_s6] ss:$0 sm:$0xff]  ;;  %v75_v17 = vld [vmem:[%s5277_s0 + $0x188] sm:$0xff]  ;;  %vm1070_vm1 = vcmp.lt.s32.totalorder %v3541_v26, 4  ;;  %vm2520_vm4 = vcmp.eq.s32.totalorder %v3541_v26, 4 }
 0x152   :  { %v620_v24 = vpop.f32.mrf.mxu1 }
 0x153   :  { %v516_v25 = vmax.f32 %v380_v23, 0.0  ;;  %v621_v27 = vadd.f32 %v3409_v51, %v620_v24  ;;  %2756 = vmatmul.msk.f32.gmra.mxu0 %vm94_vm0, %v68_v19  ;;  %2805 = vmatpush.msra.mxu3 %v3359_v29 }
 0x154   :  { %2767 = vmatmul.msk.f32.gmra.mxu3 %vm94_vm0, %v79_v22  ;;  %v85_v22 = vld [vmem:[%s5277_s0 + $0x1d8] sm:$0xff] }
 0x155   :  { %667 = vmatmul.f32.gmra.mxu1 %v516_v25  ;;  %v789_v31 = vmax.f32 %v621_v27, 0.0  ;;  %2806 = vmatpush.msra.mxu3 %v3365_v30 }
 0x157   :  { %908 = vmatmul.f32.gmra.mxu2 %v789_v31  ;;  %2807 = vmatpush.msra.mxu3 %v3375_v35  ;;  %v80_v35 = vld [vmem:[%s5277_s0 + $0x1b0] sm:$0xff] }
 0x158   :  { %v382_v32 = vpop.f32.mrf.mxu0 }
 0x159   :  { %v383_v36 = vadd.f32 %v3228_v33, %v382_v32  ;;  %2808 = vmatpush.msra.mxu3 %v3382_v37 }
 0x15a   :  { %v623_v39 = vpop.f32.mrf.mxu1 }
 0x15b   :  { %v517_v40 = vmax.f32 %v383_v36, 0.0  ;;  %v624_v41 = vadd.f32 %v3409_v51, %v623_v39  ;;  %2757 = vmatmul.msk.f32.gmra.mxu0 %vm94_vm0, %v69_v34  ;;  %2809 = vmatpush.msra.mxu3 %v3388_v38 }
 0x15c   :  { %2768 = vmatmul.msk.f32.gmra.mxu3 %vm94_vm0, %v80_v35 }
 0x15d   :  { %670 = vmatmul.f32.gmra.mxu1 %v517_v40  ;;  %v790_v42 = vmax.f32 %v624_v41, 0.0  ;;  %v81_v41 = vld [vmem:[%s5277_s0 + $0x1b8] sm:$0xff] }
 0x15f   :  { %911 = vmatmul.f32.gmra.mxu2 %v790_v42 }
 0x160   :  { %v385_v43 = vpop.f32.mrf.mxu0 }
 0x161   :  { %v386_v45 = vadd.f32 %v3228_v33, %v385_v43 }
 0x162   :  { %v626_v46 = vpop.f32.mrf.mxu1 }
 0x163   :  { %v518_v47 = vmax.f32 %v386_v45, 0.0  ;;  %v627_v48 = vadd.f32 %v3409_v51, %v626_v46  ;;  %2758 = vmatmul.msk.f32.gmra.mxu0 %vm94_vm0, %v70_v44 }
 0x164   :  { %2769 = vmatmul.msk.f32.gmra.mxu3 %vm94_vm0, %v81_v41 }
 0x165   :  { %673 = vmatmul.f32.gmra.mxu1 %v518_v47  ;;  %v791_v49 = vmax.f32 %v627_v48, 0.0 }
 0x167   :  { %914 = vmatmul.f32.gmra.mxu2 %v791_v49 }
 0x168   :  { %v388_v50 = vpop.f32.mrf.mxu0 }
 0x169   :  { %v389_v53 = vadd.f32 %v3228_v33, %v388_v50 }
 0x16a   :  { %v629_v54 = vpop.f32.mrf.mxu1 }
 0x16b   :  { %v519_v55 = vmax.f32 %v389_v53, 0.0  ;;  %v630_v56 = vadd.f32 %v3409_v51, %v629_v54  ;;  %2759 = vmatmul.msk.f32.gmra.mxu0 %vm94_vm0, %v71_v52  ;;  %v82_v52 = vld [vmem:[%s5277_s0 + $0x1c0] sm:$0xff] }
 0x16c   :  { %2770 = vmatmul.msk.f32.gmra.mxu3 %vm94_vm0, %v82_v52 }
 0x16d   :  { %676 = vmatmul.f32.gmra.mxu1 %v519_v55  ;;  %v792_v58 = vmax.f32 %v630_v56, 0.0 }
 0x16f   :  { %917 = vmatmul.f32.gmra.mxu2 %v792_v58 }
 0x170   :  { %v391_v59 = vpop.f32.mrf.mxu0 }
 0x171   :  { %v392_v61 = vadd.f32 %v3228_v33, %v391_v59 }
 0x172   :  { %v632_v62 = vpop.f32.mrf.mxu1 }
 0x173   :  { %v520_v63 = vmax.f32 %v392_v61, 0.0  ;;  %v633_v0 = vadd.f32 %v3409_v51, %v632_v62  ;;  %2760 = vmatmul.msk.f32.gmra.mxu0 %vm94_vm0, %v72_v60  ;;  %v83_v62 = vld [vmem:[%s5277_s0 + $0x1c8] sm:$0xff] }
 0x174   :  { %2771 = vmatmul.msk.f32.gmra.mxu3 %vm94_vm0, %v83_v62 }
 0x175   :  { %679 = vmatmul.f32.gmra.mxu1 %v520_v63  ;;  %v793_v1 = vmax.f32 %v633_v0, 0.0 }
 0x177   :  { %920 = vmatmul.f32.gmra.mxu2 %v793_v1 }
 0x178   :  { %v394_v10 = vpop.f32.mrf.mxu0 }
 0x179   :  { %v395_v2 = vadd.f32 %v3228_v33, %v394_v10 }
 0x17a   :  { %v635_v3 = vpop.f32.mrf.mxu1 }
 0x17b   :  { %v521_v13 = vmax.f32 %v395_v2, 0.0  ;;  %v636_v4 = vadd.f32 %v3409_v51, %v635_v3  ;;  %2761 = vmatmul.msk.f32.gmra.mxu0 %vm94_vm0, %v73_v12 }
 0x17d   :  { %682 = vmatmul.f32.gmra.mxu1 %v521_v13  ;;  %v794_v5 = vmax.f32 %v636_v4, 0.0  ;;  %v84_v4 = vld [vmem:[%s5277_s0 + $0x1d0] sm:$0xff] }
 0x17e   :  { %2772 = vmatmul.msk.f32.gmra.mxu3 %vm94_vm0, %v84_v4 }
 0x17f   :  { %923 = vmatmul.f32.gmra.mxu2 %v794_v5 }
 0x180   :  { %v397_v18 = vpop.f32.mrf.mxu0 }
 0x181   :  { %v398_v7 = vadd.f32 %v3228_v33, %v397_v18 }
 0x182   :  { %v638_v8 = vpop.f32.mrf.mxu1 }
 0x183   :  { %v522_v21 = vmax.f32 %v398_v7, 0.0  ;;  %v639_v11 = vadd.f32 %v3409_v51, %v638_v8  ;;  %2762 = vmatmul.msk.f32.gmra.mxu0 %vm94_vm0, %v74_v20 }
 0x185   :  { %685 = vmatmul.f32.gmra.mxu1 %v522_v21  ;;  %v795_v15 = vmax.f32 %v639_v11, 0.0 }
 0x186   :  { %2773 = vmatmul.msk.f32.gmra.mxu3 %vm94_vm0, %v85_v22 }
 0x187   :  { %926 = vmatmul.f32.gmra.mxu2 %v795_v15 }
 0x188   :  { %v400_v16 = vpop.f32.mrf.mxu0 }
 0x189   :  { %v401_v29 = vadd.f32 %v3228_v33, %v400_v16 }
 0x18a   :  { %v641_v19 = vpop.f32.mrf.mxu1  ;;  %v879_v23 = vpop.f32.mrf.mxu2 }
 0x18b   :  { %v523_v30 = vmax.f32 %v401_v29, 0.0  ;;  %v642_v24 = vadd.f32 %v3409_v51, %v641_v19  ;;  %v3558_v25 = vadd.f32 %v3547_v28, %v879_v23  ;;  %2763 = vmatmul.msk.f32.gmra.mxu0 %vm94_vm0, %v75_v17 }
 0x18d   :  { %688 = vmatmul.f32.gmra.mxu1 %v523_v30  ;;  %v3568_v27 = vsel %vm1070_vm1, %v3558_v25, -1e+30  ;;  %v796_v37 = vmax.f32 %v642_v24, 0.0 }
 0x18e   :  { %1134 = vmax.xlane.f32.xlu0 %v3568_v27 }
 0x18f   :  { %929 = vmatmul.f32.gmra.mxu2 %v796_v37  ;;  %v86_v37 = vld [vmem:[%s5277_s0 + $0x1e0] sm:$0xff] }
 0x190   :  { %v403_v31 = vpop.f32.mrf.mxu0  ;;  %2774 = vmatmul.msk.f32.gmra.mxu3 %vm94_vm0, %v86_v37 }
 0x191   :  { %v404_v32 = vadd.f32 %v3228_v33, %v403_v31 }
 0x192   :  { %v644_v34 = vpop.f32.mrf.mxu1  ;;  %v882_v36 = vpop.f32.mrf.mxu2 }
 0x193   :  { %v524_v39 = vmax.f32 %v404_v32, 0.0  ;;  %v645_v38 = vadd.f32 %v3409_v51, %v644_v34  ;;  %v3575_v40 = vadd.f32 %v3547_v28, %v882_v36 }
 0x195   :  { %691 = vmatmul.f32.gmra.mxu1 %v524_v39  ;;  %v3583_v42 = vsel %vm1070_vm1, %v3575_v40, -1e+30  ;;  %v797_v43 = vmax.f32 %v645_v38, 0.0 }
 0x196   :  { %1136 = vmax.xlane.f32.xlu0 %v3583_v42 }
 0x197   :  { %932 = vmatmul.f32.gmra.mxu2 %v797_v43 }
 0x198   :  { %v406_v44 = vpop.f32.mrf.mxu0 }
 0x199   :  { %v407_v45 = vadd.f32 %v3228_v33, %v406_v44 }
 0x19a   :  { %v647_v46 = vpop.f32.mrf.mxu1  ;;  %v885_v47 = vpop.f32.mrf.mxu2 }
 0x19b   :  { %v525_v48 = vmax.f32 %v407_v45, 0.0  ;;  %v648_v49 = vadd.f32 %v3409_v51, %v647_v46  ;;  %v3590_v50 = vadd.f32 %v3547_v28, %v885_v47  ;;  %v87_v45 = vld [vmem:[%s5277_s0 + $0x1e8] sm:$0xff] }
 0x19c   :  { %2775 = vmatmul.msk.f32.gmra.mxu3 %vm94_vm0, %v87_v45 }
 0x19d   :  { %694 = vmatmul.f32.gmra.mxu1 %v525_v48  ;;  %v3598_v53 = vsel %vm1070_vm1, %v3590_v50, -1e+30  ;;  %v798_v54 = vmax.f32 %v648_v49, 0.0 }
 0x19e   :  { %1138 = vmax.xlane.f32.xlu1 %v3598_v53 }
 0x19f   :  { %935 = vmatmul.f32.gmra.mxu2 %v798_v54 }
 0x1a0   :  { %v409_v55 = vpop.f32.mrf.mxu0 }
 0x1a1   :  { %v410_v56 = vadd.f32 %v3228_v33, %v409_v55 }
 0x1a2   :  { %v650_v57 = vpop.f32.mrf.mxu1  ;;  %v888_v58 = vpop.f32.mrf.mxu2 }
 0x1a3   :  { %v526_v59 = vmax.f32 %v410_v56, 0.0  ;;  %v651_v60 = vadd.f32 %v3409_v51, %v650_v57  ;;  %v3605_v61 = vadd.f32 %v3547_v28, %v888_v58  ;;  %v88_v58 = vld [vmem:[%s5277_s0 + $0x1f0] sm:$0xff] }
 0x1a4   :  { %2776 = vmatmul.msk.f32.gmra.mxu3 %vm94_vm0, %v88_v58 }
 0x1a5   :  { %697 = vmatmul.f32.gmra.mxu1 %v526_v59  ;;  %v3613_v63 = vsel %vm1070_vm1, %v3605_v61, -1e+30  ;;  %v799_v0 = vmax.f32 %v651_v60, 0.0 }
 0x1a6   :  { %1140 = vmax.xlane.f32.xlu1 %v3613_v63 }
 0x1a7   :  { %938 = vmatmul.f32.gmra.mxu2 %v799_v0 }
 0x1a8   :  { %v412_v6 = vpop.f32.mrf.mxu0 }
 0x1a9   :  { %v413_v1 = vadd.f32 %v3228_v33, %v412_v6 }
 0x1aa   :  { %v653_v10 = vpop.f32.mrf.mxu1  ;;  %v891_v12 = vpop.f32.mrf.mxu2 }
 0x1ab   :  { %v527_v2 = vmax.f32 %v413_v1, 0.0  ;;  %v654_v3 = vadd.f32 %v3409_v51, %v653_v10  ;;  %v3620_v13 = vadd.f32 %v3547_v28, %v891_v12 }
 0x1ad   :  { %700 = vmatmul.f32.gmra.mxu1 %v527_v2  ;;  %v3628_v14 = vsel %vm1070_vm1, %v3620_v13, -1e+30  ;;  %v800_v5 = vmax.f32 %v654_v3, 0.0 }
 0x1ae   :  { %1142 = vmax.xlane.f32.xlu2 %v3628_v14 }
 0x1af   :  { %941 = vmatmul.f32.gmra.mxu2 %v800_v5 }
 0x1b0   :  { %v415_v18 = vpop.f32.mrf.mxu0 }
 0x1b1   :  { %v416_v20 = vadd.f32 %v3228_v33, %v415_v18 }
 0x1b2   :  { %v656_v7 = vpop.f32.mrf.mxu1  ;;  %v894_v8 = vpop.f32.mrf.mxu2 }
 0x1b3   :  { %v528_v9 = vmax.f32 %v416_v20, 0.0  ;;  %v657_v21 = vadd.f32 %v3409_v51, %v656_v7  ;;  %v3635_v11 = vadd.f32 %v3547_v28, %v894_v8 }
 0x1b5   :  { %703 = vmatmul.f32.gmra.mxu1 %v528_v9  ;;  %v3643_v15 = vsel %vm1070_vm1, %v3635_v11, -1e+30  ;;  %v801_v16 = vmax.f32 %v657_v21, 0.0 }
 0x1b6   :  { %1144 = vmax.xlane.f32.xlu2 %v3643_v15 }
 0x1b7   :  { %944 = vmatmul.f32.gmra.mxu2 %v801_v16 }
 0x1b8   :  { %v418_v17 = vpop.f32.mrf.mxu0 }
 0x1b9   :  { %v419_v29 = vadd.f32 %v3228_v33, %v418_v17 }
 0x1ba   :  { %v659_v19 = vpop.f32.mrf.mxu1  ;;  %v897_v23 = vpop.f32.mrf.mxu2 }
 0x1bb   :  { %v529_v30 = vmax.f32 %v419_v29, 0.0  ;;  %v660_v24 = vadd.f32 %v3409_v51, %v659_v19  ;;  %v3650_v35 = vadd.f32 %v3547_v28, %v897_v23 }
 0x1bd   :  { %v802_v31 = vmax.f32 %v660_v24, 0.0  ;;  %706 = vmatmul.f32.gmra.mxu1 %v529_v30  ;;  %v3658_v32 = vsel %vm1070_vm1, %v3650_v35, -1e+30 }
 0x1be   :  { %1146 = vmax.xlane.f32.xlu0 %v3658_v32 }
 0x1bf   :  { %947 = vmatmul.f32.gmra.mxu2 %v802_v31 }
 0x1c0   :  { %v421_v34 = vpop.f32.mrf.mxu0 }
 0x1c1   :  { %v422_v36 = vadd.f32 %v3228_v33, %v421_v34 }
 0x1c2   :  { %v662_v39 = vpop.f32.mrf.mxu1  ;;  %v900_v38 = vpop.f32.mrf.mxu2 }
 0x1c3   :  { %v530_v41 = vmax.f32 %v422_v36, 0.0  ;;  %v663_v43 = vadd.f32 %v3409_v51, %v662_v39  ;;  %v3665_v44 = vadd.f32 %v3547_v28, %v900_v38 }
 0x1c5   :  { %v803_v46 = vmax.f32 %v663_v43, 0.0  ;;  %709 = vmatmul.f32.gmra.mxu1 %v530_v41  ;;  %v3673_v47 = vsel %vm1070_vm1, %v3665_v44, -1e+30 }
 0x1c6   :  { %1148 = vmax.xlane.f32.xlu1 %v3673_v47 }
 0x1c7   :  { %950 = vmatmul.f32.gmra.mxu2 %v803_v46 }
 0x1c8   :  { %v424_v48 = vpop.f32.mrf.mxu0 }
 0x1c9   :  { %v425_v49 = vadd.f32 %v3228_v33, %v424_v48 }
 0x1ca   :  { %v665_v52 = vpop.f32.mrf.mxu1  ;;  %v903_v54 = vpop.f32.mrf.mxu2 }
 0x1cb   :  { %v531_v55 = vmax.f32 %v425_v49, 0.0  ;;  %v666_v56 = vadd.f32 %v3409_v51, %v665_v52  ;;  %v3680_v57 = vadd.f32 %v3547_v28, %v903_v54 }
 0x1cd   :  { %v804_v59 = vmax.f32 %v666_v56, 0.0  ;;  %712 = vmatmul.f32.gmra.mxu1 %v531_v55  ;;  %v3688_v60 = vsel %vm1070_vm1, %v3680_v57, -1e+30  ;;  %v451_v55 = vpop.f32.mrf.mxu3 }
 0x1ce   :  { %1150 = vmax.xlane.f32.xlu2 %v3688_v60 }
 0x1cf   :  { %953 = vmatmul.f32.gmra.mxu2 %v804_v59 }
 0x1d0   :  { %v427_v62 = vpop.f32.mrf.mxu0 }
 0x1d1   :  { %v428_v0 = vadd.f32 %v3228_v33, %v427_v62 }
 0x1d2   :  { %v668_v6 = vpop.f32.mrf.mxu1  ;;  %v906_v1 = vpop.f32.mrf.mxu2 }
 0x1d3   :  { %v532_v10 = vmax.f32 %v428_v0, 0.0  ;;  %v669_v12 = vadd.f32 %v3409_v51, %v668_v6  ;;  %v3695_v2 = vadd.f32 %v3547_v28, %v906_v1 }
 0x1d5   :  { %v805_v3 = vmax.f32 %v669_v12, 0.0  ;;  %715 = vmatmul.f32.gmra.mxu1 %v532_v10  ;;  %v3700_v4 = vsel %vm1070_vm1, %v3695_v2, -1e+30  ;;  %v3750_v10 = vld [vmem:[%s5278_s2] ss:$0 sm:$0xff] }
 0x1d6   :  { %1152 = vmax.xlane.f32.xlu0 %v3700_v4 }
 0x1d7   :  { %956 = vmatmul.f32.gmra.mxu2 %v805_v3 }
 0x1d8   :  { %v430_v5 = vpop.f32.mrf.mxu0 }
 0x1d9   :  { %v431_v18 = vadd.f32 %v3228_v33, %v430_v5 }
 0x1da   :  { %v671_v20 = vpop.f32.mrf.mxu1  ;;  %v909_v7 = vpop.f32.mrf.mxu2 }
 0x1db   :  { %v533_v8 = vmax.f32 %v431_v18, 0.0  ;;  %v672_v9 = vadd.f32 %v3409_v51, %v671_v20  ;;  %v3706_v21 = vadd.f32 %v3547_v28, %v909_v7 }
 0x1dd   :  { %v806_v22 = vmax.f32 %v672_v9, 0.0  ;;  %718 = vmatmul.f32.gmra.mxu1 %v533_v8  ;;  %v3711_v16 = vsel %vm1070_vm1, %v3706_v21, -1e+30  ;;  %v454_v8 = vpop.f32.mrf.mxu3 }
 0x1de   :  { %1154 = vmax.xlane.f32.xlu1 %v3711_v16 }
 0x1df   :  { %959 = vmatmul.f32.gmra.mxu2 %v806_v22 }
 0x1e0   :  { %v433_v17 = vpop.f32.mrf.mxu0 }
 0x1e1   :  { %v434_v29 = vadd.f32 %v3228_v33, %v433_v17 }
 0x1e2   :  { %v674_v19 = vpop.f32.mrf.mxu1  ;;  %v912_v23 = vpop.f32.mrf.mxu2 }
 0x1e3   :  { %v534_v30 = vmax.f32 %v434_v29, 0.0  ;;  %v675_v24 = vadd.f32 %v3409_v51, %v674_v19  ;;  %v3717_v37 = vadd.f32 %v3547_v28, %v912_v23 }
 0x1e5   :  { %v807_v31 = vmax.f32 %v675_v24, 0.0  ;;  %721 = vmatmul.f32.gmra.mxu1 %v534_v30  ;;  %v3722_v34 = vsel %vm1070_vm1, %v3717_v37, -1e+30 }
 0x1e6   :  { %1156 = vmax.xlane.f32.xlu2 %v3722_v34 }
 0x1e7   :  { %962 = vmatmul.f32.gmra.mxu2 %v807_v31 }
 0x1e8   :  { %v436_v36 = vpop.f32.mrf.mxu0 }
 0x1e9   :  { %v437_v39 = vadd.f32 %v3228_v33, %v436_v36 }
 0x1ea   :  { %v677_v38 = vpop.f32.mrf.mxu1  ;;  %v915_v41 = vpop.f32.mrf.mxu2 }
 0x1eb   :  { %v535_v43 = vmax.f32 %v437_v39, 0.0  ;;  %v678_v45 = vadd.f32 %v3409_v51, %v677_v38  ;;  %v3728_v46 = vadd.f32 %v3547_v28, %v915_v41 }
 0x1ed   :  { %v808_v48 = vmax.f32 %v678_v45, 0.0  ;;  %724 = vmatmul.f32.gmra.mxu1 %v535_v43  ;;  %v3733_v49 = vsel %vm1070_vm1, %v3728_v46, -1e+30  ;;  %v457_v45 = vpop.f32.mrf.mxu3 }
 0x1ee   :  { %1158 = vmax.xlane.f32.xlu0 %v3733_v49 }
 0x1ef   :  { %965 = vmatmul.f32.gmra.mxu2 %v808_v48 }
 0x1f0   :  { %v439_v52 = vpop.f32.mrf.mxu0 }
 0x1f1   :  { %v440_v54 = vadd.f32 %v3228_v33, %v439_v52 }
 0x1f2   :  { %v680_v56 = vpop.f32.mrf.mxu1  ;;  %v918_v58 = vpop.f32.mrf.mxu2 }
 0x1f3   :  { %v536_v59 = vmax.f32 %v440_v54, 0.0  ;;  %v681_v62 = vadd.f32 %v3409_v51, %v680_v56  ;;  %v3739_v0 = vadd.f32 %v3547_v28, %v918_v58 }
 0x1f5   :  { %v809_v6 = vmax.f32 %v681_v62, 0.0  ;;  %727 = vmatmul.f32.gmra.mxu1 %v536_v59  ;;  %v3744_v1 = vsel %vm1070_vm1, %v3739_v0, -1e+30 }
 0x1f6   :  { %1160 = vmax.xlane.f32.xlu1 %v3744_v1 }
 0x1f7   :  { %968 = vmatmul.f32.gmra.mxu2 %v809_v6 }
 0x1f8   :  { %v442_v33 = vpop.f32.mrf.mxu0 }
 0x1f9   :  { %v443_v12 = vadd.f32 %v3750_v10, %v442_v33 }
 0x1fa   :  { %v683_v3 = vpop.f32.mrf.mxu1  ;;  %v921_v5 = vpop.f32.mrf.mxu2 }
 0x1fb   :  { %v537_v18 = vmax.f32 %v443_v12, 0.0  ;;  %v684_v20 = vadd.f32 %v3409_v51, %v683_v3  ;;  %v3755_v7 = vadd.f32 %v3547_v28, %v921_v5 }
 0x1fd   :  { %5325 = vst [vmem:[#allocation2_spill] sm:$0xff] %v3755_v7  ;;  %v810_v9 = vmax.f32 %v684_v20, 0.0  ;;  %730 = vmatmul.f32.vlgmr.msrb.gmra.mxu3 %v537_v18  ;;  %v3760_v22 = vsel %vm1070_vm1, %v3755_v7, -1e+30  ;;  %v460_v18 = vpop.f32.mrf.mxu3 }
 0x1fe   :  { %1162 = vmax.xlane.f32.xlu2 %v3760_v22 }
 0x1ff   :  { %971 = vmatmul.f32.gmra.mxu2 %v810_v9 }
 0x200   :  { %v445_v17 = vpop.f32.mrf.mxu0 }
 0x201   :  { %v446_v29 = vadd.f32 %v3750_v10, %v445_v17  ;;  %v1135_v19 = vpop.xlane.xlu0 %1134 }
 0x202   :  { %v1260_v23 = vsub.f32 %v3568_v27, %v1135_v19  ;;  %v686_v30 = vpop.f32.mrf.mxu1  ;;  %v924_v24 = vpop.f32.mrf.mxu2 }
 0x203   :  { %v538_v31 = vmax.f32 %v446_v29, 0.0  ;;  %v687_v36 = vadd.f32 %v3409_v51, %v686_v30  ;;  %v3767_v39 = vadd.f32 %v3547_v28, %v924_v24 }
 0x204   :  { %v1323_v38 = vmul.f32 1.442695, %v1260_v23 }
 0x205   :  { %5326 = vst [vmem:[#allocation3_spill] sm:$0xff] %v3767_v39  ;;  %v811_v41 = vmax.f32 %v687_v36, 0.0  ;;  %733 = vmatmul.f32.gmra.mxu3 %v538_v31  ;;  %v3772_v43 = vsel %vm1070_vm1, %v3767_v39, -1e+30 }
 0x206   :  { %2813 = vpow2.f32 %v1323_v38  ;;  %1164 = vmax.xlane.f32.xlu0 %v3772_v43  ;;  %v455_v38 = vadd.f32 %v3750_v10, %v454_v8 }
 0x207   :  { %974 = vmatmul.f32.gmra.mxu2 %v811_v41 }
 0x208   :  { %v448_v27 = vpop.f32.mrf.mxu0  ;;  %v541_v41 = vmax.f32 %v455_v38, 0.0 }
 0x209   :  { %v449_v48 = vadd.f32 %v3750_v10, %v448_v27  ;;  %v1137_v52 = vpop.xlane.xlu0 %1136  ;;  %v463_v27 = vpop.f32.mrf.mxu3 }
 0x20a   :  { %v1261_v54 = vsub.f32 %v3583_v42, %v1137_v52  ;;  %v689_v56 = vpop.f32.mrf.mxu1  ;;  %v927_v58 = vpop.f32.mrf.mxu2  ;;  %v452_v42 = vadd.f32 %v3750_v10, %v451_v55 }
 0x20b   :  { %v539_v59 = vmax.f32 %v449_v48, 0.0  ;;  %v690_v62 = vadd.f32 %v3409_v51, %v689_v56  ;;  %v3779_v6 = vadd.f32 %v3547_v28, %v927_v58 }
 0x20c   :  { %v3781_v33 = vpop.eup %2813  ;;  %v1325_v12 = vmul.f32 1.442695, %v1261_v54  ;;  %v540_v9 = vmax.f32 %v452_v42, 0.0 }
 0x20d   :  { %5327 = vst [vmem:[#allocation4_spill] sm:$0xff] %v3779_v6  ;;  %v812_v3 = vmax.f32 %v690_v62, 0.0  ;;  %736 = vmatmul.f32.gmra.mxu3 %v539_v59  ;;  %v3786_v5 = vsel %vm1070_vm1, %v3779_v6, -1e+30 }
 0x20e   :  { %2815 = vpow2.f32 %v1325_v12  ;;  %1166 = vmax.xlane.f32.xlu1 %v3786_v5  ;;  %1449 = vadd.xlane.f32.xlu0 %v3781_v33 }
 0x20f   :  { %977 = vmatmul.f32.gmra.mxu2 %v812_v3  ;;  %v458_v3 = vadd.f32 %v3750_v10, %v457_v45 }
 0x211   :  { %v1139_v20 = vpop.xlane.xlu1 %1138  ;;  %v542_v42 = vmax.f32 %v458_v3, 0.0 }
 0x212   :  { %v1262_v17 = vsub.f32 %v3598_v53, %v1139_v20  ;;  %v692_v29 = vpop.f32.mrf.mxu1  ;;  %v930_v19 = vpop.f32.mrf.mxu2 }
 0x213   :  { %v693_v23 = vadd.f32 %v3409_v51, %v692_v29  ;;  %v3794_v30 = vadd.f32 %v3547_v28, %v930_v19 }
 0x214   :  { %v3796_v24 = vpop.eup %2815  ;;  %v1327_v55 = vmul.f32 1.442695, %v1262_v17 }
 0x215   :  { %5328 = vst [vmem:[#allocation5_spill] sm:$0xff] %v3794_v30  ;;  %v813_v31 = vmax.f32 %v693_v23, 0.0  ;;  %739 = vmatmul.f32.gmra.mxu3 %v540_v9  ;;  %v3801_v36 = vsel %vm1070_vm1, %v3794_v30, -1e+30  ;;  %v466_v23 = vpop.f32.mrf.mxu3 }
 0x216   :  { %2817 = vpow2.f32 %v1327_v55  ;;  %1168 = vmax.xlane.f32.xlu2 %v3801_v36  ;;  %1451 = vadd.xlane.f32.xlu1 %v3796_v24 }
 0x217   :  { %980 = vmatmul.f32.gmra.mxu2 %v813_v31 }
 0x219   :  { %v1141_v53 = vpop.xlane.xlu1 %1140 }
 0x21a   :  { %v1263_v48 = vsub.f32 %v3613_v63, %v1141_v53  ;;  %v695_v52 = vpop.f32.mrf.mxu1  ;;  %v933_v54 = vpop.f32.mrf.mxu2 }
 0x21b   :  { %v696_v56 = vadd.f32 %v3409_v51, %v695_v52  ;;  %v3809_v58 = vadd.f32 %v3547_v28, %v933_v54 }
 0x21c   :  { %v3811_v59 = vpop.eup %2817  ;;  %v1329_v8 = vmul.f32 1.442695, %v1263_v48 }
 0x21d   :  { %5329 = vst [vmem:[#allocation6_spill] sm:$0xff] %v3809_v58  ;;  %v814_v62 = vmax.f32 %v696_v56, 0.0  ;;  %742 = vmatmul.f32.gmra.mxu3 %v541_v41  ;;  %v3816_v12 = vsel %vm1070_vm1, %v3809_v58, -1e+30 }
 0x21e   :  { %2819 = vpow2.f32 %v1329_v8  ;;  %1453 = vadd.xlane.f32.xlu2 %v3811_v59  ;;  %1170 = vmax.xlane.f32.xlu0 %v3816_v12 }
 0x21f   :  { %983 = vmatmul.f32.gmra.mxu2 %v814_v62 }
 0x221   :  { %v1143_v63 = vpop.xlane.xlu2 %1142 }
 0x222   :  { %v1264_v20 = vsub.f32 %v3628_v14, %v1143_v63  ;;  %v698_v9 = vpop.f32.mrf.mxu1  ;;  %v936_v17 = vpop.f32.mrf.mxu2  ;;  %v461_v14 = vadd.f32 %v3750_v10, %v460_v18 }
 0x223   :  { %v699_v29 = vadd.f32 %v3409_v51, %v698_v9  ;;  %v3824_v19 = vadd.f32 %v3547_v28, %v936_v17 }
 0x224   :  { %v3826_v55 = vpop.eup %2819  ;;  %v1331_v45 = vmul.f32 1.442695, %v1264_v20  ;;  %v543_v41 = vmax.f32 %v461_v14, 0.0 }
 0x225   :  { %5330 = vst [vmem:[#allocation7_spill] sm:$0xff] %v3824_v19  ;;  %v815_v31 = vmax.f32 %v699_v29, 0.0  ;;  %745 = vmatmul.f32.gmra.mxu3 %v542_v42  ;;  %v3831_v38 = vsel %vm1070_vm1, %v3824_v19, -1e+30  ;;  %v464_v42 = vadd.f32 %v3750_v10, %v463_v27 }
 0x226   :  { %2821 = vpow2.f32 %v1331_v45  ;;  %1455 = vadd.xlane.f32.xlu0 %v3826_v55  ;;  %1172 = vmax.xlane.f32.xlu1 %v3831_v38  ;;  %v3855_v45 = vld [vmem:[%s5280_s4] ss:$0 sm:$0xff] }
 0x227   :  { %986 = vmatmul.f32.gmra.mxu2 %v815_v31  ;;  %v544_v20 = vmax.f32 %v464_v42, 0.0 }
 0x229   :  { %v1145_v53 = vpop.xlane.xlu2 %1144 }
 0x22a   :  { %v1265_v48 = vsub.f32 %v3643_v15, %v1145_v53  ;;  %v701_v52 = vpop.f32.mrf.mxu1  ;;  %v939_v54 = vpop.f32.mrf.mxu2 }
 0x22b   :  { %v702_v56 = vadd.f32 %v3409_v51, %v701_v52  ;;  %v3839_v8 = vadd.f32 %v3547_v28, %v939_v54  ;;  %v469_v15 = vpop.f32.mrf.mxu3 }
 0x22c   :  { %v3841_v62 = vpop.eup %2821  ;;  %v1333_v18 = vmul.f32 1.442695, %v1265_v48  ;;  %v467_v48 = vadd.f32 %v3750_v10, %v466_v23 }
 0x22d   :  { %5331 = vst [vmem:[#allocation8_spill] sm:$0xff] %v3839_v8  ;;  %v816_v3 = vmax.f32 %v702_v56, 0.0  ;;  %748 = vmatmul.f32.gmra.mxu3 %v543_v41  ;;  %v3846_v63 = vsel %vm1070_vm1, %v3839_v8, -1e+30 }
 0x22e   :  { %2823 = vpow2.f32 %v1333_v18  ;;  %1174 = vmax.xlane.f32.xlu2 %v3846_v63  ;;  %1457 = vadd.xlane.f32.xlu1 %v3841_v62  ;;  %v545_v56 = vmax.f32 %v467_v48, 0.0 }
 0x22f   :  { %989 = vmatmul.f32.gmra.mxu2 %v816_v3 }
 0x231   :  { %v1147_v51 = vpop.xlane.xlu0 %1146 }
 0x232   :  { %v1266_v9 = vsub.f32 %v3658_v32, %v1147_v51  ;;  %v704_v17 = vpop.f32.mrf.mxu1  ;;  %v942_v29 = vpop.f32.mrf.mxu2 }
 0x233   :  { %v705_v27 = vadd.f32 %v3855_v45, %v704_v17  ;;  %v3859_v31 = vadd.f32 %v3547_v28, %v942_v29  ;;  %v472_v52 = vpop.f32.mrf.mxu3 }
 0x234   :  { %v3861_v14 = vpop.eup %2823  ;;  %v1335_v53 = vmul.f32 1.442695, %v1266_v9 }
 0x235   :  { %5332 = vst [vmem:[#allocation9_spill] sm:$0xff] %v3859_v31  ;;  %v817_v41 = vmax.f32 %v705_v27, 0.0  ;;  %751 = vmatmul.f32.gmra.mxu3 %v544_v20  ;;  %v3866_v32 = vsel %vm1070_vm1, %v3859_v31, -1e+30  ;;  %v470_v27 = vadd.f32 %v3750_v10, %v469_v15 }
 0x236   :  { %2825 = vpow2.f32 %v1335_v53  ;;  %1459 = vadd.xlane.f32.xlu2 %v3861_v14  ;;  %1176 = vmax.xlane.f32.xlu0 %v3866_v32 }
 0x237   :  { %992 = vmatmul.f32.gmra.mxu2 %v817_v41  ;;  %v546_v53 = vmax.f32 %v470_v27, 0.0 }
 0x239   :  { %v1149_v54 = vpop.xlane.xlu1 %1148 }
 0x23a   :  { %v1267_v18 = vsub.f32 %v3673_v47, %v1149_v54  ;;  %v707_v3 = vpop.f32.mrf.mxu1  ;;  %v945_v42 = vpop.f32.mrf.mxu2 }
 0x23b   :  { %v708_v51 = vadd.f32 %v3855_v45, %v707_v3  ;;  %v3874_v20 = vadd.f32 %v3547_v28, %v945_v42  ;;  %v475_v41 = vpop.f32.mrf.mxu3 }
 0x23c   :  { %v3876_v9 = vpop.eup %2825  ;;  %v1337_v23 = vmul.f32 1.442695, %v1267_v18 }
 0x23d   :  { %5333 = vst [vmem:[#allocation10_spill] sm:$0xff] %v3874_v20  ;;  %v818_v17 = vmax.f32 %v708_v51, 0.0  ;;  %754 = vmatmul.f32.gmra.mxu3 %v545_v56  ;;  %v3881_v29 = vsel %vm1070_vm1, %v3874_v20, -1e+30 }
 0x23e   :  { %2827 = vpow2.f32 %v1337_v23  ;;  %1178 = vmax.xlane.f32.xlu1 %v3881_v29  ;;  %1461 = vadd.xlane.f32.xlu0 %v3876_v9 }
 0x23f   :  { %995 = vmatmul.f32.gmra.mxu2 %v818_v17  ;;  %v473_v17 = vadd.f32 %v3750_v10, %v472_v52 }
 0x241   :  { %v1151_v47 = vpop.xlane.xlu2 %1150  ;;  %v547_v27 = vmax.f32 %v473_v17, 0.0 }
 0x242   :  { %v1268_v48 = vsub.f32 %v3688_v60, %v1151_v47  ;;  %v710_v54 = vpop.f32.mrf.mxu1  ;;  %v948_v56 = vpop.f32.mrf.mxu2 }
 0x243   :  { %v711_v18 = vadd.f32 %v3855_v45, %v710_v54  ;;  %v3889_v3 = vadd.f32 %v3547_v28, %v948_v56 }
 0x244   :  { %v3891_v42 = vpop.eup %2827  ;;  %v1339_v15 = vmul.f32 1.442695, %v1268_v48 }
 0x245   :  { %5334 = vst [vmem:[#allocation11_spill] sm:$0xff] %v3889_v3  ;;  %v819_v51 = vmax.f32 %v711_v18, 0.0  ;;  %757 = vmatmul.f32.gmra.mxu3 %v546_v53  ;;  %v3896_v23 = vsel %vm1070_vm1, %v3889_v3, -1e+30  ;;  %v478_v18 = vpop.f32.mrf.mxu3 }
 0x246   :  { %2829 = vpow2.f32 %v1339_v15  ;;  %1180 = vmax.xlane.f32.xlu2 %v3896_v23  ;;  %1463 = vadd.xlane.f32.xlu1 %v3891_v42 }
 0x247   :  { %998 = vmatmul.f32.gmra.mxu2 %v819_v51 }
 0x249   :  { %v1153_v60 = vpop.xlane.xlu0 %1152 }
 0x24a   :  { %v1269_v47 = vsub.f32 %v3700_v4, %v1153_v60  ;;  %v713_v48 = vpop.f32.mrf.mxu1  ;;  %v951_v54 = vpop.f32.mrf.mxu2  ;;  %v476_v4 = vadd.f32 %v3750_v10, %v475_v41 }
 0x24b   :  { %v714_v53 = vadd.f32 %v3855_v45, %v713_v48  ;;  %v3904_v56 = vadd.f32 %v3547_v28, %v951_v54 }
 0x24c   :  { %v3906_v3 = vpop.eup %2829  ;;  %v1341_v52 = vmul.f32 1.442695, %v1269_v47  ;;  %v548_v17 = vmax.f32 %v476_v4, 0.0  ;;  %v479_v4 = vadd.f32 %v3750_v10, %v478_v18 }
 0x24d   :  { %5335 = vst [vmem:[#allocation12_spill] sm:$0xff] %v3904_v56  ;;  %v820_v15 = vmax.f32 %v714_v53, 0.0  ;;  %760 = vmatmul.f32.gmra.mxu3 %v547_v27  ;;  %v3911_v51 = vsel %vm1070_vm1, %v3904_v56, -1e+30 }
 0x24e   :  { %2831 = vpow2.f32 %v1341_v52  ;;  %1465 = vadd.xlane.f32.xlu2 %v3906_v3  ;;  %1182 = vmax.xlane.f32.xlu0 %v3911_v51 }
 0x24f   :  { %1001 = vmatmul.f32.gmra.mxu2 %v820_v15 }
 0x251   :  { %v1155_v60 = vpop.xlane.xlu1 %1154 }
 0x252   :  { %v1270_v48 = vsub.f32 %v3711_v16, %v1155_v60  ;;  %v716_v47 = vpop.f32.mrf.mxu1  ;;  %v954_v54 = vpop.f32.mrf.mxu2  ;;  %v549_v60 = vmax.f32 %v479_v4, 0.0 }
 0x253   :  { %v717_v27 = vadd.f32 %v3855_v45, %v716_v47  ;;  %v3919_v53 = vadd.f32 %v3547_v28, %v954_v54  ;;  %v481_v16 = vpop.f32.mrf.mxu3 }
 0x254   :  { %v3921_v56 = vpop.eup %2831  ;;  %v1343_v41 = vmul.f32 1.442695, %v1270_v48  ;;  %v482_v4 = vadd.f32 %v3750_v10, %v481_v16 }
 0x255   :  { %5336 = vst [vmem:[#allocation13_spill] sm:$0xff] %v3919_v53  ;;  %v821_v52 = vmax.f32 %v717_v27, 0.0  ;;  %763 = vmatmul.f32.gmra.mxu3 %v548_v17  ;;  %v3926_v15 = vsel %vm1070_vm1, %v3919_v53, -1e+30 }
 0x256   :  { %2833 = vpow2.f32 %v1343_v41  ;;  %1184 = vmax.xlane.f32.xlu1 %v3926_v15  ;;  %1467 = vadd.xlane.f32.xlu0 %v3921_v56 }
 0x257   :  { %1004 = vmatmul.f32.gmra.mxu2 %v821_v52 }
 0x259   :  { %v1157_v47 = vpop.xlane.xlu2 %1156 }
 0x25a   :  { %v1271_v48 = vsub.f32 %v3722_v34, %v1157_v47  ;;  %v719_v54 = vpop.f32.mrf.mxu1  ;;  %v957_v17 = vpop.f32.mrf.mxu2  ;;  %v550_v47 = vmax.f32 %v482_v4, 0.0 }
 0x25b   :  { %v720_v27 = vadd.f32 %v3855_v45, %v719_v54  ;;  %v3934_v53 = vadd.f32 %v3547_v28, %v957_v17  ;;  %v484_v34 = vpop.f32.mrf.mxu3 }
 0x25c   :  { %v3936_v20 = vpop.eup %2833  ;;  %v1345_v18 = vmul.f32 1.442695, %v1271_v48  ;;  %v485_v4 = vadd.f32 %v3750_v10, %v484_v34 }
 0x25d   :  { %5337 = vst [vmem:[#allocation14_spill] sm:$0xff] %v3934_v53  ;;  %v822_v41 = vmax.f32 %v720_v27, 0.0  ;;  %766 = vmatmul.f32.gmra.mxu3 %v549_v60  ;;  %v3941_v52 = vsel %vm1070_vm1, %v3934_v53, -1e+30 }
 0x25e   :  { %2835 = vpow2.f32 %v1345_v18  ;;  %1186 = vmax.xlane.f32.xlu2 %v3941_v52  ;;  %1469 = vadd.xlane.f32.xlu1 %v3936_v20 }
 0x25f   :  { %1007 = vmatmul.f32.gmra.mxu2 %v822_v41 }
 0x261   :  { %v1159_v54 = vpop.xlane.xlu0 %1158 }
 0x262   :  { %v1272_v48 = vsub.f32 %v3733_v49, %v1159_v54  ;;  %v722_v17 = vpop.f32.mrf.mxu1  ;;  %v960_v60 = vpop.f32.mrf.mxu2  ;;  %v551_v49 = vmax.f32 %v485_v4, 0.0 }
 0x263   :  { %v723_v27 = vadd.f32 %v3855_v45, %v722_v17  ;;  %v3949_v53 = vadd.f32 %v3547_v28, %v960_v60  ;;  %v487_v17 = vpop.f32.mrf.mxu3 }
 0x264   :  { %v3951_v31 = vpop.eup %2835  ;;  %v1347_v16 = vmul.f32 1.442695, %v1272_v48  ;;  %v488_v4 = vadd.f32 %v3750_v10, %v487_v17 }
 0x265   :  { %5338 = vst [vmem:[#allocation15_spill] sm:$0xff] %v3949_v53  ;;  %v823_v18 = vmax.f32 %v723_v27, 0.0  ;;  %769 = vmatmul.f32.gmra.mxu3 %v550_v47  ;;  %v3956_v41 = vsel %vm1070_vm1, %v3949_v53, -1e+30 }
 0x266   :  { %2837 = vpow2.f32 %v1347_v16  ;;  %1471 = vadd.xlane.f32.xlu2 %v3951_v31  ;;  %1188 = vmax.xlane.f32.xlu0 %v3956_v41 }
 0x267   :  { %1010 = vmatmul.f32.gmra.mxu2 %v823_v18 }
 0x269   :  { %v1161_v54 = vpop.xlane.xlu1 %1160 }
 0x26a   :  { %v1273_v48 = vsub.f32 %v3744_v1, %v1161_v54  ;;  %v725_v60 = vpop.f32.mrf.mxu1  ;;  %v963_v47 = vpop.f32.mrf.mxu2  ;;  %v552_v1 = vmax.f32 %v488_v4, 0.0 }
 0x26b   :  { %v726_v27 = vadd.f32 %v3855_v45, %v725_v60  ;;  %v3964_v53 = vadd.f32 %v3547_v28, %v963_v47 }
 0x26c   :  { %v3966_v8 = vpop.eup %2837  ;;  %v1349_v34 = vmul.f32 1.442695, %v1273_v48 }
 0x26d   :  { %5339 = vst [vmem:[#allocation16_spill] sm:$0xff] %v3964_v53  ;;  %v824_v16 = vmax.f32 %v726_v27, 0.0  ;;  %772 = vmatmul.f32.gmra.mxu3 %v551_v49  ;;  %v3971_v18 = vsel %vm1070_vm1, %v3964_v53, -1e+30 }
 0x26e   :  { %2839 = vpow2.f32 %v1349_v34  ;;  %1190 = vmax.xlane.f32.xlu1 %v3971_v18  ;;  %1473 = vadd.xlane.f32.xlu0 %v3966_v8 }
 0x26f   :  { %1013 = vmatmul.f32.gmra.mxu2 %v824_v16 }
 0x271   :  { %v1163_v54 = vpop.xlane.xlu2 %1162 }
 0x272   :  { %v1274_v60 = vsub.f32 %v3760_v22, %v1163_v54  ;;  %v728_v48 = vpop.f32.mrf.mxu1  ;;  %v966_v47 = vpop.f32.mrf.mxu2 }
 0x273   :  { %v729_v49 = vadd.f32 %v3855_v45, %v728_v48  ;;  %v3979_v27 = vadd.f32 %v3547_v28, %v966_v47 }
 0x274   :  { %v3981_v53 = vpop.eup %2839  ;;  %v1351_v10 = vmul.f32 1.442695, %v1274_v60 }
 0x275   :  { %5340 = vst [vmem:[#allocation17_spill] sm:$0xff] %v3979_v27  ;;  %v825_v17 = vmax.f32 %v729_v49, 0.0  ;;  %775 = vmatmul.f32.gmra.mxu3 %v552_v1  ;;  %v3986_v34 = vsel %vm1070_vm1, %v3979_v27, -1e+30 }
 0x276   :  { %2841 = vpow2.f32 %v1351_v10  ;;  %1192 = vmax.xlane.f32.xlu2 %v3986_v34  ;;  %1475 = vadd.xlane.f32.xlu1 %v3981_v53 }
 0x277   :  { %1016 = vmatmul.f32.gmra.mxu2 %v825_v17 }
 0x279   :  { %v1165_v22 = vpop.xlane.xlu0 %1164 }
 0x27a   :  { %v1275_v16 = vsub.f32 %v3772_v43, %v1165_v22  ;;  %v969_v4 = vpop.f32.mrf.mxu2 }
 0x27b   :  { %v3992_v54 = vadd.f32 %v3547_v28, %v969_v4 }
 0x27c   :  { %v3994_v60 = vpop.eup %2841  ;;  %v1353_v1 = vmul.f32 1.442695, %v1275_v16 }
 0x27d   :  { %5341 = vst [vmem:[#allocation18_spill] sm:$0xff] %v3992_v54  ;;  %v3999_v48 = vsel %vm1070_vm1, %v3992_v54, -1e+30 }
 0x27e   :  { %2843 = vpow2.f32 %v1353_v1  ;;  %1477 = vadd.xlane.f32.xlu2 %v3994_v60  ;;  %1194 = vmax.xlane.f32.xlu0 %v3999_v48 }
 0x280   :  { %v731_v47 = vpop.f32.mrf.mxu3 }
 0x281   :  { %v732_v43 = vadd.f32 %v3855_v45, %v731_v47  ;;  %v1167_v49 = vpop.xlane.xlu1 %1166  ;;  %v1450_v10 = vpop.xlane.xlu0 %1449 }
 0x282   :  { %v1276_v17 = vsub.f32 %v3786_v5, %v1167_v49  ;;  %2845 = vrcp.f32 %v1450_v10  ;;  %v972_v22 = vpop.f32.mrf.mxu2  ;;  %v1586_v6 = vand.u32 2147483648, %v1450_v10  ;;  %vm1580_vm3 = vweird.f32 %v1450_v10 }
 0x283   :  { %v826_v16 = vmax.f32 %v732_v43, 0.0  ;;  %v4006_v4 = vadd.f32 %v3547_v28, %v972_v22 }
 0x284   :  { %v4008_v54 = vpop.eup %2843  ;;  %v1355_v1 = vmul.f32 1.442695, %v1276_v17 }
 0x285   :  { %5342 = vst [vmem:[#allocation19_spill] sm:$0xff] %v4006_v4  ;;  %1019 = vmatmul.f32.vlgmr.msra.gmra.mxu3 %v826_v16  ;;  %v4013_v27 = vsel %vm1070_vm1, %v4006_v4, -1e+30 }
 0x286   :  { %5343 = vst [vmem:[#allocation20_spill] sm:$0xff] %v4008_v54  ;;  %2847 = vpow2.f32 %v1355_v1  ;;  %1196 = vmax.xlane.f32.xlu1 %v4013_v27  ;;  %1479 = vadd.xlane.f32.xlu0 %v4008_v54 }
 0x288   :  { %v2846_v5 = vpop.eup %2845  ;;  %v734_v47 = vpop.f32.mrf.mxu3 }
 0x289   :  { %v1576_v43 = vmul.f32 %v2846_v5, %v1450_v10  ;;  %v735_v49 = vadd.f32 %v3855_v45, %v734_v47  ;;  %v1169_v22 = vpop.xlane.xlu2 %1168  ;;  %v4018_v19 = vpop.xlane.xlu1 %1451  ;;  %vm1581_vm2 = vweird.f32 %v2846_v5  ;;  %v1584_v47 = vand.u32 2147483647, %v1450_v10 }
 0x28a   :  { %v1277_v17 = vsub.f32 %v3801_v36, %v1169_v22  ;;  %2849 = vrcp.f32 %v4018_v19  ;;  %v975_v16 = vpop.f32.mrf.mxu2  ;;  %vm1582_vm5 = vmor %vm1580_vm3, %vm1581_vm2  ;;  %vm1594_vm8 = vweird.f32 %v4018_v19 }
 0x28b   :  { %v1577_v4 = vsub.f32 1.0, %v1576_v43  ;;  %v827_v58 = vmax.f32 %v735_v49, 0.0  ;;  %v4023_v1 = vadd.f32 %v3547_v28, %v975_v16  ;;  %vm1585_vm6 = vcmp.eq.f32.partialorder %v1584_v47, 8.507059e+37 }
 0x28c   :  { %v4025_v30 = vpop.eup %2847  ;;  %v1357_v39 = vmul.f32 1.442695, %v1277_v17 }
 0x28d   :  { %5344 = vst [vmem:[#allocation21_spill] sm:$0xff] %v4023_v1  ;;  %v1578_v54 = vmul.f32 %v2846_v5, %v1577_v4  ;;  %1022 = vmatmul.f32.gmra.mxu3 %v827_v58  ;;  %v4030_v36 = vsel %vm1070_vm1, %v4023_v1, -1e+30  ;;  %v1587_v4 = vor.u32 1.1754944e-38, %v1586_v6  ;;  %v2521_v6 = vsel %vm2520_vm4, %v3558_v25, 0.0 }
 0x28e   :  { %5345 = vst [vmem:[#allocation22_spill] sm:$0xff] %v4025_v30  ;;  %2851 = vpow2.f32 %v1357_v39  ;;  %1198 = vmax.xlane.f32.xlu2 %v4030_v36  ;;  %1481 = vadd.xlane.f32.xlu1 %v4025_v30 }
 0x28f   :  { %5346 = vst [vmem:[#allocation23_spill] sm:$0xff] %v4030_v36  ;;  %v1579_v28 = vadd.f32 %v2846_v5, %v1578_v54 }
 0x290   :  { %v2850_v43 = vpop.eup %2849  ;;  %v737_v49 = vpop.f32.mrf.mxu3 }
 0x291   :  { %v1583_v22 = vsel %vm1582_vm5, %v2846_v5, %v1579_v28  ;;  %v1590_v58 = vmul.f32 %v2850_v43, %v4018_v19  ;;  %v738_v17 = vadd.f32 %v3855_v45, %v737_v49  ;;  %v4037_v16 = vpop.xlane.xlu2 %1453  ;;  %v1171_v39 = vpop.xlane.xlu0 %1170  ;;  %v1600_v5 = vand.u32 2147483648, %v4018_v19  ;;  %v4051_v28 = vld [vmem:[%s5282_s6] ss:$0 sm:$0xff] }
 0x292   :  { %v1588_v1 = vsel %vm1585_vm6, %v1587_v4, %v1583_v22  ;;  %2853 = vrcp.f32 %v4037_v16  ;;  %v978_v54 = vpop.f32.mrf.mxu2  ;;  %v1278_v47 = vsub.f32 %v3816_v12, %v1171_v39  ;;  %vm1595_vm7 = vweird.f32 %v2850_v43 }
 0x293   :  { %v2457_v10 = vmul.f32 %v3781_v33, %v1588_v1  ;;  %v1591_v30 = vsub.f32 1.0, %v1590_v58  ;;  %v828_v36 = vmax.f32 %v738_v17, 0.0  ;;  %v4054_v4 = vadd.f32 %v4051_v28, %v978_v54  ;;  %vm1596_vm9 = vmor %vm1594_vm8, %vm1595_vm7 }
 0x294   :  { %v4041_v7 = vpop.eup %2851  ;;  %v1598_v49 = vand.u32 2147483647, %v4018_v19  ;;  %v1359_v25 = vmul.f32 1.442695, %v1278_v47  ;;  %vm1608_vm12 = vweird.f32 %v4037_v16 }
 0x295   :  { %v2584_v33 = vsel %vm1070_vm1, %v2457_v10, %v2521_v6  ;;  %v1592_v1 = vmul.f32 %v2850_v43, %v1591_v30  ;;  %1025 = vmatmul.f32.gmra.mxu3 %v828_v36  ;;  %v4066_v12 = vsel %vm1070_vm1, %v4054_v4, -1e+30  ;;  %v1601_v36 = vor.u32 1.1754944e-38, %v1600_v5 }
 0x296   :  { %2647 = vst [vmem:[%s5283_s7] sm:$0xff] %v2584_v33  ;;  %1483 = vadd.xlane.f32.xlu2 %v4041_v7  ;;  %1200 = vmax.xlane.f32.xlu0 %v4066_v12  ;;  %2855 = vpow2.f32 %v1359_v25  ;;  %vm1599_vm10 = vcmp.eq.f32.partialorder %v1598_v49, 8.507059e+37  ;;  %v1614_v49 = vand.u32 2147483648, %v4037_v16 }
 0x297   :  { %v1593_v22 = vadd.f32 %v2850_v43, %v1592_v1 }
 0x298   :  { %v2854_v30 = vpop.eup %2853  ;;  %v740_v58 = vpop.f32.mrf.mxu3 }
 0x299   :  { %v1597_v17 = vsel %vm1596_vm9, %v2850_v43, %v1593_v22  ;;  %v1604_v39 = vmul.f32 %v2854_v30, %v4037_v16  ;;  %v741_v54 = vadd.f32 %v3855_v45, %v740_v58  ;;  %v1173_v10 = vpop.xlane.xlu1 %1172  ;;  %v4072_v6 = vpop.xlane.xlu0 %1455  ;;  %v2522_v43 = vsel %vm2520_vm4, %v3575_v40, 0.0 }
 0x29a   :  { %v1602_v47 = vsel %vm1599_vm10, %v1601_v36, %v1597_v17  ;;  %v1279_v33 = vsub.f32 %v3831_v38, %v1173_v10  ;;  %2857 = vrcp.f32 %v4072_v6  ;;  %v981_v19 = vpop.f32.mrf.mxu2  ;;  %vm1609_vm11 = vweird.f32 %v2854_v30 }
 0x29b   :  { %v2458_v1 = vmul.f32 %v3796_v24, %v1602_v47  ;;  %v1605_v5 = vsub.f32 1.0, %v1604_v39  ;;  %v829_v25 = vmax.f32 %v741_v54, 0.0  ;;  %v4082_v58 = vadd.f32 %v4051_v28, %v981_v19  ;;  %vm1610_vm13 = vmor %vm1608_vm12, %vm1609_vm11 }
 0x29c   :  { %v1361_v22 = vmul.f32 1.442695, %v1279_v33  ;;  %v1612_v17 = vand.u32 2147483647, %v4037_v16  ;;  %v4087_v24 = vpop.eup %2855  ;;  %v1615_v10 = vor.u32 1.1754944e-38, %v1614_v49  ;;  %vm1622_vm0 = vweird.f32 %v4072_v6 }
 0x29d   :  { %5347 = vst [vmem:[#allocation24_spill] sm:$0xff] %v4082_v58  ;;  %v2585_v38 = vsel %vm1070_vm1, %v2458_v1, %v2522_v43  ;;  %v1606_v36 = vmul.f32 %v2854_v30, %v1605_v5  ;;  %1028 = vmatmul.f32.gmra.mxu3 %v829_v25  ;;  %v4095_v40 = vsel %vm1070_vm1, %v4082_v58, -1e+30 }
 0x29e   :  { %2648 = vst [vmem:[%s5283_s7 + $0x8] sm:$0xff] %v2585_v38  ;;  %2859 = vpow2.f32 %v1361_v22  ;;  %1202 = vmax.xlane.f32.xlu1 %v4095_v40  ;;  %1485 = vadd.xlane.f32.xlu0 %v4087_v24  ;;  %vm1613_vm14 = vcmp.eq.f32.partialorder %v1612_v17, 8.507059e+37  ;;  %v1628_v17 = vand.u32 2147483648, %v4072_v6 }
 0x29f   :  { %v1607_v39 = vadd.f32 %v2854_v30, %v1606_v36 }
 0x2a0   :  { %v2858_v54 = vpop.eup %2857  ;;  %v743_v47 = vpop.f32.mrf.mxu3 }
 0x2a1   :  { %v1611_v33 = vsel %vm1610_vm13, %v2854_v30, %v1607_v39  ;;  %v1618_v19 = vmul.f32 %v2858_v54, %v4072_v6  ;;  %v744_v1 = vadd.f32 %v3855_v45, %v743_v47  ;;  %v1175_v5 = vpop.xlane.xlu2 %1174  ;;  %v4102_v25 = vpop.xlane.xlu1 %1457  ;;  %v2523_v30 = vsel %vm2520_vm4, %v3590_v50, 0.0 }
 0x2a2   :  { %v1616_v43 = vsel %vm1613_vm14, %v1615_v10, %v1611_v33  ;;  %v1280_v16 = vsub.f32 %v3846_v63, %v1175_v5  ;;  %2861 = vrcp.f32 %v4102_v25  ;;  %v984_v22 = vpop.f32.mrf.mxu2  ;;  %vm1623_vm15 = vweird.f32 %v2858_v54 }
 0x2a3   :  { %v2459_v38 = vmul.f32 %v3811_v59, %v1616_v43  ;;  %v1619_v36 = vsub.f32 1.0, %v1618_v19  ;;  %v830_v49 = vmax.f32 %v744_v1, 0.0  ;;  %v4114_v10 = vadd.f32 %v4051_v28, %v984_v22  ;;  %vm1624_vm2 = vmor %vm1622_vm0, %vm1623_vm15 }
 0x2a4   :  { %v4107_v58 = vpop.eup %2859  ;;  %v1363_v39 = vmul.f32 1.442695, %v1280_v16  ;;  %v1626_v59 = vand.u32 2147483647, %v4072_v6  ;;  %v1629_v1 = vor.u32 1.1754944e-38, %v1628_v17  ;;  %v1642_v17 = vand.u32 2147483648, %v4102_v25 }
 0x2a5   :  { %v2586_v63 = vsel %vm1070_vm1, %v2459_v38, %v2523_v30  ;;  %v1620_v47 = vmul.f32 %v2858_v54, %v1619_v36  ;;  %1031 = vmatmul.f32.gmra.mxu3 %v830_v49  ;;  %v4125_v50 = vsel %vm1070_vm1, %v4114_v10, -1e+30  ;;  %vm1636_vm6 = vweird.f32 %v4102_v25 }
 0x2a6   :  { %2649 = vst [vmem:[%s5283_s7 + $0x10] sm:$0xff] %v2586_v63  ;;  %2863 = vpow2.f32 %v1363_v39  ;;  %1204 = vmax.xlane.f32.xlu2 %v4125_v50  ;;  %1487 = vadd.xlane.f32.xlu1 %v4107_v58  ;;  %vm1627_vm3 = vcmp.eq.f32.partialorder %v1626_v59, 8.507059e+37 }
 0x2a7   :  { %v1621_v33 = vadd.f32 %v2858_v54, %v1620_v47 }
 0x2a8   :  { %v2862_v19 = vpop.eup %2861  ;;  %v746_v5 = vpop.f32.mrf.mxu3 }
 0x2a9   :  { %v1625_v43 = vsel %vm1624_vm2, %v2858_v54, %v1621_v33  ;;  %v1632_v16 = vmul.f32 %v2862_v19, %v4102_v25  ;;  %v747_v22 = vadd.f32 %v3855_v45, %v746_v5  ;;  %v4132_v38 = vpop.xlane.xlu2 %1459  ;;  %v1177_v36 = vpop.xlane.xlu0 %1176  ;;  %v2524_v54 = vsel %vm2520_vm4, %v3605_v61, 0.0 }
 0x2aa   :  { %v1630_v49 = vsel %vm1627_vm3, %v1629_v1, %v1625_v43  ;;  %2865 = vrcp.f32 %v4132_v38  ;;  %v987_v6 = vpop.f32.mrf.mxu2  ;;  %v1281_v59 = vsub.f32 %v3866_v32, %v1177_v36  ;;  %vm1637_vm5 = vweird.f32 %v2862_v19 }
 0x2ab   :  { %v2460_v30 = vmul.f32 %v3826_v55, %v1630_v49  ;;  %v1633_v39 = vsub.f32 1.0, %v1632_v16  ;;  %v831_v63 = vmax.f32 %v747_v22, 0.0  ;;  %v4144_v33 = vadd.f32 %v4051_v28, %v987_v6  ;;  %vm1638_vm7 = vmor %vm1636_vm6, %vm1637_vm5 }
 0x2ac   :  { %v4136_v47 = vpop.eup %2863  ;;  %v1640_v55 = vand.u32 2147483647, %v4102_v25  ;;  %v1365_v61 = vmul.f32 1.442695, %v1281_v59  ;;  %v1643_v22 = vor.u32 1.1754944e-38, %v1642_v17  ;;  %vm1650_vm10 = vweird.f32 %v4132_v38 }
 0x2ad   :  { %v2587_v1 = vsel %vm1070_vm1, %v2460_v30, %v2524_v54  ;;  %v1634_v5 = vmul.f32 %v2862_v19, %v1633_v39  ;;  %1034 = vmatmul.f32.gmra.mxu3 %v831_v63  ;;  %v4155_v32 = vsel %vm1070_vm1, %v4144_v33, -1e+30 }
 0x2ae   :  { %2650 = vst [vmem:[%s5283_s7 + $0x18] sm:$0xff] %v2587_v1  ;;  %1489 = vadd.xlane.f32.xlu2 %v4136_v47  ;;  %1206 = vmax.xlane.f32.xlu0 %v4155_v32  ;;  %2867 = vpow2.f32 %v1365_v61  ;;  %vm1641_vm8 = vcmp.eq.f32.partialorder %v1640_v55, 8.507059e+37  ;;  %v1656_v55 = vand.u32 2147483648, %v4132_v38 }
 0x2af   :  { %v1635_v43 = vadd.f32 %v2862_v19, %v1634_v5 }
 0x2b0   :  { %v2866_v16 = vpop.eup %2865  ;;  %v749_v36 = vpop.f32.mrf.mxu3 }
 0x2b1   :  { %v1639_v49 = vsel %vm1638_vm7, %v2862_v19, %v1635_v43  ;;  %v1646_v6 = vmul.f32 %v2866_v16, %v4132_v38  ;;  %v750_v30 = vadd.f32 %v3855_v45, %v749_v36  ;;  %v1179_v39 = vpop.xlane.xlu1 %1178  ;;  %v4162_v63 = vpop.xlane.xlu0 %1461  ;;  %v2525_v19 = vsel %vm2520_vm4, %v3620_v13, 0.0 }
 0x2b2   :  { %v1644_v54 = vsel %vm1641_vm8, %v1643_v22, %v1639_v49  ;;  %v1282_v25 = vsub.f32 %v3881_v29, %v1179_v39  ;;  %2869 = vrcp.f32 %v4162_v63  ;;  %v990_v59 = vpop.f32.mrf.mxu2  ;;  %vm1651_vm9 = vweird.f32 %v2866_v16 }
 0x2b3   :  { %v2461_v1 = vmul.f32 %v3841_v62, %v1644_v54  ;;  %v1647_v17 = vsub.f32 1.0, %v1646_v6  ;;  %v832_v5 = vmax.f32 %v750_v30, 0.0  ;;  %v4172_v43 = vadd.f32 %v4051_v28, %v990_v59  ;;  %vm1652_vm11 = vmor %vm1650_vm10, %vm1651_vm9 }
 0x2b4   :  { %v1367_v61 = vmul.f32 1.442695, %v1282_v25  ;;  %v1654_v36 = vand.u32 2147483647, %v4132_v38  ;;  %v4177_v62 = vpop.eup %2867  ;;  %v1657_v30 = vor.u32 1.1754944e-38, %v1656_v55  ;;  %vm1664_vm14 = vweird.f32 %v4162_v63 }
 0x2b5   :  { %v2588_v29 = vsel %vm1070_vm1, %v2461_v1, %v2525_v19  ;;  %v1648_v22 = vmul.f32 %v2866_v16, %v1647_v17  ;;  %1037 = vmatmul.f32.gmra.mxu3 %v832_v5  ;;  %v4185_v13 = vsel %vm1070_vm1, %v4172_v43, -1e+30 }
 0x2b6   :  { %2651 = vst [vmem:[%s5283_s7 + $0x20] sm:$0xff] %v2588_v29  ;;  %2871 = vpow2.f32 %v1367_v61  ;;  %1208 = vmax.xlane.f32.xlu1 %v4185_v13  ;;  %1491 = vadd.xlane.f32.xlu0 %v4177_v62  ;;  %vm1655_vm12 = vcmp.eq.f32.partialorder %v1654_v36, 8.507059e+37  ;;  %v1670_v36 = vand.u32 2147483648, %v4162_v63 }
 0x2b7   :  { %v1649_v49 = vadd.f32 %v2866_v16, %v1648_v22 }
 0x2b8   :  { %v2870_v6 = vpop.eup %2869  ;;  %v752_v39 = vpop.f32.mrf.mxu3 }
 0x2b9   :  { %v1653_v54 = vsel %vm1652_vm11, %v2866_v16, %v1649_v49  ;;  %v1660_v25 = vmul.f32 %v2870_v6, %v4162_v63  ;;  %v753_v59 = vadd.f32 %v3855_v45, %v752_v39  ;;  %v1181_v1 = vpop.xlane.xlu2 %1180  ;;  %v4192_v17 = vpop.xlane.xlu1 %1463  ;;  %v2526_v16 = vsel %vm2520_vm4, %v3635_v11, 0.0 }
 0x2ba   :  { %v1658_v5 = vsel %vm1655_vm12, %v1657_v30, %v1653_v54  ;;  %v1283_v38 = vsub.f32 %v3896_v23, %v1181_v1  ;;  %2873 = vrcp.f32 %v4192_v17  ;;  %v993_v19 = vpop.f32.mrf.mxu2  ;;  %vm1665_vm13 = vweird.f32 %v2870_v6 }
 0x2bb   :  { %v2462_v61 = vmul.f32 %v3861_v14, %v1658_v5  ;;  %v1661_v29 = vsub.f32 1.0, %v1660_v25  ;;  %v833_v55 = vmax.f32 %v753_v59, 0.0  ;;  %v4204_v30 = vadd.f32 %v4051_v28, %v993_v19  ;;  %vm1666_vm15 = vmor %vm1664_vm14, %vm1665_vm13 }
 0x2bc   :  { %v4197_v22 = vpop.eup %2871  ;;  %v1369_v49 = vmul.f32 1.442695, %v1283_v38  ;;  %v1668_v14 = vand.u32 2147483647, %v4162_v63  ;;  %v1671_v59 = vor.u32 1.1754944e-38, %v1670_v36  ;;  %v1684_v36 = vand.u32 2147483648, %v4192_v17 }
 0x2bd   :  { %v2589_v23 = vsel %vm1070_vm1, %v2462_v61, %v2526_v16  ;;  %v1662_v39 = vmul.f32 %v2870_v6, %v1661_v29  ;;  %1040 = vmatmul.f32.gmra.mxu3 %v833_v55  ;;  %v4215_v11 = vsel %vm1070_vm1, %v4204_v30, -1e+30  ;;  %vm1678_vm3 = vweird.f32 %v4192_v17 }
 0x2be   :  { %2652 = vst [vmem:[%s5283_s7 + $0x28] sm:$0xff] %v2589_v23  ;;  %2875 = vpow2.f32 %v1369_v49  ;;  %1210 = vmax.xlane.f32.xlu2 %v4215_v11  ;;  %1493 = vadd.xlane.f32.xlu1 %v4197_v22  ;;  %vm1669_vm0 = vcmp.eq.f32.partialorder %v1668_v14, 8.507059e+37 }
 0x2bf   :  { %v1663_v54 = vadd.f32 %v2870_v6, %v1662_v39 }
 0x2c0   :  { %v2874_v25 = vpop.eup %2873  ;;  %v755_v1 = vpop.f32.mrf.mxu3 }
 0x2c1   :  { %v1667_v5 = vsel %vm1666_vm15, %v2870_v6, %v1663_v54  ;;  %v1674_v38 = vmul.f32 %v2874_v25, %v4192_v17  ;;  %v756_v19 = vadd.f32 %v3855_v45, %v755_v1  ;;  %v4222_v61 = vpop.xlane.xlu2 %1465  ;;  %v1183_v29 = vpop.xlane.xlu0 %1182  ;;  %v2527_v6 = vsel %vm2520_vm4, %v3650_v35, 0.0 }
 0x2c2   :  { %v1672_v55 = vsel %vm1669_vm0, %v1671_v59, %v1667_v5  ;;  %2877 = vrcp.f32 %v4222_v61  ;;  %v996_v63 = vpop.f32.mrf.mxu2  ;;  %v1284_v14 = vsub.f32 %v3911_v51, %v1183_v29  ;;  %vm1679_vm2 = vweird.f32 %v2874_v25 }
 0x2c3   :  { %v2463_v16 = vmul.f32 %v3876_v9, %v1672_v55  ;;  %v1675_v49 = vsub.f32 1.0, %v1674_v38  ;;  %v834_v23 = vmax.f32 %v756_v19, 0.0  ;;  %v4234_v54 = vadd.f32 %v4051_v28, %v996_v63  ;;  %vm1680_vm5 = vmor %vm1678_vm3, %vm1679_vm2 }
 0x2c4   :  { %v4226_v39 = vpop.eup %2875  ;;  %v1682_v9 = vand.u32 2147483647, %v4192_v17  ;;  %v1371_v35 = vmul.f32 1.442695, %v1284_v14  ;;  %v1685_v19 = vor.u32 1.1754944e-38, %v1684_v36  ;;  %vm1692_vm8 = vweird.f32 %v4222_v61 }
 0x2c5   :  { %v2590_v59 = vsel %vm1070_vm1, %v2463_v16, %v2527_v6  ;;  %v1676_v1 = vmul.f32 %v2874_v25, %v1675_v49  ;;  %1043 = vmatmul.f32.gmra.mxu3 %v834_v23  ;;  %v4245_v51 = vsel %vm1070_vm1, %v4234_v54, -1e+30 }
 0x2c6   :  { %2653 = vst [vmem:[%s5283_s7 + $0x30] sm:$0xff] %v2590_v59  ;;  %1495 = vadd.xlane.f32.xlu2 %v4226_v39  ;;  %1212 = vmax.xlane.f32.xlu0 %v4245_v51  ;;  %2879 = vpow2.f32 %v1371_v35  ;;  %vm1683_vm6 = vcmp.eq.f32.partialorder %v1682_v9, 8.507059e+37  ;;  %v1698_v9 = vand.u32 2147483648, %v4222_v61 }
 0x2c7   :  { %v1677_v5 = vadd.f32 %v2874_v25, %v1676_v1 }
 0x2c8   :  { %v2878_v38 = vpop.eup %2877  ;;  %v758_v29 = vpop.f32.mrf.mxu3 }
 0x2c9   :  { %v1681_v55 = vsel %vm1680_vm5, %v2874_v25, %v1677_v5  ;;  %v1688_v63 = vmul.f32 %v2878_v38, %v4222_v61  ;;  %v759_v16 = vadd.f32 %v3855_v45, %v758_v29  ;;  %v1185_v49 = vpop.xlane.xlu1 %1184  ;;  %v4252_v23 = vpop.xlane.xlu0 %1467  ;;  %v2528_v25 = vsel %vm2520_vm4, %v3665_v44, 0.0 }
 0x2ca   :  { %v1686_v6 = vsel %vm1683_vm6, %v1685_v19, %v1681_v55  ;;  %v1285_v17 = vsub.f32 %v3926_v15, %v1185_v49  ;;  %2881 = vrcp.f32 %v4252_v23  ;;  %v999_v14 = vpop.f32.mrf.mxu2  ;;  %vm1693_vm7 = vweird.f32 %v2878_v38 }
 0x2cb   :  { %v2464_v59 = vmul.f32 %v3891_v42, %v1686_v6  ;;  %v1689_v36 = vsub.f32 1.0, %v1688_v63  ;;  %v835_v1 = vmax.f32 %v759_v16, 0.0  ;;  %v4262_v5 = vadd.f32 %v4051_v28, %v999_v14  ;;  %vm1694_vm9 = vmor %vm1692_vm8, %vm1693_vm7 }
 0x2cc   :  { %v1373_v35 = vmul.f32 1.442695, %v1285_v17  ;;  %v1696_v29 = vand.u32 2147483647, %v4222_v61  ;;  %v4267_v42 = vpop.eup %2879  ;;  %v1699_v16 = vor.u32 1.1754944e-38, %v1698_v9  ;;  %vm1706_vm12 = vweird.f32 %v4252_v23 }
 0x2cd   :  { %v2591_v15 = vsel %vm1070_vm1, %v2464_v59, %v2528_v25  ;;  %v1690_v19 = vmul.f32 %v2878_v38, %v1689_v36  ;;  %1046 = vmatmul.f32.gmra.mxu3 %v835_v1  ;;  %v4275_v44 = vsel %vm1070_vm1, %v4262_v5, -1e+30 }
 0x2ce   :  { %2654 = vst [vmem:[%s5283_s7 + $0x38] sm:$0xff] %v2591_v15  ;;  %2883 = vpow2.f32 %v1373_v35  ;;  %1214 = vmax.xlane.f32.xlu1 %v4275_v44  ;;  %1497 = vadd.xlane.f32.xlu0 %v4267_v42  ;;  %vm1697_vm10 = vcmp.eq.f32.partialorder %v1696_v29, 8.507059e+37 }
 0x2cf   :  { %v1691_v55 = vadd.f32 %v2878_v38, %v1690_v19 }
 0x2d0   :  { %v2882_v63 = vpop.eup %2881  ;;  %v761_v49 = vpop.f32.mrf.mxu3 }
 0x2d1   :  { %v1695_v6 = vsel %vm1694_vm9, %v2878_v38, %v1691_v55  ;;  %v1702_v17 = vmul.f32 %v2882_v63, %v4252_v23  ;;  %v762_v14 = vadd.f32 %v3855_v45, %v761_v49  ;;  %v1187_v59 = vpop.xlane.xlu2 %1186  ;;  %v4282_v36 = vpop.xlane.xlu1 %1469  ;;  %v2529_v38 = vsel %vm2520_vm4, %v3680_v57, 0.0 }
 0x2d2   :  { %v1700_v1 = vsel %vm1697_vm10, %v1699_v16, %v1695_v6  ;;  %v1286_v61 = vsub.f32 %v3941_v52, %v1187_v59  ;;  %2885 = vrcp.f32 %v4282_v36  ;;  %v1002_v25 = vpop.f32.mrf.mxu2  ;;  %v1712_v45 = vand.u32 2147483648, %v4252_v23 }
 0x2d3   :  { %v2465_v35 = vmul.f32 %v3906_v3, %v1700_v1  ;;  %v1703_v15 = vsub.f32 1.0, %v1702_v17  ;;  %v836_v9 = vmax.f32 %v762_v14, 0.0  ;;  %v4294_v55 = vadd.f32 %v4051_v28, %v1002_v25 }
 0x2d4   :  { %v4287_v19 = vpop.eup %2883  ;;  %v1375_v29 = vmul.f32 1.442695, %v1286_v61  ;;  %vm1707_vm11 = vweird.f32 %v2882_v63  ;;  %v1710_v3 = vand.u32 2147483647, %v4252_v23  ;;  %v1713_v17 = vor.u32 1.1754944e-38, %v1712_v45 }
 0x2d5   :  { %v2592_v52 = vsel %vm1070_vm1, %v2465_v35, %v2529_v38  ;;  %v1704_v16 = vmul.f32 %v2882_v63, %v1703_v15  ;;  %1049 = vmatmul.f32.gmra.mxu3 %v836_v9  ;;  %v4305_v57 = vsel %vm1070_vm1, %v4294_v55, -1e+30  ;;  %vm1708_vm13 = vmor %vm1706_vm12, %vm1707_vm11  ;;  %v4314_v61 = vld [vmem:[%s5280_s4] ss:$0 sm:$0xff]  ;;  %vm1720_vm0 = vweird.f32 %v4282_v36 }
 0x2d6   :  { %2655 = vst [vmem:[%s5283_s7 + $0x40] sm:$0xff] %v2592_v52  ;;  %2887 = vpow2.f32 %v1375_v29  ;;  %1216 = vmax.xlane.f32.xlu2 %v4305_v57  ;;  %1499 = vadd.xlane.f32.xlu1 %v4287_v19  ;;  %vm1711_vm14 = vcmp.eq.f32.partialorder %v1710_v3, 8.507059e+37  ;;  %v2530_v52 = vsel %vm2520_vm4, %v3695_v2, 0.0 }
 0x2d7   :  { %v1705_v49 = vadd.f32 %v2882_v63, %v1704_v16  ;;  %v1726_v16 = vand.u32 2147483648, %v4282_v36 }
 0x2d8   :  { %v2886_v6 = vpop.eup %2885  ;;  %v764_v14 = vpop.f32.mrf.mxu3 }
 0x2d9   :  { %v1709_v59 = vsel %vm1708_vm13, %v2882_v63, %v1705_v49  ;;  %v1716_v1 = vmul.f32 %v2886_v6, %v4282_v36  ;;  %v765_v25 = vadd.f32 %v4314_v61, %v764_v14  ;;  %v4317_v23 = vpop.xlane.xlu2 %1471  ;;  %v1189_v35 = vpop.xlane.xlu0 %1188  ;;  %vm1721_vm15 = vweird.f32 %v2886_v6 }
 0x2da   :  { %v1714_v15 = vsel %vm1711_vm14, %v1713_v17, %v1709_v59  ;;  %2889 = vrcp.f32 %v4317_v23  ;;  %v1005_v9 = vpop.f32.mrf.mxu2  ;;  %v1287_v3 = vsub.f32 %v3956_v41, %v1189_v35  ;;  %vm1722_vm2 = vmor %vm1720_vm0, %vm1721_vm15  ;;  %vm1734_vm6 = vweird.f32 %v4317_v23 }
 0x2db   :  { %v2466_v38 = vmul.f32 %v3921_v56, %v1714_v15  ;;  %v1717_v63 = vsub.f32 1.0, %v1716_v1  ;;  %v837_v45 = vmax.f32 %v765_v25, 0.0  ;;  %v4329_v49 = vadd.f32 %v4051_v28, %v1005_v9 }
 0x2dc   :  { %v4321_v29 = vpop.eup %2887  ;;  %v1724_v56 = vand.u32 2147483647, %v4282_v36  ;;  %v1377_v2 = vmul.f32 1.442695, %v1287_v3  ;;  %v1727_v25 = vor.u32 1.1754944e-38, %v1726_v16 }
 0x2dd   :  { %5348 = vst [vmem:[#allocation25_spill] sm:$0xff] %v4329_v49  ;;  %v2593_v17 = vsel %vm1070_vm1, %v2466_v38, %v2530_v52  ;;  %v1718_v14 = vmul.f32 %v2886_v6, %v1717_v63  ;;  %1052 = vmatmul.f32.gmra.mxu3 %v837_v45  ;;  %v4340_v41 = vsel %vm1070_vm1, %v4329_v49, -1e+30 }
 0x2de   :  { %2656 = vst [vmem:[%s5283_s7 + $0x48] sm:$0xff] %v2593_v17  ;;  %1501 = vadd.xlane.f32.xlu2 %v4321_v29  ;;  %1218 = vmax.xlane.f32.xlu0 %v4340_v41  ;;  %2891 = vpow2.f32 %v1377_v2  ;;  %vm1725_vm3 = vcmp.eq.f32.partialorder %v1724_v56, 8.507059e+37  ;;  %v1740_v56 = vand.u32 2147483648, %v4317_v23 }
 0x2df   :  { %v1719_v59 = vadd.f32 %v2886_v6, %v1718_v14 }
 0x2e0   :  { %v2890_v1 = vpop.eup %2889  ;;  %v767_v35 = vpop.f32.mrf.mxu3 }
 0x2e1   :  { %v1723_v15 = vsel %vm1722_vm2, %v2886_v6, %v1719_v59  ;;  %v1730_v9 = vmul.f32 %v2890_v1, %v4317_v23  ;;  %v768_v38 = vadd.f32 %v4314_v61, %v767_v35  ;;  %v1191_v63 = vpop.xlane.xlu1 %1190  ;;  %v4347_v45 = vpop.xlane.xlu0 %1473  ;;  %v2531_v6 = vsel %vm2520_vm4, %v3706_v21, 0.0 }
 0x2e2   :  { %v1728_v52 = vsel %vm1725_vm3, %v1727_v25, %v1723_v15  ;;  %v1288_v36 = vsub.f32 %v3971_v18, %v1191_v63  ;;  %2893 = vrcp.f32 %v4347_v45  ;;  %v1008_v3 = vpop.f32.mrf.mxu2  ;;  %vm1735_vm5 = vweird.f32 %v2890_v1 }
 0x2e3   :  { %v2467_v17 = vmul.f32 %v3936_v20, %v1728_v52  ;;  %v1731_v16 = vsub.f32 1.0, %v1730_v9  ;;  %v838_v14 = vmax.f32 %v768_v38, 0.0  ;;  %v4357_v59 = vadd.f32 %v4051_v28, %v1008_v3  ;;  %vm1736_vm7 = vmor %vm1734_vm6, %vm1735_vm5 }
 0x2e4   :  { %v1379_v2 = vmul.f32 1.442695, %v1288_v36  ;;  %v1738_v35 = vand.u32 2147483647, %v4317_v23  ;;  %v4362_v20 = vpop.eup %2891  ;;  %v1741_v38 = vor.u32 1.1754944e-38, %v1740_v56  ;;  %vm1748_vm10 = vweird.f32 %v4347_v45 }
 0x2e5   :  { %5349 = vst [vmem:[#allocation26_spill] sm:$0xff] %v4357_v59  ;;  %v2594_v18 = vsel %vm1070_vm1, %v2467_v17, %v2531_v6  ;;  %v1732_v25 = vmul.f32 %v2890_v1, %v1731_v16  ;;  %1055 = vmatmul.f32.gmra.mxu3 %v838_v14  ;;  %v4370_v21 = vsel %vm1070_vm1, %v4357_v59, -1e+30  ;;  %v5380_v59 = vld [vmem:[#allocation14_spill] sm:$0xff] }
 0x2e6   :  { %2657 = vst [vmem:[%s5283_s7 + $0x50] sm:$0xff] %v2594_v18  ;;  %2895 = vpow2.f32 %v1379_v2  ;;  %1220 = vmax.xlane.f32.xlu1 %v4370_v21  ;;  %1503 = vadd.xlane.f32.xlu0 %v4362_v20  ;;  %vm1739_vm8 = vcmp.eq.f32.partialorder %v1738_v35, 8.507059e+37  ;;  %v1754_v35 = vand.u32 2147483648, %v4347_v45 }
 0x2e7   :  { %v1733_v15 = vadd.f32 %v2890_v1, %v1732_v25 }
 0x2e8   :  { %v2894_v9 = vpop.eup %2893  ;;  %v770_v63 = vpop.f32.mrf.mxu3 }
 0x2e9   :  { %v1737_v52 = vsel %vm1736_vm7, %v2890_v1, %v1733_v15  ;;  %v1744_v36 = vmul.f32 %v2894_v9, %v4347_v45  ;;  %v771_v3 = vadd.f32 %v4314_v61, %v770_v63  ;;  %v1193_v17 = vpop.xlane.xlu2 %1192  ;;  %v4377_v16 = vpop.xlane.xlu1 %1475  ;;  %v2532_v1 = vsel %vm2520_vm4, %v3717_v37, 0.0 }
 0x2ea   :  { %v1742_v14 = vsel %vm1739_vm8, %v1741_v38, %v1737_v52  ;;  %v1289_v23 = vsub.f32 %v3986_v34, %v1193_v17  ;;  %2897 = vrcp.f32 %v4377_v16  ;;  %v1011_v6 = vpop.f32.mrf.mxu2  ;;  %vm1749_vm9 = vweird.f32 %v2894_v9 }
 0x2eb   :  { %v2468_v2 = vmul.f32 %v3951_v31, %v1742_v14  ;;  %v1745_v18 = vsub.f32 1.0, %v1744_v36  ;;  %v839_v56 = vmax.f32 %v771_v3, 0.0  ;;  %v4389_v38 = vadd.f32 %v4051_v28, %v1011_v6  ;;  %vm1750_vm11 = vmor %vm1748_vm10, %vm1749_vm9 }
 0x2ec   :  { %v4382_v25 = vpop.eup %2895  ;;  %v1381_v15 = vmul.f32 1.442695, %v1289_v23  ;;  %v1752_v31 = vand.u32 2147483647, %v4347_v45  ;;  %v1755_v3 = vor.u32 1.1754944e-38, %v1754_v35  ;;  %v1768_v35 = vand.u32 2147483648, %v4377_v16 }
 0x2ed   :  { %5350 = vst [vmem:[#allocation27_spill] sm:$0xff] %v4389_v38  ;;  %v2595_v34 = vsel %vm1070_vm1, %v2468_v2, %v2532_v1  ;;  %v1746_v63 = vmul.f32 %v2894_v9, %v1745_v18  ;;  %1058 = vmatmul.f32.gmra.mxu3 %v839_v56  ;;  %v4400_v37 = vsel %vm1070_vm1, %v4389_v38, -1e+30  ;;  %vm1762_vm14 = vweird.f32 %v4377_v16 }
 0x2ee   :  { %2658 = vst [vmem:[%s5283_s7 + $0x58] sm:$0xff] %v2595_v34  ;;  %2899 = vpow2.f32 %v1381_v15  ;;  %1222 = vmax.xlane.f32.xlu2 %v4400_v37  ;;  %1505 = vadd.xlane.f32.xlu1 %v4382_v25  ;;  %vm1753_vm12 = vcmp.eq.f32.partialorder %v1752_v31, 8.507059e+37 }
 0x2ef   :  { %v1747_v52 = vadd.f32 %v2894_v9, %v1746_v63 }
 0x2f0   :  { %v2898_v36 = vpop.eup %2897  ;;  %v773_v17 = vpop.f32.mrf.mxu3 }
 0x2f1   :  { %v1751_v14 = vsel %vm1750_vm11, %v2894_v9, %v1747_v52  ;;  %v1758_v23 = vmul.f32 %v2898_v36, %v4377_v16  ;;  %v774_v6 = vadd.f32 %v4314_v61, %v773_v17  ;;  %v4407_v2 = vpop.xlane.xlu2 %1477  ;;  %v1195_v18 = vpop.xlane.xlu0 %1194  ;;  %v2533_v9 = vsel %vm2520_vm4, %v3728_v46, 0.0 }
 0x2f2   :  { %v1756_v56 = vsel %vm1753_vm12, %v1755_v3, %v1751_v14  ;;  %2901 = vrcp.f32 %v4407_v2  ;;  %v1014_v45 = vpop.f32.mrf.mxu2  ;;  %v1290_v31 = vsub.f32 %v3999_v48, %v1195_v18  ;;  %vm1763_vm13 = vweird.f32 %v2898_v36 }
 0x2f3   :  { %v2469_v1 = vmul.f32 %v3966_v8, %v1756_v56  ;;  %v1759_v15 = vsub.f32 1.0, %v1758_v23  ;;  %v840_v34 = vmax.f32 %v774_v6, 0.0  ;;  %v4419_v52 = vadd.f32 %v4051_v28, %v1014_v45  ;;  %vm1764_vm15 = vmor %vm1762_vm14, %vm1763_vm13 }
 0x2f4   :  { %v4411_v63 = vpop.eup %2899  ;;  %v1766_v8 = vand.u32 2147483647, %v4377_v16  ;;  %v1383_v46 = vmul.f32 1.442695, %v1290_v31  ;;  %v1769_v6 = vor.u32 1.1754944e-38, %v1768_v35  ;;  %v1782_v35 = vand.u32 2147483648, %v4407_v2 }
 0x2f5   :  { %5351 = vst [vmem:[#allocation28_spill] sm:$0xff] %v4419_v52  ;;  %v2596_v3 = vsel %vm1070_vm1, %v2469_v1, %v2533_v9  ;;  %v1760_v17 = vmul.f32 %v2898_v36, %v1759_v15  ;;  %1061 = vmatmul.f32.gmra.mxu3 %v840_v34  ;;  %v4430_v48 = vsel %vm1070_vm1, %v4419_v52, -1e+30  ;;  %vm1776_vm3 = vweird.f32 %v4407_v2 }
 0x2f6   :  { %2659 = vst [vmem:[%s5283_s7 + $0x60] sm:$0xff] %v2596_v3  ;;  %1507 = vadd.xlane.f32.xlu2 %v4411_v63  ;;  %1224 = vmax.xlane.f32.xlu0 %v4430_v48  ;;  %2903 = vpow2.f32 %v1383_v46  ;;  %vm1767_vm0 = vcmp.eq.f32.partialorder %v1766_v8, 8.507059e+37 }
 0x2f7   :  { %v1761_v14 = vadd.f32 %v2898_v36, %v1760_v17 }
 0x2f8   :  { %v2902_v23 = vpop.eup %2901  ;;  %v776_v18 = vpop.f32.mrf.mxu3 }
 0x2f9   :  { %v1765_v56 = vsel %vm1764_vm15, %v2898_v36, %v1761_v14  ;;  %v1772_v45 = vmul.f32 %v2902_v23, %v4407_v2  ;;  %v777_v1 = vadd.f32 %v4314_v61, %v776_v18  ;;  %v1197_v15 = vpop.xlane.xlu1 %1196  ;;  %v1480_v34 = vpop.xlane.xlu0 %1479  ;;  %v2534_v36 = vsel %vm2520_vm4, %v3739_v0, 0.0 }
 0x2fa   :  { %v1770_v9 = vsel %vm1767_vm0, %v1769_v6, %v1765_v56  ;;  %v1291_v16 = vsub.f32 %v4013_v27, %v1197_v15  ;;  %2905 = vrcp.f32 %v1480_v34  ;;  %v1017_v31 = vpop.f32.mrf.mxu2  ;;  %vm1777_vm2 = vweird.f32 %v2902_v23 }
 0x2fb   :  { %v2470_v3 = vmul.f32 %v3981_v53, %v1770_v9  ;;  %v1773_v17 = vsub.f32 1.0, %v1772_v45  ;;  %v841_v38 = vmax.f32 %v777_v1, 0.0  ;;  %v4444_v61 = vadd.f32 %v4051_v28, %v1017_v31  ;;  %vm1778_vm5 = vmor %vm1776_vm3, %vm1777_vm2 }
 0x2fc   :  { %v1385_v8 = vmul.f32 1.442695, %v1291_v16  ;;  %v1780_v14 = vand.u32 2147483647, %v4407_v2  ;;  %v4449_v53 = vpop.eup %2903  ;;  %v1783_v18 = vor.u32 1.1754944e-38, %v1782_v35  ;;  %v5353_v2 = vld [vmem:[#allocation2_spill] sm:$0xff]  ;;  %vm1790_vm8 = vweird.f32 %v1480_v34 }
 0x2fd   :  { %5352 = vst [vmem:[#allocation29_spill] sm:$0xff] %v4444_v61  ;;  %v2597_v46 = vsel %vm1070_vm1, %v2470_v3, %v2534_v36  ;;  %v1774_v27 = vmul.f32 %v2902_v23, %v1773_v17  ;;  %1064 = vmatmul.f32.gmra.mxu3 %v841_v38  ;;  %v4457_v0 = vsel %vm1070_vm1, %v4444_v61, -1e+30  ;;  %v2535_v17 = vsel %vm2520_vm4, %v5353_v2, 0.0 }
 0x2fe   :  { %2660 = vst [vmem:[%s5283_s7 + $0x68] sm:$0xff] %v2597_v46  ;;  %2907 = vpow2.f32 %v1385_v8  ;;  %1226 = vmax.xlane.f32.xlu1 %v4457_v0  ;;  %1509 = vadd.xlane.f32.xlu0 %v4449_v53  ;;  %vm1781_vm6 = vcmp.eq.f32.partialorder %v1780_v14, 8.507059e+37  ;;  %v1796_v36 = vand.u32 2147483648, %v1480_v34  ;;  %v1794_v8 = vand.u32 2147483647, %v1480_v34  ;;  %v5354_v46 = vld [vmem:[#allocation23_spill] sm:$0xff] }
 0x2ff   :  { %v1775_v6 = vadd.f32 %v2902_v23, %v1774_v27 }
 0x300   :  { %v2906_v38 = vpop.eup %2905  ;;  %vm1795_vm10 = vcmp.eq.f32.partialorder %v1794_v8, 8.507059e+37 }
 0x301   :  { %v1779_v56 = vsel %vm1778_vm5, %v2902_v23, %v1775_v6  ;;  %v1786_v45 = vmul.f32 %v2906_v38, %v1480_v34  ;;  %v1199_v1 = vpop.xlane.xlu2 %1198  ;;  %v1482_v15 = vpop.xlane.xlu1 %1481  ;;  %vm1791_vm7 = vweird.f32 %v2906_v38  ;;  %v1797_v6 = vor.u32 1.1754944e-38, %v1796_v36 }
 0x302   :  { %v1784_v9 = vsel %vm1781_vm6, %v1783_v18, %v1779_v56  ;;  %2909 = vrcp.f32 %v1482_v15  ;;  %vm1792_vm9 = vmor %vm1790_vm8, %vm1791_vm7  ;;  %v1810_v36 = vand.u32 2147483648, %v1482_v15  ;;  %vm1804_vm12 = vweird.f32 %v1482_v15 }
 0x303   :  { %v2471_v16 = vmul.f32 %v3994_v60, %v1784_v9  ;;  %v1787_v31 = vsub.f32 1.0, %v1786_v45  ;;  %v1292_v60 = vsub.f32 %v5354_v46, %v1199_v1  ;;  %v5356_v1 = vld [vmem:[#allocation20_spill] sm:$0xff] }
 0x304   :  { %v4463_v3 = vpop.eup %2907 }
 0x305   :  { %v2598_v35 = vsel %vm1070_vm1, %v2471_v16, %v2535_v17  ;;  %v1788_v23 = vmul.f32 %v2906_v38, %v1787_v31  ;;  %v1387_v2 = vmul.f32 1.442695, %v1292_v60  ;;  %v1808_v60 = vand.u32 2147483647, %v1482_v15 }
 0x306   :  { %2661 = vst [vmem:[%s5283_s7 + $0x70] sm:$0xff] %v2598_v35  ;;  %1511 = vadd.xlane.f32.xlu1 %v4463_v3 }
 0x307   :  { %v1789_v27 = vadd.f32 %v2906_v38, %v1788_v23  ;;  %v5357_v23 = vld [vmem:[#allocation3_spill] sm:$0xff]  ;;  %vm1809_vm14 = vcmp.eq.f32.partialorder %v1808_v60, 8.507059e+37 }
 0x308   :  { %v2910_v14 = vpop.eup %2909  ;;  %v1020_v18 = vpop.f32.mrf.mxu3  ;;  %v2536_v46 = vsel %vm2520_vm4, %v5357_v23, 0.0 }
 0x309   :  { %v1793_v56 = vsel %vm1792_vm9, %v2906_v38, %v1789_v27  ;;  %v1800_v45 = vmul.f32 %v2910_v14, %v1482_v15  ;;  %v4476_v9 = vadd.f32 %v4051_v28, %v1020_v18  ;;  %v1484_v16 = vpop.xlane.xlu2 %1483  ;;  %v1201_v17 = vpop.xlane.xlu0 %1200  ;;  %vm1805_vm11 = vweird.f32 %v2910_v14 }
 0x30a   :  { %v1798_v31 = vsel %vm1795_vm10, %v1797_v6, %v1793_v56  ;;  %2911 = vrcp.f32 %v1484_v16  ;;  %v1293_v6 = vsub.f32 %v4066_v12, %v1201_v17  ;;  %vm1806_vm13 = vmor %vm1804_vm12, %vm1805_vm11  ;;  %v1811_v56 = vor.u32 1.1754944e-38, %v1810_v36 }
 0x30b   :  { %5355 = vst [vmem:[#allocation2_spill] sm:$0xff] %v4476_v9  ;;  %v2472_v35 = vmul.f32 %v5356_v1, %v1798_v31  ;;  %v1801_v34 = vsub.f32 1.0, %v1800_v45  ;;  %v4485_v38 = vsel %vm1070_vm1, %v4476_v9, -1e+30  ;;  %2913 = vpow2.f32 %v1387_v2 }
 0x30c   :  { %1228 = vmax.xlane.f32.xlu2 %v4485_v38  ;;  %v1822_v60 = vand.u32 2147483647, %v1484_v16  ;;  %vm1818_vm0 = vweird.f32 %v1484_v16 }
 0x30d   :  { %v2599_v28 = vsel %vm1070_vm1, %v2472_v35, %v2536_v46  ;;  %v1802_v8 = vmul.f32 %v2910_v14, %v1801_v34  ;;  %v4497_v35 = vld [vmem:[%s5282_s6] ss:$0 sm:$0xff] }
 0x30e   :  { %2662 = vst [vmem:[%s5283_s7 + $0x78] sm:$0xff] %v2599_v28  ;;  %v5359_v46 = vld [vmem:[#allocation22_spill] sm:$0xff]  ;;  %v1389_v28 = vmul.f32 1.442695, %v1293_v6  ;;  %vm1823_vm3 = vcmp.eq.f32.partialorder %v1822_v60, 8.507059e+37 }
 0x30f   :  { %v1803_v27 = vadd.f32 %v2910_v14, %v1802_v8 }
 0x310   :  { %v2912_v18 = vpop.eup %2911  ;;  %v1023_v45 = vpop.f32.mrf.mxu3 }
 0x311   :  { %v1807_v31 = vsel %vm1806_vm13, %v2910_v14, %v1803_v27  ;;  %v1814_v1 = vmul.f32 %v2912_v18, %v1484_v16  ;;  %v4500_v34 = vadd.f32 %v4497_v35, %v1023_v45  ;;  %v1203_v23 = vpop.xlane.xlu1 %1202  ;;  %v1486_v15 = vpop.xlane.xlu0 %1485  ;;  %v5360_v14 = vld [vmem:[#allocation4_spill] sm:$0xff]  ;;  %v1824_v27 = vand.u32 2147483648, %v1484_v16  ;;  %v5362_v16 = vld [vmem:[#allocation5_spill] sm:$0xff] }
 0x312   :  { %v1812_v2 = vsel %vm1809_vm14, %v1811_v56, %v1807_v31  ;;  %v4503_v36 = vpop.eup %2913  ;;  %v2537_v8 = vsel %vm2520_vm4, %v5360_v14, 0.0  ;;  %2915 = vrcp.f32 %v1486_v15  ;;  %vm1819_vm15 = vweird.f32 %v2912_v18 }
 0x313   :  { %5358 = vst [vmem:[#allocation23_spill] sm:$0xff] %v4500_v34  ;;  %v2473_v12 = vmul.f32 %v5359_v46, %v1812_v2  ;;  %v1815_v17 = vsub.f32 1.0, %v1814_v1  ;;  %v4514_v6 = vsel %vm1070_vm1, %v4500_v34, -1e+30  ;;  %2917 = vpow2.f32 %v1389_v28  ;;  %vm1820_vm2 = vmor %vm1818_vm0, %vm1819_vm15 }
 0x314   :  { %1513 = vadd.xlane.f32.xlu2 %v4503_v36  ;;  %1230 = vmax.xlane.f32.xlu0 %v4514_v6  ;;  %v1294_v31 = vsub.f32 %v4095_v40, %v1203_v23  ;;  %v1825_v1 = vor.u32 1.1754944e-38, %v1824_v27  ;;  %v2538_v40 = vsel %vm2520_vm4, %v5362_v16, 0.0  ;;  %vm1832_vm6 = vweird.f32 %v1486_v15 }
 0x315   :  { %v2600_v45 = vsel %vm1070_vm1, %v2473_v12, %v2537_v8  ;;  %v1816_v9 = vmul.f32 %v2912_v18, %v1815_v17 }
 0x316   :  { %2663 = vst [vmem:[%s5283_s7 + $0x80] sm:$0xff] %v2600_v45  ;;  %v1391_v61 = vmul.f32 1.442695, %v1294_v31 }
 0x317   :  { %v1817_v56 = vadd.f32 %v2912_v18, %v1816_v9 }
 0x318   :  { %v1026_v2 = vpop.f32.mrf.mxu3  ;;  %v2916_v17 = vpop.eup %2915 }
 0x319   :  { %v1821_v46 = vsel %vm1820_vm2, %v2912_v18, %v1817_v56  ;;  %v4522_v12 = vadd.f32 %v4497_v35, %v1026_v2  ;;  %v1205_v8 = vpop.xlane.xlu2 %1204  ;;  %v1488_v34 = vpop.xlane.xlu1 %1487  ;;  %v1828_v9 = vmul.f32 %v2916_v17, %v1486_v15  ;;  %vm1833_vm5 = vweird.f32 %v2916_v17 }
 0x31a   :  { %v1826_v14 = vsel %vm1823_vm3, %v1825_v1, %v1821_v46  ;;  %2919 = vrcp.f32 %v1488_v34  ;;  %v4528_v23 = vpop.eup %2917  ;;  %v1836_v56 = vand.u32 2147483647, %v1486_v15  ;;  %v1295_v31 = vsub.f32 %v4125_v50, %v1205_v8  ;;  %vm1834_vm7 = vmor %vm1832_vm6, %vm1833_vm5 }
 0x31b   :  { %5361 = vst [vmem:[#allocation20_spill] sm:$0xff] %v4522_v12  ;;  %v2474_v45 = vmul.f32 %v4041_v7, %v1826_v14  ;;  %v1829_v28 = vsub.f32 1.0, %v1828_v9  ;;  %v4535_v60 = vsel %vm1070_vm1, %v4522_v12, -1e+30  ;;  %v1838_v7 = vand.u32 2147483648, %v1486_v15 }
 0x31c   :  { %1232 = vmax.xlane.f32.xlu1 %v4535_v60  ;;  %1515 = vadd.xlane.f32.xlu0 %v4528_v23  ;;  %2921 = vpow2.f32 %v1391_v61  ;;  %vm1837_vm8 = vcmp.eq.f32.partialorder %v1836_v56, 8.507059e+37  ;;  %vm1846_vm10 = vweird.f32 %v1488_v34 }
 0x31d   :  { %v2601_v18 = vsel %vm1070_vm1, %v2474_v45, %v2538_v40  ;;  %v1830_v27 = vmul.f32 %v2916_v17, %v1829_v28  ;;  %v1839_v14 = vor.u32 1.1754944e-38, %v1838_v7  ;;  %v1393_v28 = vmul.f32 1.442695, %v1295_v31 }
 0x31e   :  { %2664 = vst [vmem:[%s5283_s7 + $0x88] sm:$0xff] %v2601_v18 }
 0x31f   :  { %v1831_v2 = vadd.f32 %v2916_v17, %v1830_v27  ;;  %v5364_v27 = vld [vmem:[#allocation6_spill] sm:$0xff] }
 0x320   :  { %v1029_v1 = vpop.f32.mrf.mxu3  ;;  %v2920_v46 = vpop.eup %2919  ;;  %v2539_v7 = vsel %vm2520_vm4, %v5364_v27, 0.0 }
 0x321   :  { %v4544_v45 = vadd.f32 %v4497_v35, %v1029_v1  ;;  %v4546_v9 = vpop.xlane.xlu2 %1489  ;;  %v1207_v16 = vpop.xlane.xlu0 %1206  ;;  %v1835_v40 = vsel %vm1834_vm7, %v2916_v17, %v1831_v2  ;;  %v1842_v61 = vmul.f32 %v2920_v46, %v1488_v34  ;;  %v1852_v1 = vand.u32 2147483648, %v1488_v34 }
 0x322   :  { %v1840_v18 = vsel %vm1837_vm8, %v1839_v14, %v1835_v40  ;;  %2923 = vrcp.f32 %v4546_v9  ;;  %v4549_v50 = vpop.eup %2921  ;;  %vm1847_vm9 = vweird.f32 %v2920_v46  ;;  %v1850_v2 = vand.u32 2147483647, %v1488_v34 }
 0x323   :  { %5363 = vst [vmem:[#allocation3_spill] sm:$0xff] %v4544_v45  ;;  %v2475_v15 = vmul.f32 %v4087_v24, %v1840_v18  ;;  %v1843_v8 = vsub.f32 1.0, %v1842_v61  ;;  %v4558_v17 = vsel %vm1070_vm1, %v4544_v45, -1e+30  ;;  %2925 = vpow2.f32 %v1393_v28  ;;  %vm1848_vm11 = vmor %vm1846_vm10, %vm1847_vm9 }
 0x324   :  { %1517 = vadd.xlane.f32.xlu1 %v4549_v50  ;;  %1234 = vmax.xlane.f32.xlu2 %v4558_v17  ;;  %v1296_v24 = vsub.f32 %v4155_v32, %v1207_v16  ;;  %v1853_v18 = vor.u32 1.1754944e-38, %v1852_v1  ;;  %vm1851_vm12 = vcmp.eq.f32.partialorder %v1850_v2, 8.507059e+37  ;;  %v5366_v1 = vld [vmem:[#allocation7_spill] sm:$0xff]  ;;  %vm1860_vm14 = vweird.f32 %v4546_v9 }
 0x325   :  { %v2602_v56 = vsel %vm1070_vm1, %v2475_v15, %v2539_v7  ;;  %v1844_v31 = vmul.f32 %v2920_v46, %v1843_v8 }
 0x326   :  { %2665 = vst [vmem:[%s5283_s7 + $0x90] sm:$0xff] %v2602_v56  ;;  %v1395_v28 = vmul.f32 1.442695, %v1296_v24 }
 0x327   :  { %v1845_v40 = vadd.f32 %v2920_v46, %v1844_v31  ;;  %v2540_v31 = vsel %vm2520_vm4, %v5366_v1, 0.0 }
 0x328   :  { %v1032_v14 = vpop.f32.mrf.mxu3  ;;  %v2924_v61 = vpop.eup %2923 }
 0x329   :  { %v4569_v15 = vadd.f32 %v4497_v35, %v1032_v14  ;;  %v1209_v8 = vpop.xlane.xlu1 %1208  ;;  %v4571_v27 = vpop.xlane.xlu0 %1491  ;;  %v1849_v7 = vsel %vm1848_vm11, %v2920_v46, %v1845_v40  ;;  %v1856_v45 = vmul.f32 %v2924_v61, %v4546_v9  ;;  %v1866_v14 = vand.u32 2147483648, %v4546_v9 }
 0x32a   :  { %v1854_v56 = vsel %vm1851_vm12, %v1853_v18, %v1849_v7  ;;  %2927 = vrcp.f32 %v4571_v27  ;;  %v4576_v16 = vpop.eup %2925  ;;  %vm1861_vm13 = vweird.f32 %v2924_v61  ;;  %vm1874_vm3 = vweird.f32 %v4571_v27 }
 0x32b   :  { %5365 = vst [vmem:[#allocation22_spill] sm:$0xff] %v4569_v15  ;;  %v2476_v32 = vmul.f32 %v4107_v58, %v1854_v56  ;;  %v1857_v34 = vsub.f32 1.0, %v1856_v45  ;;  %v4585_v46 = vsel %vm1070_vm1, %v4569_v15, -1e+30  ;;  %v1864_v58 = vand.u32 2147483647, %v4546_v9  ;;  %vm1862_vm15 = vmor %vm1860_vm14, %vm1861_vm13 }
 0x32c   :  { %1519 = vadd.xlane.f32.xlu2 %v4576_v16  ;;  %1236 = vmax.xlane.f32.xlu0 %v4585_v46  ;;  %2929 = vpow2.f32 %v1395_v28  ;;  %v1297_v45 = vsub.f32 %v4185_v13, %v1209_v8  ;;  %v1867_v56 = vor.u32 1.1754944e-38, %v1866_v14  ;;  %v5368_v14 = vld [vmem:[#allocation8_spill] sm:$0xff] }
 0x32d   :  { %v2603_v2 = vsel %vm1070_vm1, %v2476_v32, %v2540_v31  ;;  %v1858_v24 = vmul.f32 %v2924_v61, %v1857_v34  ;;  %vm1865_vm0 = vcmp.eq.f32.partialorder %v1864_v58, 8.507059e+37 }
 0x32e   :  { %2666 = vst [vmem:[%s5283_s7 + $0x98] sm:$0xff] %v2603_v2  ;;  %v1397_v15 = vmul.f32 1.442695, %v1297_v45 }
 0x32f   :  { %v1859_v18 = vadd.f32 %v2924_v61, %v1858_v24  ;;  %v2541_v24 = vsel %vm2520_vm4, %v5368_v14, 0.0 }
 0x330   :  { %v1035_v40 = vpop.f32.mrf.mxu3  ;;  %v2928_v7 = vpop.eup %2927 }
 0x331   :  { %v4598_v32 = vadd.f32 %v4497_v35, %v1035_v40  ;;  %v1211_v34 = vpop.xlane.xlu2 %1210  ;;  %v4600_v1 = vpop.xlane.xlu1 %1493  ;;  %v1863_v31 = vsel %vm1862_vm15, %v2924_v61, %v1859_v18  ;;  %v1870_v2 = vmul.f32 %v2928_v7, %v4571_v27  ;;  %v1880_v40 = vand.u32 2147483648, %v4571_v27 }
 0x332   :  { %v1868_v28 = vsel %vm1865_vm0, %v1867_v56, %v1863_v31  ;;  %2931 = vrcp.f32 %v4600_v1  ;;  %v4605_v8 = vpop.eup %2929  ;;  %vm1875_vm2 = vweird.f32 %v2928_v7  ;;  %v1298_v18 = vsub.f32 %v4215_v11, %v1211_v34 }
 0x333   :  { %5367 = vst [vmem:[#allocation4_spill] sm:$0xff] %v4598_v32  ;;  %v2477_v13 = vmul.f32 %v4136_v47, %v1868_v28  ;;  %v1871_v9 = vsub.f32 1.0, %v1870_v2  ;;  %v4614_v61 = vsel %vm1070_vm1, %v4598_v32, -1e+30  ;;  %v1878_v47 = vand.u32 2147483647, %v4571_v27  ;;  %vm1876_vm5 = vmor %vm1874_vm3, %vm1875_vm2 }
 0x334   :  { %1238 = vmax.xlane.f32.xlu1 %v4614_v61  ;;  %1521 = vadd.xlane.f32.xlu0 %v4605_v8  ;;  %2933 = vpow2.f32 %v1397_v15  ;;  %v1881_v28 = vor.u32 1.1754944e-38, %v1880_v40  ;;  %v1399_v32 = vmul.f32 1.442695, %v1298_v18  ;;  %v5370_v40 = vld [vmem:[#allocation9_spill] sm:$0xff]  ;;  %vm1888_vm8 = vweird.f32 %v4600_v1 }
 0x335   :  { %v2604_v58 = vsel %vm1070_vm1, %v2477_v13, %v2541_v24  ;;  %v1872_v45 = vmul.f32 %v2928_v7, %v1871_v9  ;;  %vm1879_vm6 = vcmp.eq.f32.partialorder %v1878_v47, 8.507059e+37 }
 0x336   :  { %2667 = vst [vmem:[%s5283_s7 + $0xa0] sm:$0xff] %v2604_v58 }
 0x337   :  { %v1873_v31 = vadd.f32 %v2928_v7, %v1872_v45  ;;  %v2542_v45 = vsel %vm2520_vm4, %v5370_v40, 0.0 }
 0x338   :  { %v1038_v56 = vpop.f32.mrf.mxu3  ;;  %v2932_v2 = vpop.eup %2931 }
 0x339   :  { %v4627_v13 = vadd.f32 %v4497_v35, %v1038_v56  ;;  %v4629_v9 = vpop.xlane.xlu2 %1495  ;;  %v1213_v14 = vpop.xlane.xlu0 %1212  ;;  %v1877_v24 = vsel %vm1876_vm5, %v2928_v7, %v1873_v31  ;;  %v1884_v58 = vmul.f32 %v2932_v2, %v4600_v1  ;;  %v1894_v56 = vand.u32 2147483648, %v4600_v1 }
 0x33a   :  { %v1882_v15 = vsel %vm1879_vm6, %v1881_v28, %v1877_v24  ;;  %2935 = vrcp.f32 %v4629_v9  ;;  %v4634_v34 = vpop.eup %2933  ;;  %vm1889_vm7 = vweird.f32 %v2932_v2  ;;  %v1299_v31 = vsub.f32 %v4245_v51, %v1213_v14 }
 0x33b   :  { %5369 = vst [vmem:[#allocation5_spill] sm:$0xff] %v4627_v13  ;;  %v2478_v11 = vmul.f32 %v4177_v62, %v1882_v15  ;;  %v1885_v27 = vsub.f32 1.0, %v1884_v58  ;;  %v4643_v7 = vsel %vm1070_vm1, %v4627_v13, -1e+30  ;;  %v1892_v62 = vand.u32 2147483647, %v4600_v1  ;;  %vm1890_vm9 = vmor %vm1888_vm8, %vm1889_vm7 }
 0x33c   :  { %1240 = vmax.xlane.f32.xlu2 %v4643_v7  ;;  %1523 = vadd.xlane.f32.xlu1 %v4634_v34  ;;  %2937 = vpow2.f32 %v1399_v32  ;;  %v1895_v15 = vor.u32 1.1754944e-38, %v1894_v56  ;;  %v1401_v13 = vmul.f32 1.442695, %v1299_v31  ;;  %v5372_v56 = vld [vmem:[#allocation10_spill] sm:$0xff]  ;;  %vm1902_vm12 = vweird.f32 %v4629_v9 }
 0x33d   :  { %v2605_v47 = vsel %vm1070_vm1, %v2478_v11, %v2542_v45  ;;  %v1886_v18 = vmul.f32 %v2932_v2, %v1885_v27  ;;  %vm1893_vm10 = vcmp.eq.f32.partialorder %v1892_v62, 8.507059e+37 }
 0x33e   :  { %2668 = vst [vmem:[%s5283_s7 + $0xa8] sm:$0xff] %v2605_v47 }
 0x33f   :  { %v1887_v24 = vadd.f32 %v2932_v2, %v1886_v18  ;;  %v2543_v18 = vsel %vm2520_vm4, %v5372_v56, 0.0 }
 0x340   :  { %v1041_v28 = vpop.f32.mrf.mxu3  ;;  %v2936_v58 = vpop.eup %2935 }
 0x341   :  { %v4656_v11 = vadd.f32 %v4497_v35, %v1041_v28  ;;  %v1215_v27 = vpop.xlane.xlu1 %1214  ;;  %v4658_v40 = vpop.xlane.xlu0 %1497  ;;  %v1891_v45 = vsel %vm1890_vm9, %v2932_v2, %v1887_v24  ;;  %v1898_v47 = vmul.f32 %v2936_v58, %v4629_v9  ;;  %v1908_v28 = vand.u32 2147483648, %v4629_v9 }
 0x342   :  { %v1896_v32 = vsel %vm1893_vm10, %v1895_v15, %v1891_v45  ;;  %2939 = vrcp.f32 %v4658_v40  ;;  %v4663_v14 = vpop.eup %2937  ;;  %vm1903_vm11 = vweird.f32 %v2936_v58  ;;  %v1300_v24 = vsub.f32 %v4275_v44, %v1215_v27 }
 0x343   :  { %5371 = vst [vmem:[#allocation6_spill] sm:$0xff] %v4656_v11  ;;  %v2479_v51 = vmul.f32 %v4197_v22, %v1896_v32  ;;  %v1899_v1 = vsub.f32 1.0, %v1898_v47  ;;  %v4672_v2 = vsel %vm1070_vm1, %v4656_v11, -1e+30  ;;  %v1906_v22 = vand.u32 2147483647, %v4629_v9  ;;  %vm1904_vm13 = vmor %vm1902_vm12, %vm1903_vm11 }
 0x344   :  { %1525 = vadd.xlane.f32.xlu2 %v4663_v14  ;;  %1242 = vmax.xlane.f32.xlu0 %v4672_v2  ;;  %2941 = vpow2.f32 %v1401_v13  ;;  %v1909_v32 = vor.u32 1.1754944e-38, %v1908_v28  ;;  %v1403_v13 = vmul.f32 1.442695, %v1300_v24  ;;  %v5374_v9 = vld [vmem:[#allocation11_spill] sm:$0xff]  ;;  %vm1916_vm0 = vweird.f32 %v4658_v40 }
 0x345   :  { %v2606_v62 = vsel %vm1070_vm1, %v2479_v51, %v2543_v18  ;;  %v1900_v31 = vmul.f32 %v2936_v58, %v1899_v1  ;;  %vm1907_vm14 = vcmp.eq.f32.partialorder %v1906_v22, 8.507059e+37  ;;  %v2544_v28 = vsel %vm2520_vm4, %v5374_v9, 0.0 }
 0x346   :  { %2669 = vst [vmem:[%s5283_s7 + $0xb0] sm:$0xff] %v2606_v62 }
 0x347   :  { %v1901_v45 = vadd.f32 %v2936_v58, %v1900_v31 }
 0x348   :  { %v1044_v15 = vpop.f32.mrf.mxu3  ;;  %v2940_v47 = vpop.eup %2939 }
 0x349   :  { %v4685_v51 = vadd.f32 %v4497_v35, %v1044_v15  ;;  %v1217_v1 = vpop.xlane.xlu2 %1216  ;;  %v1500_v56 = vpop.xlane.xlu1 %1499  ;;  %v1905_v18 = vsel %vm1904_vm13, %v2936_v58, %v1901_v45  ;;  %v1912_v11 = vmul.f32 %v2940_v47, %v4658_v40  ;;  %v1922_v15 = vand.u32 2147483648, %v4658_v40 }
 0x34a   :  { %v1910_v62 = vsel %vm1907_vm14, %v1909_v32, %v1905_v18  ;;  %2943 = vrcp.f32 %v1500_v56  ;;  %v4689_v31 = vpop.eup %2941  ;;  %vm1917_vm15 = vweird.f32 %v2940_v47  ;;  %vm1930_vm6 = vweird.f32 %v1500_v56 }
 0x34b   :  { %5373 = vst [vmem:[#allocation7_spill] sm:$0xff] %v4685_v51  ;;  %v2480_v44 = vmul.f32 %v4226_v39, %v1910_v62  ;;  %v1913_v27 = vsub.f32 1.0, %v1912_v11  ;;  %v4698_v58 = vsel %vm1070_vm1, %v4685_v51, -1e+30  ;;  %v1920_v39 = vand.u32 2147483647, %v4658_v40  ;;  %vm1918_vm2 = vmor %vm1916_vm0, %vm1917_vm15 }
 0x34c   :  { %1244 = vmax.xlane.f32.xlu1 %v4698_v58  ;;  %1527 = vadd.xlane.f32.xlu0 %v4689_v31  ;;  %2945 = vpow2.f32 %v1403_v13  ;;  %v1301_v11 = vsub.f32 %v4305_v57, %v1217_v1  ;;  %v1923_v62 = vor.u32 1.1754944e-38, %v1922_v15  ;;  %v5376_v40 = vld [vmem:[#allocation12_spill] sm:$0xff] }
 0x34d   :  { %v2607_v22 = vsel %vm1070_vm1, %v2480_v44, %v2544_v28  ;;  %v1914_v24 = vmul.f32 %v2940_v47, %v1913_v27  ;;  %vm1921_vm3 = vcmp.eq.f32.partialorder %v1920_v39, 8.507059e+37  ;;  %v2545_v15 = vsel %vm2520_vm4, %v5376_v40, 0.0 }
 0x34e   :  { %2670 = vst [vmem:[%s5283_s7 + $0xb8] sm:$0xff] %v2607_v22  ;;  %v1405_v13 = vmul.f32 1.442695, %v1301_v11  ;;  %v1934_v11 = vand.u32 2147483647, %v1500_v56 }
 0x34f   :  { %v1915_v32 = vadd.f32 %v2940_v47, %v1914_v24 }
 0x350   :  { %v1047_v45 = vpop.f32.mrf.mxu3  ;;  %v2944_v18 = vpop.eup %2943  ;;  %vm1935_vm8 = vcmp.eq.f32.partialorder %v1934_v11, 8.507059e+37 }
 0x351   :  { %v4711_v44 = vadd.f32 %v4497_v35, %v1047_v45  ;;  %v1502_v27 = vpop.xlane.xlu2 %1501  ;;  %v4713_v9 = vpop.xlane.xlu0 %1218  ;;  %v1919_v28 = vsel %vm1918_vm2, %v2940_v47, %v1915_v32  ;;  %v1926_v51 = vmul.f32 %v2944_v18, %v1500_v56  ;;  %v1936_v45 = vand.u32 2147483648, %v1500_v56  ;;  %v5378_v56 = vld [vmem:[#allocation13_spill] sm:$0xff] }
 0x352   :  { %v1924_v22 = vsel %vm1921_vm3, %v1923_v62, %v1919_v28  ;;  %2947 = vrcp.f32 %v1502_v27  ;;  %v4716_v24 = vpop.eup %2945  ;;  %vm1931_vm5 = vweird.f32 %v2944_v18  ;;  %vm1944_vm10 = vweird.f32 %v1502_v27 }
 0x353   :  { %5375 = vst [vmem:[#allocation8_spill] sm:$0xff] %v4711_v44  ;;  %v2481_v57 = vmul.f32 %v4267_v42, %v1924_v22  ;;  %v1927_v1 = vsub.f32 1.0, %v1926_v51  ;;  %v4724_v12 = vsel %vm1070_vm1, %v4711_v44, -1e+30  ;;  %2949 = vpow2.f32 %v1405_v13  ;;  %vm1932_vm7 = vmor %vm1930_vm6, %vm1931_vm5 }
 0x354   :  { %1246 = vmax.xlane.f32.xlu2 %v4724_v12  ;;  %1529 = vadd.xlane.f32.xlu1 %v4716_v24  ;;  %v1937_v62 = vor.u32 1.1754944e-38, %v1936_v45  ;;  %v2546_v45 = vsel %vm2520_vm4, %v5378_v56, 0.0 }
 0x355   :  { %v2608_v47 = vsel %vm1070_vm1, %v2481_v57, %v2545_v15  ;;  %v1928_v39 = vmul.f32 %v2944_v18, %v1927_v1 }
 0x356   :  { %2671 = vst [vmem:[%s5283_s7 + $0xc0] sm:$0xff] %v2608_v47 }
 0x357   :  { %v1929_v51 = vadd.f32 %v2944_v18, %v1928_v39  ;;  %v1950_v39 = vand.u32 2147483648, %v1502_v27 }
 0x358   :  { %v1050_v42 = vpop.f32.mrf.mxu3  ;;  %v2948_v32 = vpop.eup %2947 }
 0x359   :  { %v4734_v28 = vadd.f32 %v4497_v35, %v1050_v42  ;;  %v4736_v22 = vpop.xlane.xlu1 %1220  ;;  %v1504_v57 = vpop.xlane.xlu0 %1503  ;;  %v1933_v1 = vsel %vm1932_vm7, %v2944_v18, %v1929_v51  ;;  %v1940_v40 = vmul.f32 %v2948_v32, %v1502_v27  ;;  %vm1945_vm9 = vweird.f32 %v2948_v32 }
 0x35a   :  { %v1938_v15 = vsel %vm1935_vm8, %v1937_v62, %v1933_v1  ;;  %2951 = vrcp.f32 %v1504_v57  ;;  %v4739_v44 = vpop.eup %2949  ;;  %v1948_v51 = vand.u32 2147483647, %v1502_v27  ;;  %vm1946_vm11 = vmor %vm1944_vm10, %vm1945_vm9  ;;  %v2547_v27 = vsel %vm2520_vm4, %v5380_v59, 0.0 }
 0x35b   :  { %5377 = vst [vmem:[#allocation9_spill] sm:$0xff] %v4734_v28  ;;  %v2482_v47 = vmul.f32 %v4287_v19, %v1938_v15  ;;  %v1941_v13 = vsub.f32 1.0, %v1940_v40  ;;  %v4747_v42 = vsel %vm1070_vm1, %v4734_v28, -1e+30  ;;  %v1951_v40 = vor.u32 1.1754944e-38, %v1950_v39 }
 0x35c   :  { %1531 = vadd.xlane.f32.xlu2 %v4739_v44  ;;  %1248 = vmax.xlane.f32.xlu0 %v4747_v42  ;;  %vm1949_vm12 = vcmp.eq.f32.partialorder %v1948_v51, 8.507059e+37  ;;  %vm1958_vm14 = vweird.f32 %v1504_v57 }
 0x35d   :  { %v2609_v18 = vsel %vm1070_vm1, %v2482_v47, %v2546_v45  ;;  %v1942_v11 = vmul.f32 %v2948_v32, %v1941_v13 }
 0x35e   :  { %2672 = vst [vmem:[%s5283_s7 + $0xc8] sm:$0xff] %v2609_v18 }
 0x35f   :  { %v1943_v62 = vadd.f32 %v2948_v32, %v1942_v11  ;;  %v1964_v11 = vand.u32 2147483648, %v1504_v57 }
 0x360   :  { %v1053_v19 = vpop.f32.mrf.mxu3  ;;  %v2952_v1 = vpop.eup %2951 }
 0x361   :  { %v4757_v15 = vadd.f32 %v4497_v35, %v1053_v19  ;;  %v4759_v47 = vpop.xlane.xlu2 %1222  ;;  %v1506_v13 = vpop.xlane.xlu1 %1505  ;;  %v1947_v56 = vsel %vm1946_vm11, %v2948_v32, %v1943_v62  ;;  %v1954_v45 = vmul.f32 %v2952_v1, %v1504_v57  ;;  %vm1959_vm13 = vweird.f32 %v2952_v1 }
 0x362   :  { %v1952_v28 = vsel %vm1949_vm12, %v1951_v40, %v1947_v56  ;;  %2953 = vrcp.f32 %v1506_v13  ;;  %v1962_v19 = vand.u32 2147483647, %v1504_v57  ;;  %vm1960_vm15 = vmor %vm1958_vm14, %vm1959_vm13  ;;  %v1965_v62 = vor.u32 1.1754944e-38, %v1964_v11 }
 0x363   :  { %5379 = vst [vmem:[#allocation10_spill] sm:$0xff] %v4757_v15  ;;  %v2483_v52 = vmul.f32 %v4321_v29, %v1952_v28  ;;  %v1955_v18 = vsub.f32 1.0, %v1954_v45  ;;  %v4768_v39 = vsel %vm1070_vm1, %v4757_v15, -1e+30  ;;  %vm1972_vm3 = vweird.f32 %v1506_v13 }
 0x364   :  { %1250 = vmax.xlane.f32.xlu1 %v4768_v39  ;;  %vm1963_vm0 = vcmp.eq.f32.partialorder %v1962_v19, 8.507059e+37 }
 0x365   :  { %v2610_v32 = vsel %vm1070_vm1, %v2483_v52, %v2547_v27  ;;  %v1956_v51 = vmul.f32 %v2952_v1, %v1955_v18 }
 0x366   :  { %2673 = vst [vmem:[%s5283_s7 + $0xd0] sm:$0xff] %v2610_v32  ;;  %v5382_v32 = vld [vmem:[#allocation15_spill] sm:$0xff] }
 0x367   :  { %v1957_v59 = vadd.f32 %v2952_v1, %v1956_v51  ;;  %v2548_v57 = vsel %vm2520_vm4, %v5382_v32, 0.0  ;;  %v1978_v51 = vand.u32 2147483648, %v1506_v13 }
 0x368   :  { %v1056_v29 = vpop.f32.mrf.mxu3  ;;  %v2954_v28 = vpop.eup %2953 }
 0x369   :  { %v4777_v40 = vadd.f32 %v4497_v35, %v1056_v29  ;;  %v1508_v56 = vpop.xlane.xlu2 %1507  ;;  %v1225_v52 = vpop.xlane.xlu0 %1224  ;;  %v1961_v45 = vsel %vm1960_vm15, %v2952_v1, %v1957_v59  ;;  %v1968_v18 = vmul.f32 %v2954_v28, %v1506_v13  ;;  %vm1973_vm2 = vweird.f32 %v2954_v28 }
 0x36a   :  { %v1966_v27 = vsel %vm1963_vm0, %v1965_v62, %v1961_v45  ;;  %2955 = vrcp.f32 %v1508_v56  ;;  %v1976_v29 = vand.u32 2147483647, %v1506_v13  ;;  %vm1974_vm5 = vmor %vm1972_vm3, %vm1973_vm2  ;;  %v5383_v13 = vld [vmem:[#allocation16_spill] sm:$0xff]  ;;  %vm1986_vm8 = vweird.f32 %v1508_v56 }
 0x36b   :  { %5381 = vst [vmem:[#allocation11_spill] sm:$0xff] %v4777_v40  ;;  %v2484_v15 = vmul.f32 %v4362_v20, %v1966_v27  ;;  %v1969_v49 = vsub.f32 1.0, %v1968_v18  ;;  %v4786_v11 = vsel %vm1070_vm1, %v4777_v40, -1e+30  ;;  %v1302_v20 = vsub.f32 %v4340_v41, %v4713_v9 }
 0x36c   :  { %1252 = vmax.xlane.f32.xlu2 %v4786_v11  ;;  %v1979_v18 = vor.u32 1.1754944e-38, %v1978_v51  ;;  %vm1977_vm6 = vcmp.eq.f32.partialorder %v1976_v29, 8.507059e+37  ;;  %v2549_v51 = vsel %vm2520_vm4, %v5383_v13, 0.0  ;;  %v1992_v40 = vand.u32 2147483648, %v1508_v56 }
 0x36d   :  { %v2611_v1 = vsel %vm1070_vm1, %v2484_v15, %v2548_v57  ;;  %v1970_v19 = vmul.f32 %v2954_v28, %v1969_v49  ;;  %v1407_v41 = vmul.f32 1.442695, %v1302_v20 }
 0x36e   :  { %2674 = vst [vmem:[%s5283_s7 + $0xd8] sm:$0xff] %v2611_v1 }
 0x36f   :  { %v1971_v62 = vadd.f32 %v2954_v28, %v1970_v19 }
 0x370   :  { %v1059_v59 = vpop.f32.mrf.mxu3  ;;  %v2956_v45 = vpop.eup %2955 }
 0x371   :  { %v4797_v15 = vadd.f32 %v4497_v35, %v1059_v59  ;;  %v1227_v49 = vpop.xlane.xlu1 %1226  ;;  %v4799_v27 = vpop.xlane.xlu0 %1509  ;;  %v1975_v32 = vsel %vm1974_vm5, %v2954_v28, %v1971_v62  ;;  %v1982_v57 = vmul.f32 %v2956_v45, %v1508_v56  ;;  %v1303_v59 = vsub.f32 %v4370_v21, %v4736_v22 }
 0x372   :  { %v1980_v9 = vsel %vm1977_vm6, %v1979_v18, %v1975_v32  ;;  %2957 = vrcp.f32 %v4799_v27  ;;  %vm1987_vm7 = vweird.f32 %v2956_v45  ;;  %v1305_v21 = vsub.f32 %v4430_v48, %v1225_v52 }
 0x373   :  { %v2485_v1 = vmul.f32 %v4382_v25, %v1980_v9  ;;  %v1983_v19 = vsub.f32 1.0, %v1982_v57  ;;  %v4811_v28 = vsel %vm1070_vm1, %v4797_v15, -1e+30  ;;  %v1990_v25 = vand.u32 2147483647, %v1508_v56  ;;  %vm1988_vm9 = vmor %vm1986_vm8, %vm1987_vm7 }
 0x374   :  { %1254 = vmax.xlane.f32.xlu0 %v4811_v28  ;;  %2959 = vpow2.f32 %v1407_v41  ;;  %v1409_v57 = vmul.f32 1.442695, %v1303_v59  ;;  %v1993_v9 = vor.u32 1.1754944e-38, %v1992_v40  ;;  %v1304_v48 = vsub.f32 %v4400_v37, %v4759_v47 }
 0x375   :  { %v2612_v29 = vsel %vm1070_vm1, %v2485_v1, %v2549_v51  ;;  %v1984_v20 = vmul.f32 %v2956_v45, %v1983_v19  ;;  %vm1991_vm10 = vcmp.eq.f32.partialorder %v1990_v25, 8.507059e+37  ;;  %v1413_v51 = vmul.f32 1.442695, %v1305_v21 }
 0x376   :  { %2675 = vst [vmem:[%s5283_s7 + $0xe0] sm:$0xff] %v2612_v29  ;;  %v2006_v25 = vand.u32 2147483648, %v4799_v27  ;;  %v2004_v47 = vand.u32 2147483647, %v4799_v27  ;;  %vm2000_vm12 = vweird.f32 %v4799_v27 }
 0x377   :  { %v1985_v62 = vadd.f32 %v2956_v45, %v1984_v20  ;;  %v1306_v20 = vsub.f32 %v4457_v0, %v1227_v49  ;;  %v1411_v49 = vmul.f32 1.442695, %v1304_v48 }
 0x378   :  { %v1062_v22 = vpop.f32.mrf.mxu3  ;;  %v2958_v32 = vpop.eup %2957  ;;  %vm2005_vm14 = vcmp.eq.f32.partialorder %v2004_v47, 8.507059e+37 }
 0x379   :  { %v4821_v18 = vadd.f32 %v4497_v35, %v1062_v22  ;;  %v4823_v1 = vpop.xlane.xlu1 %1511  ;;  %v1989_v19 = vsel %vm1988_vm9, %v2956_v45, %v1985_v62  ;;  %v1996_v41 = vmul.f32 %v2958_v32, %v4799_v27  ;;  %v5384_v45 = vld [vmem:[#allocation17_spill] sm:$0xff]  ;;  %vm2001_vm11 = vweird.f32 %v2958_v32 }
 0x37a   :  { %v1994_v13 = vsel %vm1991_vm10, %v1993_v9, %v1989_v19  ;;  %2961 = vrcp.f32 %v4823_v1  ;;  %v4835_v59 = vpop.eup %2959  ;;  %v2550_v29 = vsel %vm2520_vm4, %v5384_v45, 0.0  ;;  %v1415_v9 = vmul.f32 1.442695, %v1306_v20  ;;  %vm2002_vm13 = vmor %vm2000_vm12, %vm2001_vm11  ;;  %v5385_v45 = vld [vmem:[#allocation18_spill] sm:$0xff] }
 0x37b   :  { %v2486_v56 = vmul.f32 %v4411_v63, %v1994_v13  ;;  %v1997_v52 = vsub.f32 1.0, %v1996_v41  ;;  %v4833_v40 = vsel %vm1070_vm1, %v4821_v18, -1e+30  ;;  %2963 = vpow2.f32 %v1409_v57 }
 0x37c   :  { %1256 = vmax.xlane.f32.xlu1 %v4833_v40  ;;  %1533 = vadd.xlane.f32.xlu0 %v4835_v59  ;;  %2965 = vpow2.f32 %v1413_v51  ;;  %v2007_v19 = vor.u32 1.1754944e-38, %v2006_v25  ;;  %v2020_v20 = vand.u32 2147483648, %v4823_v1  ;;  %vm2014_vm0 = vweird.f32 %v4823_v1 }
 0x37d   :  { %v2613_v37 = vsel %vm1070_vm1, %v2486_v56, %v2550_v29  ;;  %v1998_v63 = vmul.f32 %v2958_v32, %v1997_v52  ;;  %2967 = vpow2.f32 %v1411_v49  ;;  %v2551_v29 = vsel %vm2520_vm4, %v5385_v45, 0.0 }
 0x37e   :  { %2676 = vst [vmem:[%s5283_s7 + $0xe8] sm:$0xff] %v2613_v37  ;;  %2969 = vpow2.f32 %v1415_v9 }
 0x37f   :  { %v1229_v21 = vpop.xlane.xlu2 %1228  ;;  %v1999_v22 = vadd.f32 %v2958_v32, %v1998_v63 }
 0x380   :  { %v1065_v0 = vpop.f32.mrf.mxu3  ;;  %v2962_v57 = vpop.eup %2961  ;;  %v1307_v52 = vsub.f32 %v4485_v38, %v1229_v21  ;;  %v2018_v38 = vand.u32 2147483647, %v4823_v1 }
 0x381   :  { %v4852_v62 = vadd.f32 %v4497_v35, %v1065_v0  ;;  %v2003_v41 = vsel %vm2002_vm13, %v2958_v32, %v1999_v22  ;;  %v2010_v13 = vmul.f32 %v2962_v57, %v4823_v1  ;;  %v4855_v56 = vpop.eup %2963  ;;  %vm2015_vm15 = vweird.f32 %v2962_v57  ;;  %v5386_v1 = vld [vmem:[#allocation19_spill] sm:$0xff] }
 0x382   :  { %v2008_v51 = vsel %vm2005_vm14, %v2007_v19, %v2003_v41  ;;  %v4865_v32 = vpop.eup %2965  ;;  %v1417_v47 = vmul.f32 1.442695, %v1307_v52  ;;  %vm2016_vm2 = vmor %vm2014_vm0, %vm2015_vm15  ;;  %v2021_v0 = vor.u32 1.1754944e-38, %v2020_v20  ;;  %vm2019_vm3 = vcmp.eq.f32.partialorder %v2018_v38, 8.507059e+37 }
 0x383   :  { %v4860_v48 = vsel %vm1070_vm1, %v4852_v62, -1e+30  ;;  %v2487_v35 = vmul.f32 %v4449_v53, %v2008_v51  ;;  %v2011_v27 = vsub.f32 1.0, %v2010_v13  ;;  %v4881_v22 = vpop.eup %2967 }
 0x384   :  { %1258 = vmax.xlane.f32.xlu2 %v4860_v48  ;;  %1535 = vadd.xlane.f32.xlu1 %v4855_v56  ;;  %v4883_v19 = vpop.eup %2969 }
 0x385   :  { %v2614_v25 = vsel %vm1070_vm1, %v2487_v35, %v2551_v29  ;;  %v2012_v53 = vmul.f32 %v2962_v57, %v2011_v27  ;;  %1539 = vadd.xlane.f32.xlu0 %v4865_v32  ;;  %v2552_v35 = vsel %vm2520_vm4, %v5386_v1, 0.0 }
 0x386   :  { %2677 = vst [vmem:[%s5283_s7 + $0xf0] sm:$0xff] %v2614_v25 }
 0x387   :  { %v1514_v37 = vpop.xlane.xlu2 %1513  ;;  %v2013_v63 = vadd.f32 %v2962_v57, %v2012_v53  ;;  %v1231_v21 = vpop.xlane.xlu0 %1230 }
 0x388   :  { %2971 = vrcp.f32 %v1514_v37  ;;  %v1308_v49 = vsub.f32 %v4514_v6, %v1231_v21  ;;  %v2034_v25 = vand.u32 2147483648, %v1514_v37  ;;  %vm2028_vm6 = vweird.f32 %v1514_v37 }
 0x389   :  { %v2017_v9 = vsel %vm2016_vm2, %v2962_v57, %v2013_v63  ;;  %2973 = vpow2.f32 %v1417_v47  ;;  %v2032_v63 = vand.u32 2147483647, %v1514_v37 }
 0x38a   :  { %v2022_v41 = vsel %vm2019_vm3, %v2021_v0, %v2017_v9  ;;  %v1419_v13 = vmul.f32 1.442695, %v1308_v49  ;;  %v2035_v0 = vor.u32 1.1754944e-38, %v2034_v25 }
 0x38b   :  { %v2488_v51 = vmul.f32 %v4463_v3, %v2022_v41  ;;  %vm2033_vm8 = vcmp.eq.f32.partialorder %v2032_v63, 8.507059e+37 }
 0x38c   :  { %1537 = vadd.xlane.f32.xlu2 %v4881_v22  ;;  %2975 = vpow2.f32 %v1419_v13  ;;  %1541 = vadd.xlane.f32.xlu1 %v4883_v19 }
 0x38d   :  { %v2615_v57 = vsel %vm1070_vm1, %v2488_v51, %v2552_v35  ;;  %v5387_v35 = vld [vmem:[#allocation21_spill] sm:$0xff] }
 0x38e   :  { %v2972_v6 = vpop.eup %2971  ;;  %2678 = vst [vmem:[%s5283_s7 + $0xf8] sm:$0xff] %v2615_v57  ;;  %v2553_v57 = vsel %vm2520_vm4, %v5387_v35, 0.0 }
 0x38f   :  { %v2024_v27 = vmul.f32 %v2972_v6, %v1514_v37  ;;  %v1233_v3 = vpop.xlane.xlu1 %1232  ;;  %v1516_v52 = vpop.xlane.xlu0 %1515  ;;  %vm2029_vm5 = vweird.f32 %v2972_v6 }
 0x390   :  { %v1309_v29 = vsub.f32 %v4535_v60, %v1233_v3  ;;  %2977 = vrcp.f32 %v1516_v52  ;;  %v4897_v20 = vpop.eup %2973  ;;  %vm2030_vm7 = vmor %vm2028_vm6, %vm2029_vm5  ;;  %vm2042_vm10 = vweird.f32 %v1516_v52 }
 0x391   :  { %v2025_v45 = vsub.f32 1.0, %v2024_v27 }
 0x392   :  { %v4899_v53 = vpop.eup %2975  ;;  %v1421_v47 = vmul.f32 1.442695, %v1309_v29  ;;  %v2046_v29 = vand.u32 2147483647, %v1516_v52 }
 0x393   :  { %v2026_v38 = vmul.f32 %v2972_v6, %v2025_v45  ;;  %1545 = vadd.xlane.f32.xlu0 %v4899_v53  ;;  %v2048_v45 = vand.u32 2147483648, %v1516_v52 }
 0x394   :  { %1543 = vadd.xlane.f32.xlu2 %v4897_v20  ;;  %2979 = vpow2.f32 %v1421_v47  ;;  %vm2047_vm12 = vcmp.eq.f32.partialorder %v2046_v29, 8.507059e+37 }
 0x395   :  { %v2027_v21 = vadd.f32 %v2972_v6, %v2026_v38  ;;  %v2049_v63 = vor.u32 1.1754944e-38, %v2048_v45 }
 0x396   :  { %v2978_v60 = vpop.eup %2977 }
 0x397   :  { %v2031_v49 = vsel %vm2030_vm7, %v2972_v6, %v2027_v21  ;;  %v2038_v41 = vmul.f32 %v2978_v60, %v1516_v52  ;;  %v1518_v13 = vpop.xlane.xlu1 %1517  ;;  %v1235_v1 = vpop.xlane.xlu2 %1234  ;;  %vm2043_vm9 = vweird.f32 %v2978_v60 }
 0x398   :  { %v2036_v9 = vsel %vm2033_vm8, %v2035_v0, %v2031_v49  ;;  %2981 = vrcp.f32 %v1518_v13  ;;  %v1310_v37 = vsub.f32 %v4558_v17, %v1235_v1  ;;  %vm2044_vm11 = vmor %vm2042_vm10, %vm2043_vm9  ;;  %v2554_v1 = vsel %vm2520_vm4, %v4054_v4, 0.0 }
 0x399   :  { %v2489_v51 = vmul.f32 %v4503_v36, %v2036_v9  ;;  %v2039_v27 = vsub.f32 1.0, %v2038_v41  ;;  %v2062_v35 = vand.u32 2147483648, %v1518_v13  ;;  %vm2056_vm14 = vweird.f32 %v1518_v13 }
 0x39a   :  { %v4908_v3 = vpop.eup %2979  ;;  %v1423_v25 = vmul.f32 1.442695, %v1310_v37  ;;  %v2060_v37 = vand.u32 2147483647, %v1518_v13 }
 0x39b   :  { %v2616_v6 = vsel %vm1070_vm1, %v2489_v51, %v2553_v57  ;;  %v2040_v36 = vmul.f32 %v2978_v60, %v2039_v27  ;;  %1547 = vadd.xlane.f32.xlu1 %v4908_v3  ;;  %v2063_v4 = vor.u32 1.1754944e-38, %v2062_v35 }
 0x39c   :  { %2679 = vst [vmem:[%s5283_s7 + $0x100] sm:$0xff] %v2616_v6  ;;  %2983 = vpow2.f32 %v1423_v25  ;;  %vm2061_vm0 = vcmp.eq.f32.partialorder %v2060_v37, 8.507059e+37 }
 0x39d   :  { %v2041_v38 = vadd.f32 %v2978_v60, %v2040_v36 }
 0x39e   :  { %v2982_v17 = vpop.eup %2981 }
 0x39f   :  { %v2045_v47 = vsel %vm2044_vm11, %v2978_v60, %v2041_v38  ;;  %v2052_v21 = vmul.f32 %v2982_v17, %v1518_v13  ;;  %v1520_v49 = vpop.xlane.xlu2 %1519  ;;  %v1237_v9 = vpop.xlane.xlu0 %1236  ;;  %vm2057_vm13 = vweird.f32 %v2982_v17 }
 0x3a0   :  { %v2050_v0 = vsel %vm2047_vm12, %v2049_v63, %v2045_v47  ;;  %2985 = vrcp.f32 %v1520_v49  ;;  %v1311_v52 = vsub.f32 %v4585_v46, %v1237_v9  ;;  %vm2058_vm15 = vmor %vm2056_vm14, %vm2057_vm13  ;;  %vm2070_vm3 = vweird.f32 %v1520_v49 }
 0x3a1   :  { %v2490_v41 = vmul.f32 %v4528_v23, %v2050_v0  ;;  %v2053_v51 = vsub.f32 1.0, %v2052_v21  ;;  %v5388_v21 = vld [vmem:[#allocation24_spill] sm:$0xff] }
 0x3a2   :  { %v4921_v57 = vpop.eup %2983  ;;  %v1425_v23 = vmul.f32 1.442695, %v1311_v52  ;;  %v2555_v0 = vsel %vm2520_vm4, %v5388_v21, 0.0 }
 0x3a3   :  { %v2617_v60 = vsel %vm1070_vm1, %v2490_v41, %v2554_v1  ;;  %v2054_v27 = vmul.f32 %v2982_v17, %v2053_v51  ;;  %1549 = vadd.xlane.f32.xlu2 %v4921_v57  ;;  %v2076_v41 = vand.u32 2147483648, %v1520_v49 }
 0x3a4   :  { %2680 = vst [vmem:[%s5283_s7 + $0x108] sm:$0xff] %v2617_v60  ;;  %2987 = vpow2.f32 %v1425_v23 }
 0x3a5   :  { %v2055_v6 = vadd.f32 %v2982_v17, %v2054_v27  ;;  %v2077_v52 = vor.u32 1.1754944e-38, %v2076_v41 }
 0x3a6   :  { %v2986_v46 = vpop.eup %2985 }
 0x3a7   :  { %v2059_v45 = vsel %vm2058_vm15, %v2982_v17, %v2055_v6  ;;  %v2066_v29 = vmul.f32 %v2986_v46, %v1520_v49  ;;  %v1239_v25 = vpop.xlane.xlu1 %1238  ;;  %v1522_v38 = vpop.xlane.xlu0 %1521  ;;  %vm2071_vm2 = vweird.f32 %v2986_v46 }
 0x3a8   :  { %v2064_v36 = vsel %vm2061_vm0, %v2063_v4, %v2059_v45  ;;  %v1312_v47 = vsub.f32 %v4614_v61, %v1239_v25  ;;  %2989 = vrcp.f32 %v1522_v38  ;;  %v2074_v61 = vand.u32 2147483647, %v1520_v49  ;;  %vm2072_vm5 = vmor %vm2070_vm3, %vm2071_vm2 }
 0x3a9   :  { %v2491_v63 = vmul.f32 %v4549_v50, %v2064_v36  ;;  %v2067_v13 = vsub.f32 1.0, %v2066_v29  ;;  %v2556_v49 = vsel %vm2520_vm4, %v4114_v10, 0.0  ;;  %v2090_v25 = vand.u32 2147483648, %v1522_v38 }
 0x3aa   :  { %v1427_v17 = vmul.f32 1.442695, %v1312_v47  ;;  %v4936_v51 = vpop.eup %2987  ;;  %vm2075_vm6 = vcmp.eq.f32.partialorder %v2074_v61, 8.507059e+37  ;;  %v2088_v21 = vand.u32 2147483647, %v1522_v38  ;;  %vm2084_vm8 = vweird.f32 %v1522_v38 }
 0x3ab   :  { %v2618_v9 = vsel %vm1070_vm1, %v2491_v63, %v2555_v0  ;;  %v2068_v50 = vmul.f32 %v2986_v46, %v2067_v13  ;;  %1551 = vadd.xlane.f32.xlu0 %v4936_v51  ;;  %v2091_v10 = vor.u32 1.1754944e-38, %v2090_v25 }
 0x3ac   :  { %2681 = vst [vmem:[%s5283_s7 + $0x110] sm:$0xff] %v2618_v9  ;;  %2991 = vpow2.f32 %v1427_v17  ;;  %vm2089_vm10 = vcmp.eq.f32.partialorder %v2088_v21, 8.507059e+37 }
 0x3ad   :  { %v2069_v1 = vadd.f32 %v2986_v46, %v2068_v50 }
 0x3ae   :  { %v2990_v35 = vpop.eup %2989 }
 0x3af   :  { %v2073_v60 = vsel %vm2072_vm5, %v2986_v46, %v2069_v1  ;;  %v2080_v27 = vmul.f32 %v2990_v35, %v1522_v38  ;;  %v1241_v37 = vpop.xlane.xlu2 %1240  ;;  %v1524_v23 = vpop.xlane.xlu1 %1523  ;;  %vm2085_vm7 = vweird.f32 %v2990_v35  ;;  %v2557_v38 = vsel %vm2520_vm4, %v4144_v33, 0.0 }
 0x3b0   :  { %v2078_v6 = vsel %vm2075_vm6, %v2077_v52, %v2073_v60  ;;  %v1313_v4 = vsub.f32 %v4643_v7, %v1241_v37  ;;  %2993 = vrcp.f32 %v1524_v23  ;;  %vm2086_vm9 = vmor %vm2084_vm8, %vm2085_vm7  ;;  %v2102_v60 = vand.u32 2147483647, %v1524_v23 }
 0x3b1   :  { %v2492_v45 = vmul.f32 %v4576_v16, %v2078_v6  ;;  %v2081_v36 = vsub.f32 1.0, %v2080_v27  ;;  %v2104_v27 = vand.u32 2147483648, %v1524_v23  ;;  %vm2098_vm12 = vweird.f32 %v1524_v23 }
 0x3b2   :  { %v4944_v29 = vpop.eup %2991  ;;  %v1429_v63 = vmul.f32 1.442695, %v1313_v4  ;;  %vm2103_vm14 = vcmp.eq.f32.partialorder %v2102_v60, 8.507059e+37 }
 0x3b3   :  { %v2619_v46 = vsel %vm1070_vm1, %v2492_v45, %v2556_v49  ;;  %v2082_v47 = vmul.f32 %v2990_v35, %v2081_v36  ;;  %1553 = vadd.xlane.f32.xlu1 %v4944_v29  ;;  %v2105_v33 = vor.u32 1.1754944e-38, %v2104_v27 }
 0x3b4   :  { %2682 = vst [vmem:[%s5283_s7 + $0x118] sm:$0xff] %v2619_v46  ;;  %2995 = vpow2.f32 %v1429_v63 }
 0x3b5   :  { %v2083_v16 = vadd.f32 %v2990_v35, %v2082_v47 }
 0x3b6   :  { %v2994_v7 = vpop.eup %2993 }
 0x3b7   :  { %v2087_v0 = vsel %vm2086_vm9, %v2990_v35, %v2083_v16  ;;  %v2094_v13 = vmul.f32 %v2994_v7, %v1524_v23  ;;  %v1526_v9 = vpop.xlane.xlu2 %1525  ;;  %v1243_v41 = vpop.xlane.xlu0 %1242  ;;  %vm2099_vm11 = vweird.f32 %v2994_v7  ;;  %v2558_v23 = vsel %vm2520_vm4, %v4172_v43, 0.0 }
 0x3b8   :  { %v2092_v17 = vsel %vm2089_vm10, %v2091_v10, %v2087_v0  ;;  %2997 = vrcp.f32 %v1526_v9  ;;  %v1314_v1 = vsub.f32 %v4672_v2, %v1243_v41  ;;  %vm2100_vm13 = vmor %vm2098_vm12, %vm2099_vm11  ;;  %v2118_v21 = vand.u32 2147483648, %v1526_v9 }
 0x3b9   :  { %v2493_v50 = vmul.f32 %v4605_v8, %v2092_v17  ;;  %v2095_v61 = vsub.f32 1.0, %v2094_v13  ;;  %v2116_v13 = vand.u32 2147483647, %v1526_v9  ;;  %vm2112_vm0 = vweird.f32 %v1526_v9 }
 0x3ba   :  { %v4957_v52 = vpop.eup %2995  ;;  %v1431_v6 = vmul.f32 1.442695, %v1314_v1 }
 0x3bb   :  { %v2620_v35 = vsel %vm1070_vm1, %v2493_v50, %v2557_v38  ;;  %v2096_v37 = vmul.f32 %v2994_v7, %v2095_v61  ;;  %1555 = vadd.xlane.f32.xlu2 %v4957_v52  ;;  %vm2117_vm3 = vcmp.eq.f32.partialorder %v2116_v13, 8.507059e+37 }
 0x3bc   :  { %2683 = vst [vmem:[%s5283_s7 + $0x120] sm:$0xff] %v2620_v35  ;;  %2999 = vpow2.f32 %v1431_v6 }
 0x3bd   :  { %v2097_v8 = vadd.f32 %v2994_v7, %v2096_v37 }
 0x3be   :  { %v2998_v2 = vpop.eup %2997 }
 0x3bf   :  { %v2101_v4 = vsel %vm2100_vm13, %v2994_v7, %v2097_v8  ;;  %v2108_v45 = vmul.f32 %v2998_v2, %v1526_v9  ;;  %v1245_v36 = vpop.xlane.xlu1 %1244  ;;  %v1528_v49 = vpop.xlane.xlu0 %1527  ;;  %vm2113_vm15 = vweird.f32 %v2998_v2  ;;  %v2559_v9 = vsel %vm2520_vm4, %v4204_v30, 0.0 }
 0x3c0   :  { %v2106_v25 = vsel %vm2103_vm14, %v2105_v33, %v2101_v4  ;;  %v1315_v63 = vsub.f32 %v4698_v58, %v1245_v36  ;;  %3001 = vrcp.f32 %v1528_v49  ;;  %vm2114_vm2 = vmor %vm2112_vm0, %vm2113_vm15  ;;  %v2119_v58 = vor.u32 1.1754944e-38, %v2118_v21 }
 0x3c1   :  { %v2494_v46 = vmul.f32 %v4634_v34, %v2106_v25  ;;  %v2109_v47 = vsub.f32 1.0, %v2108_v45  ;;  %v2132_v37 = vand.u32 2147483648, %v1528_v49  ;;  %v2130_v33 = vand.u32 2147483647, %v1528_v49 }
 0x3c2   :  { %v1433_v16 = vmul.f32 1.442695, %v1315_v63  ;;  %v4973_v10 = vpop.eup %2999  ;;  %vm2126_vm6 = vweird.f32 %v1528_v49 }
 0x3c3   :  { %v2621_v7 = vsel %vm1070_vm1, %v2494_v46, %v2558_v23  ;;  %v2110_v0 = vmul.f32 %v2998_v2, %v2109_v47  ;;  %1557 = vadd.xlane.f32.xlu0 %v4973_v10  ;;  %v2133_v30 = vor.u32 1.1754944e-38, %v2132_v37  ;;  %vm2131_vm8 = vcmp.eq.f32.partialorder %v2130_v33, 8.507059e+37 }
 0x3c4   :  { %2684 = vst [vmem:[%s5283_s7 + $0x128] sm:$0xff] %v2621_v7  ;;  %3003 = vpow2.f32 %v1433_v16 }
 0x3c5   :  { %v2111_v34 = vadd.f32 %v2998_v2, %v2110_v0 }
 0x3c6   :  { %v3002_v43 = vpop.eup %3001 }
 0x3c7   :  { %v2115_v41 = vsel %vm2114_vm2, %v2998_v2, %v2111_v34  ;;  %v2122_v17 = vmul.f32 %v3002_v43, %v1528_v49  ;;  %v1247_v50 = vpop.xlane.xlu2 %1246  ;;  %v1530_v61 = vpop.xlane.xlu1 %1529  ;;  %vm2127_vm5 = vweird.f32 %v3002_v43  ;;  %v2560_v49 = vsel %vm2520_vm4, %v4234_v54, 0.0 }
 0x3c8   :  { %v2120_v1 = vsel %vm2117_vm3, %v2119_v58, %v2115_v41  ;;  %v1316_v38 = vsub.f32 %v4724_v12, %v1247_v50  ;;  %3005 = vrcp.f32 %v1530_v61  ;;  %vm2128_vm7 = vmor %vm2126_vm6, %vm2127_vm5  ;;  %v2144_v16 = vand.u32 2147483647, %v1530_v61 }
 0x3c9   :  { %v2495_v60 = vmul.f32 %v4663_v14, %v2120_v1  ;;  %v2123_v27 = vsub.f32 1.0, %v2122_v17  ;;  %v2146_v7 = vand.u32 2147483648, %v1530_v61  ;;  %vm2140_vm10 = vweird.f32 %v1530_v61 }
 0x3ca   :  { %v4983_v35 = vpop.eup %3003  ;;  %v1435_v6 = vmul.f32 1.442695, %v1316_v38  ;;  %vm2145_vm12 = vcmp.eq.f32.partialorder %v2144_v16, 8.507059e+37 }
 0x3cb   :  { %v2622_v8 = vsel %vm1070_vm1, %v2495_v60, %v2559_v9  ;;  %v2124_v2 = vmul.f32 %v3002_v43, %v2123_v27  ;;  %1559 = vadd.xlane.f32.xlu1 %v4983_v35  ;;  %v2147_v54 = vor.u32 1.1754944e-38, %v2146_v7  ;;  %v2561_v60 = vsel %vm2520_vm4, %v4262_v5, 0.0 }
 0x3cc   :  { %2685 = vst [vmem:[%s5283_s7 + $0x130] sm:$0xff] %v2622_v8  ;;  %3007 = vpow2.f32 %v1435_v6 }
 0x3cd   :  { %v2125_v12 = vadd.f32 %v3002_v43, %v2124_v2 }
 0x3ce   :  { %v3006_v14 = vpop.eup %3005 }
 0x3cf   :  { %v2129_v4 = vsel %vm2128_vm7, %v3002_v43, %v2125_v12  ;;  %v2136_v45 = vmul.f32 %v3006_v14, %v1530_v61  ;;  %v1532_v36 = vpop.xlane.xlu2 %1531  ;;  %v1249_v25 = vpop.xlane.xlu0 %1248  ;;  %vm2141_vm9 = vweird.f32 %v3006_v14 }
 0x3d0   :  { %v2134_v63 = vsel %vm2131_vm8, %v2133_v30, %v2129_v4  ;;  %3009 = vrcp.f32 %v1532_v36  ;;  %v1317_v23 = vsub.f32 %v4747_v42, %v1249_v25  ;;  %vm2142_vm11 = vmor %vm2140_vm10, %vm2141_vm9  ;;  %v2160_v27 = vand.u32 2147483648, %v1532_v36 }
 0x3d1   :  { %v2496_v46 = vmul.f32 %v4689_v31, %v2134_v63  ;;  %v2137_v47 = vsub.f32 1.0, %v2136_v45  ;;  %v2158_v8 = vand.u32 2147483647, %v1532_v36  ;;  %vm2154_vm14 = vweird.f32 %v1532_v36 }
 0x3d2   :  { %v4996_v21 = vpop.eup %3007  ;;  %v1437_v34 = vmul.f32 1.442695, %v1317_v23  ;;  %v2161_v5 = vor.u32 1.1754944e-38, %v2160_v27  ;;  %v2562_v4 = vsel %vm2520_vm4, %v4294_v55, 0.0  ;;  %v5389_v27 = vld [vmem:[#allocation25_spill] sm:$0xff] }
 0x3d3   :  { %v2623_v0 = vsel %vm1070_vm1, %v2496_v46, %v2560_v49  ;;  %v2138_v13 = vmul.f32 %v3006_v14, %v2137_v47  ;;  %1561 = vadd.xlane.f32.xlu2 %v4996_v21  ;;  %vm2159_vm0 = vcmp.eq.f32.partialorder %v2158_v8, 8.507059e+37 }
 0x3d4   :  { %2686 = vst [vmem:[%s5283_s7 + $0x138] sm:$0xff] %v2623_v0  ;;  %3011 = vpow2.f32 %v1437_v34 }
 0x3d5   :  { %v2139_v31 = vadd.f32 %v3006_v14, %v2138_v13 }
 0x3d6   :  { %v3010_v42 = vpop.eup %3009 }
 0x3d7   :  { %v2143_v43 = vsel %vm2142_vm11, %v3006_v14, %v2139_v31  ;;  %v2150_v58 = vmul.f32 %v3010_v42, %v1532_v36  ;;  %v1251_v41 = vpop.xlane.xlu1 %1250  ;;  %vm2155_vm13 = vweird.f32 %v3010_v42 }
 0x3d8   :  { %v2148_v17 = vsel %vm2145_vm12, %v2147_v54, %v2143_v43  ;;  %v1318_v50 = vsub.f32 %v4768_v39, %v1251_v41  ;;  %vm2156_vm15 = vmor %vm2154_vm14, %vm2155_vm13 }
 0x3d9   :  { %v2497_v1 = vmul.f32 %v4716_v24, %v2148_v17  ;;  %v2151_v38 = vsub.f32 1.0, %v2150_v58 }
 0x3da   :  { %v1439_v61 = vmul.f32 1.442695, %v1318_v50  ;;  %v5012_v9 = vpop.eup %3011 }
 0x3db   :  { %v2624_v37 = vsel %vm1070_vm1, %v2497_v1, %v2561_v60  ;;  %v2152_v6 = vmul.f32 %v3010_v42, %v2151_v38  ;;  %1563 = vadd.xlane.f32.xlu0 %v5012_v9 }
 0x3dc   :  { %2687 = vst [vmem:[%s5283_s7 + $0x140] sm:$0xff] %v2624_v37  ;;  %3013 = vpow2.f32 %v1439_v61  ;;  %v2563_v61 = vsel %vm2520_vm4, %v5389_v27, 0.0 }
 0x3dd   :  { %v2153_v24 = vadd.f32 %v3010_v42, %v2152_v6 }
 0x3df   :  { %v2157_v39 = vsel %vm2156_vm15, %v3010_v42, %v2153_v24  ;;  %v1253_v2 = vpop.xlane.xlu2 %1252 }
 0x3e0   :  { %v2162_v33 = vsel %vm2159_vm0, %v2161_v5, %v2157_v39  ;;  %v1319_v12 = vsub.f32 %v4786_v11, %v1253_v2 }
 0x3e1   :  { %v2498_v14 = vmul.f32 %v4739_v44, %v2162_v33 }
 0x3e2   :  { %v5022_v30 = vpop.eup %3013  ;;  %v1441_v45 = vmul.f32 1.442695, %v1319_v12 }
 0x3e3   :  { %v2625_v36 = vsel %vm1070_vm1, %v2498_v14, %v2562_v4  ;;  %1565 = vadd.xlane.f32.xlu1 %v5022_v30  ;;  %v5390_v4 = vld [vmem:[#allocation26_spill] sm:$0xff] }
 0x3e4   :  { %2688 = vst [vmem:[%s5283_s7 + $0x148] sm:$0xff] %v2625_v36  ;;  %3015 = vpow2.f32 %v1441_v45  ;;  %v2564_v45 = vsel %vm2520_vm4, %v5390_v4, 0.0 }
 0x3e7   :  { %v1255_v11 = vpop.xlane.xlu0 %1254 }
 0x3e8   :  { %v1320_v44 = vsub.f32 %v4811_v28, %v1255_v11 }
 0x3ea   :  { %v5034_v25 = vpop.eup %3015  ;;  %v1443_v63 = vmul.f32 1.442695, %v1320_v44  ;;  %v5391_v44 = vld [vmem:[#allocation28_spill] sm:$0xff] }
 0x3eb   :  { %1567 = vadd.xlane.f32.xlu2 %v5034_v25 }
 0x3ec   :  { %3017 = vpow2.f32 %v1443_v63  ;;  %v2566_v63 = vsel %vm2520_vm4, %v5391_v44, 0.0 }
 0x3ef   :  { %v1257_v55 = vpop.xlane.xlu1 %1256  ;;  %v1534_v47 = vpop.xlane.xlu0 %1533 }
 0x3f0   :  { %v1321_v46 = vsub.f32 %v4833_v40, %v1257_v55  ;;  %3019 = vrcp.f32 %v1534_v47  ;;  %v2174_v54 = vand.u32 2147483648, %v1534_v47  ;;  %v2172_v58 = vand.u32 2147483647, %v1534_v47 }
 0x3f1   :  { %vm2168_vm3 = vweird.f32 %v1534_v47 }
 0x3f2   :  { %v1445_v23 = vmul.f32 1.442695, %v1321_v46  ;;  %v5038_v49 = vpop.eup %3017  ;;  %v2175_v1 = vor.u32 1.1754944e-38, %v2174_v54  ;;  %vm2173_vm6 = vcmp.eq.f32.partialorder %v2172_v58, 8.507059e+37 }
 0x3f3   :  { %1569 = vadd.xlane.f32.xlu0 %v5038_v49 }
 0x3f4   :  { %3021 = vpow2.f32 %v1445_v23 }
 0x3f6   :  { %v3020_v7 = vpop.eup %3019 }
 0x3f7   :  { %v1259_v16 = vpop.xlane.xlu2 %1258  ;;  %v1536_v0 = vpop.xlane.xlu1 %1535  ;;  %v2164_v13 = vmul.f32 %v3020_v7, %v1534_v47  ;;  %vm2169_vm2 = vweird.f32 %v3020_v7 }
 0x3f8   :  { %v1322_v28 = vsub.f32 %v4860_v48, %v1259_v16  ;;  %3023 = vrcp.f32 %v1536_v0  ;;  %v1540_v34 = vpop.xlane.xlu0 %1539  ;;  %vm2170_vm5 = vmor %vm2168_vm3, %vm2169_vm2  ;;  %v2186_v39 = vand.u32 2147483647, %v1536_v0  ;;  %v2188_v33 = vand.u32 2147483648, %v1536_v0 }
 0x3f9   :  { %3025 = vrcp.f32 %v1540_v34  ;;  %v2165_v40 = vsub.f32 1.0, %v2164_v13  ;;  %v2214_v14 = vand.u32 2147483647, %v1540_v34  ;;  %v2216_v11 = vand.u32 2147483648, %v1540_v34 }
 0x3fa   :  { %v1447_v31 = vmul.f32 1.442695, %v1322_v28  ;;  %v5042_v42 = vpop.eup %3021  ;;  %vm2182_vm9 = vweird.f32 %v1536_v0  ;;  %vm2187_vm10 = vcmp.eq.f32.partialorder %v2186_v39, 8.507059e+37  ;;  %vm2210_vm11 = vweird.f32 %v1540_v34 }
 0x3fb   :  { %1571 = vadd.xlane.f32.xlu1 %v5042_v42  ;;  %v2166_v43 = vmul.f32 %v3020_v7, %v2165_v40  ;;  %v2189_v23 = vor.u32 1.1754944e-38, %v2188_v33  ;;  %vm2215_vm13 = vcmp.eq.f32.partialorder %v2214_v14, 8.507059e+37  ;;  %v2217_v40 = vor.u32 1.1754944e-38, %v2216_v11 }
 0x3fc   :  { %3027 = vpow2.f32 %v1447_v31 }
 0x3fd   :  { %v2167_v17 = vadd.f32 %v3020_v7, %v2166_v43 }
 0x3fe   :  { %v3024_v41 = vpop.eup %3023 }
 0x3ff   :  { %v5045_v48 = vpop.xlane.xlu2 %1537  ;;  %v3026_v50 = vpop.eup %3025  ;;  %v2178_v38 = vmul.f32 %v3024_v41, %v1536_v0  ;;  %v2171_v37 = vsel %vm2170_vm5, %v3020_v7, %v2167_v17  ;;  %vm2183_vm7 = vweird.f32 %v3024_v41 }
 0x400   :  { %3029 = vrcp.f32 %v5045_v48  ;;  %v5048_v60 = vpop.xlane.xlu1 %1541  ;;  %v2206_v6 = vmul.f32 %v3026_v50, %v1540_v34  ;;  %v2176_v24 = vsel %vm2173_vm6, %v2175_v1, %v2171_v37  ;;  %vm2211_vm8 = vweird.f32 %v3026_v50  ;;  %vm2184_vm12 = vmor %vm2182_vm9, %vm2183_vm7 }
 0x401   :  { %v2179_v5 = vsub.f32 1.0, %v2178_v38  ;;  %3031 = vrcp.f32 %v5048_v60  ;;  %v2499_v2 = vmul.f32 %v4835_v59, %v2176_v24  ;;  %vm2212_vm14 = vmor %vm2210_vm11, %vm2211_vm8  ;;  %vm2196_vm15 = vweird.f32 %v5045_v48 }
 0x402   :  { %v5053_v8 = vpop.eup %3027  ;;  %v2207_v12 = vsub.f32 1.0, %v2206_v6  ;;  %v2200_v38 = vand.u32 2147483647, %v5045_v48  ;;  %v2228_v6 = vand.u32 2147483647, %v5048_v60  ;;  %v2230_v24 = vand.u32 2147483648, %v5048_v60 }
 0x403   :  { %1573 = vadd.xlane.f32.xlu2 %v5053_v8  ;;  %v2180_v36 = vmul.f32 %v3024_v41, %v2179_v5  ;;  %v2626_v55 = vsel %vm1070_vm1, %v2499_v2, %v2563_v61  ;;  %vm2224_vm6 = vweird.f32 %v5048_v60 }
 0x404   :  { %v2208_v59 = vmul.f32 %v3026_v50, %v2207_v12  ;;  %2689 = vst [vmem:[%s5283_s7 + $0x150] sm:$0xff] %v2626_v55  ;;  %vm2201_vm5 = vcmp.eq.f32.partialorder %v2200_v38, 8.507059e+37  ;;  %v2231_v44 = vor.u32 1.1754944e-38, %v2230_v24  ;;  %vm2229_vm8 = vcmp.eq.f32.partialorder %v2228_v6, 8.507059e+37 }
 0x405   :  { %v2181_v47 = vadd.f32 %v3024_v41, %v2180_v36 }
 0x406   :  { %v3030_v46 = vpop.eup %3029  ;;  %v2209_v16 = vadd.f32 %v3026_v50, %v2208_v59  ;;  %v5070_v28 = vpop.xlane.xlu0 %1545 }
 0x407   :  { %v2192_v7 = vmul.f32 %v3030_v46, %v5045_v48  ;;  %v3032_v13 = vpop.eup %3031  ;;  %v2185_v31 = vsel %vm2184_vm12, %v3024_v41, %v2181_v47  ;;  %3033 = vrcp.f32 %v5070_v28  ;;  %v5076_v58 = vpop.xlane.xlu2 %1543  ;;  %v2202_v41 = vand.u32 2147483648, %v5045_v48 }
 0x408   :  { %v2190_v0 = vsel %vm2187_vm10, %v2189_v23, %v2185_v31  ;;  %v2213_v54 = vsel %vm2212_vm14, %v3026_v50, %v2209_v16  ;;  %v2220_v43 = vmul.f32 %v3032_v13, %v5048_v60  ;;  %vm2197_vm0 = vweird.f32 %v3030_v46 }
 0x409   :  { %v2193_v34 = vsub.f32 1.0, %v2192_v7  ;;  %v2500_v17 = vmul.f32 %v4855_v56, %v2190_v0  ;;  %v2218_v1 = vsel %vm2215_vm13, %v2217_v40, %v2213_v54  ;;  %3035 = vrcp.f32 %v5076_v58  ;;  %vm2198_vm3 = vmor %vm2196_vm15, %vm2197_vm0  ;;  %v5393_v40 = vld [vmem:[#allocation29_spill] sm:$0xff] }
 0x40a   :  { %v2502_v27 = vmul.f32 %v4865_v32, %v2218_v1  ;;  %v2221_v37 = vsub.f32 1.0, %v2220_v43  ;;  %vm2225_vm2 = vweird.f32 %v3032_v13  ;;  %v2203_v2 = vor.u32 1.1754944e-38, %v2202_v41 }
 0x40b   :  { %v2194_v61 = vmul.f32 %v3030_v46, %v2193_v34  ;;  %v2627_v50 = vsel %vm1070_vm1, %v2500_v17, %v2564_v45  ;;  %v5392_v45 = vld [vmem:[#allocation27_spill] sm:$0xff]  ;;  %vm2226_vm7 = vmor %vm2224_vm6, %vm2225_vm2  ;;  %v2258_v47 = vand.u32 2147483648, %v5070_v28  ;;  %vm2252_vm10 = vweird.f32 %v5070_v28 }
 0x40c   :  { %2690 = vst [vmem:[%s5283_s7 + $0x158] sm:$0xff] %v2627_v50  ;;  %v2629_v56 = vsel %vm1070_vm1, %v2502_v27, %v2566_v63  ;;  %v2222_v5 = vmul.f32 %v3032_v13, %v2221_v37  ;;  %v2565_v36 = vsel %vm2520_vm4, %v5392_v45, 0.0  ;;  %v2242_v43 = vand.u32 2147483647, %v5076_v58 }
 0x40d   :  { %v2195_v32 = vadd.f32 %v3030_v46, %v2194_v61  ;;  %v3034_v39 = vpop.eup %3033  ;;  %2692 = vst [vmem:[%s5283_s7 + $0x168] sm:$0xff] %v2629_v56  ;;  %v2244_v17 = vand.u32 2147483648, %v5076_v58  ;;  %vm2238_vm14 = vweird.f32 %v5076_v58 }
 0x40e   :  { %v2223_v12 = vadd.f32 %v3032_v13, %v2222_v5  ;;  %v2248_v14 = vmul.f32 %v3034_v39, %v5070_v28  ;;  %v5099_v4 = vpop.xlane.xlu1 %1547  ;;  %vm2253_vm9 = vweird.f32 %v3034_v39  ;;  %vm2243_vm0 = vcmp.eq.f32.partialorder %v2242_v43, 8.507059e+37 }
 0x40f   :  { %v2199_v33 = vsel %vm2198_vm3, %v3030_v46, %v2195_v32  ;;  %3037 = vrcp.f32 %v5099_v4  ;;  %v3036_v59 = vpop.eup %3035  ;;  %v2256_v46 = vand.u32 2147483647, %v5070_v28  ;;  %vm2254_vm11 = vmor %vm2252_vm10, %vm2253_vm9  ;;  %v5394_v28 = vld [vmem:[#allocation23_spill] sm:$0xff]  ;;  %v2245_v56 = vor.u32 1.1754944e-38, %v2244_v17 }
 0x410   :  { %v2204_v11 = vsel %vm2201_vm5, %v2203_v2, %v2199_v33  ;;  %v2227_v63 = vsel %vm2226_vm7, %v3032_v13, %v2223_v12  ;;  %v2249_v55 = vsub.f32 1.0, %v2248_v14  ;;  %v2234_v31 = vmul.f32 %v3036_v59, %v5076_v58  ;;  %v5395_v14 = vld [vmem:[#allocation2_spill] sm:$0xff] }
 0x411   :  { %v2501_v48 = vmul.f32 %v4881_v22, %v2204_v11  ;;  %v2232_v60 = vsel %vm2229_vm8, %v2231_v44, %v2227_v63  ;;  %v2567_v22 = vsel %vm2520_vm4, %v5393_v40, 0.0  ;;  %vm2257_vm12 = vcmp.eq.f32.partialorder %v2256_v46, 8.507059e+37 }
 0x412   :  { %v2503_v16 = vmul.f32 %v4883_v19, %v2232_v60  ;;  %v2250_v7 = vmul.f32 %v3034_v39, %v2249_v55  ;;  %v2235_v54 = vsub.f32 1.0, %v2234_v31  ;;  %v2259_v19 = vor.u32 1.1754944e-38, %v2258_v47 }
 0x413   :  { %v2628_v23 = vsel %vm1070_vm1, %v2501_v48, %v2565_v36  ;;  %vm2239_vm13 = vweird.f32 %v3036_v59  ;;  %v2569_v27 = vsel %vm2520_vm4, %v5394_v28, 0.0  ;;  %v2270_v32 = vand.u32 2147483647, %v5099_v4 }
 0x414   :  { %2691 = vst [vmem:[%s5283_s7 + $0x160] sm:$0xff] %v2628_v23  ;;  %v2630_v13 = vsel %vm1070_vm1, %v2503_v16, %v2567_v22  ;;  %v2251_v0 = vadd.f32 %v3034_v39, %v2250_v7  ;;  %v2236_v38 = vmul.f32 %v3036_v59, %v2235_v54  ;;  %vm2240_vm15 = vmor %vm2238_vm14, %vm2239_vm13  ;;  %v2272_v5 = vand.u32 2147483648, %v5099_v4 }
 0x415   :  { %v3038_v34 = vpop.eup %3037  ;;  %2693 = vst [vmem:[%s5283_s7 + $0x170] sm:$0xff] %v2630_v13  ;;  %vm2266_vm3 = vweird.f32 %v5099_v4  ;;  %v2568_v45 = vsel %vm2520_vm4, %v5395_v14, 0.0  ;;  %vm2271_vm6 = vcmp.eq.f32.partialorder %v2270_v32, 8.507059e+37 }
 0x416   :  { %v2255_v1 = vsel %vm2254_vm11, %v3034_v39, %v2251_v0  ;;  %v2262_v41 = vmul.f32 %v3038_v34, %v5099_v4  ;;  %v1550_v37 = vpop.xlane.xlu2 %1549  ;;  %v2237_v6 = vadd.f32 %v3036_v59, %v2236_v38  ;;  %vm2267_vm2 = vweird.f32 %v3038_v34 }
 0x417   :  { %v2260_v61 = vsel %vm2257_vm12, %v2259_v19, %v2255_v1  ;;  %3039 = vrcp.f32 %v1550_v37  ;;  %vm2268_vm5 = vmor %vm2266_vm3, %vm2267_vm2  ;;  %v2273_v36 = vor.u32 1.1754944e-38, %v2272_v5  ;;  %v2286_v23 = vand.u32 2147483648, %v1550_v37  ;;  %v5397_v19 = vld [vmem:[#allocation3_spill] sm:$0xff] }
 0x418   :  { %v2505_v50 = vmul.f32 %v4899_v53, %v2260_v61  ;;  %v2263_v24 = vsub.f32 1.0, %v2262_v41  ;;  %v2241_v2 = vsel %vm2240_vm15, %v3036_v59, %v2237_v6  ;;  %v5396_v59 = vld [vmem:[#allocation20_spill] sm:$0xff]  ;;  %v2284_v7 = vand.u32 2147483647, %v1550_v37 }
 0x419   :  { %v2246_v53 = vsel %vm2243_vm0, %v2245_v56, %v2241_v2  ;;  %v2570_v60 = vsel %vm2520_vm4, %v5396_v59, 0.0  ;;  %vm2280_vm8 = vweird.f32 %v1550_v37  ;;  %v2571_v43 = vsel %vm2520_vm4, %v5397_v19, 0.0 }
 0x41a   :  { %v2632_v39 = vsel %vm1070_vm1, %v2505_v50, %v2569_v27  ;;  %v2264_v33 = vmul.f32 %v3038_v34, %v2263_v24  ;;  %v2504_v58 = vmul.f32 %v4897_v20, %v2246_v53  ;;  %vm2285_vm10 = vcmp.eq.f32.partialorder %v2284_v7, 8.507059e+37 }
 0x41b   :  { %2695 = vst [vmem:[%s5283_s7 + $0x180] sm:$0xff] %v2632_v39  ;;  %v5398_v39 = vld [vmem:[#allocation22_spill] sm:$0xff] }
 0x41c   :  { %v2265_v12 = vadd.f32 %v3038_v34, %v2264_v33  ;;  %v2631_v44 = vsel %vm1070_vm1, %v2504_v58, %v2568_v45  ;;  %v2572_v2 = vsel %vm2520_vm4, %v5398_v39, 0.0 }
 0x41d   :  { %v3040_v11 = vpop.eup %3039  ;;  %2694 = vst [vmem:[%s5283_s7 + $0x178] sm:$0xff] %v2631_v44 }
 0x41e   :  { %v2269_v48 = vsel %vm2268_vm5, %v3038_v34, %v2265_v12  ;;  %v2276_v63 = vmul.f32 %v3040_v11, %v1550_v37  ;;  %v1552_v55 = vpop.xlane.xlu0 %1551  ;;  %vm2281_vm7 = vweird.f32 %v3040_v11 }
 0x41f   :  { %v2274_v20 = vsel %vm2271_vm6, %v2273_v36, %v2269_v48  ;;  %3041 = vrcp.f32 %v1552_v55  ;;  %vm2282_vm9 = vmor %vm2280_vm8, %vm2281_vm7  ;;  %v2300_v38 = vand.u32 2147483648, %v1552_v55  ;;  %v2298_v28 = vand.u32 2147483647, %v1552_v55 }
 0x420   :  { %v2506_v4 = vmul.f32 %v4908_v3, %v2274_v20  ;;  %v2277_v46 = vsub.f32 1.0, %v2276_v63  ;;  %v2287_v3 = vor.u32 1.1754944e-38, %v2286_v23  ;;  %vm2294_vm12 = vweird.f32 %v1552_v55  ;;  %v5399_v63 = vld [vmem:[#allocation4_spill] sm:$0xff] }
 0x421   :  { %vm2299_vm14 = vcmp.eq.f32.partialorder %v2298_v28, 8.507059e+37 }
 0x422   :  { %v2633_v47 = vsel %vm1070_vm1, %v2506_v4, %v2570_v60  ;;  %v2278_v16 = vmul.f32 %v3040_v11, %v2277_v46  ;;  %v2573_v4 = vsel %vm2520_vm4, %v5399_v63, 0.0 }
 0x423   :  { %2696 = vst [vmem:[%s5283_s7 + $0x188] sm:$0xff] %v2633_v47 }
 0x424   :  { %v2279_v31 = vadd.f32 %v3040_v11, %v2278_v16 }
 0x425   :  { %v3042_v40 = vpop.eup %3041 }
 0x426   :  { %v2283_v22 = vsel %vm2282_vm9, %v3040_v11, %v2279_v31  ;;  %v1554_v13 = vpop.xlane.xlu1 %1553  ;;  %v2290_v54 = vmul.f32 %v3042_v40, %v1552_v55  ;;  %vm2295_vm11 = vweird.f32 %v3042_v40 }
 0x427   :  { %v2288_v0 = vsel %vm2285_vm10, %v2287_v3, %v2283_v22  ;;  %3043 = vrcp.f32 %v1554_v13  ;;  %vm2296_vm13 = vmor %vm2294_vm12, %vm2295_vm11  ;;  %v2314_v5 = vand.u32 2147483648, %v1554_v13  ;;  %v2312_v53 = vand.u32 2147483647, %v1554_v13  ;;  %v5400_v22 = vld [vmem:[#allocation5_spill] sm:$0xff] }
 0x428   :  { %v2507_v34 = vmul.f32 %v4921_v57, %v2288_v0  ;;  %v2291_v17 = vsub.f32 1.0, %v2290_v54  ;;  %v2301_v57 = vor.u32 1.1754944e-38, %v2300_v38  ;;  %vm2308_vm0 = vweird.f32 %v1554_v13 }
 0x429   :  { %vm2313_vm3 = vcmp.eq.f32.partialorder %v2312_v53, 8.507059e+37 }
 0x42a   :  { %v2634_v1 = vsel %vm1070_vm1, %v2507_v34, %v2571_v43  ;;  %v2292_v41 = vmul.f32 %v3042_v40, %v2291_v17 }
 0x42b   :  { %2697 = vst [vmem:[%s5283_s7 + $0x190] sm:$0xff] %v2634_v1 }
 0x42c   :  { %v2293_v61 = vadd.f32 %v3042_v40, %v2292_v41 }
 0x42d   :  { %v3044_v27 = vpop.eup %3043 }
 0x42e   :  { %v2304_v37 = vmul.f32 %v3044_v27, %v1554_v13  ;;  %v1556_v50 = vpop.xlane.xlu2 %1555  ;;  %v2297_v6 = vsel %vm2296_vm13, %v3042_v40, %v2293_v61  ;;  %vm2309_vm15 = vweird.f32 %v3044_v27  ;;  %v2574_v13 = vsel %vm2520_vm4, %v5400_v22, 0.0 }
 0x42f   :  { %3045 = vrcp.f32 %v1556_v50  ;;  %v2302_v24 = vsel %vm2299_vm14, %v2301_v57, %v2297_v6  ;;  %vm2310_vm2 = vmor %vm2308_vm0, %vm2309_vm15  ;;  %v2328_v55 = vand.u32 2147483648, %v1556_v50  ;;  %v2326_v46 = vand.u32 2147483647, %v1556_v50 }
 0x430   :  { %v2305_v56 = vsub.f32 1.0, %v2304_v37  ;;  %v2508_v32 = vmul.f32 %v4936_v51, %v2302_v24  ;;  %v2315_v51 = vor.u32 1.1754944e-38, %v2314_v5  ;;  %vm2322_vm6 = vweird.f32 %v1556_v50 }
 0x431   :  { %vm2327_vm8 = vcmp.eq.f32.partialorder %v2326_v46, 8.507059e+37 }
 0x432   :  { %v2306_v33 = vmul.f32 %v3044_v27, %v2305_v56  ;;  %v2635_v58 = vsel %vm1070_vm1, %v2508_v32, %v2572_v2 }
 0x433   :  { %2698 = vst [vmem:[%s5283_s7 + $0x198] sm:$0xff] %v2635_v58 }
 0x434   :  { %v2307_v12 = vadd.f32 %v3044_v27, %v2306_v33 }
 0x435   :  { %v3046_v14 = vpop.eup %3045 }
 0x436   :  { %v2311_v45 = vsel %vm2310_vm2, %v3044_v27, %v2307_v12  ;;  %v2318_v36 = vmul.f32 %v3046_v14, %v1556_v50  ;;  %v1558_v44 = vpop.xlane.xlu0 %1557  ;;  %vm2323_vm5 = vweird.f32 %v3046_v14  ;;  %v5401_v50 = vld [vmem:[#allocation6_spill] sm:$0xff] }
 0x437   :  { %v2316_v11 = vsel %vm2313_vm3, %v2315_v51, %v2311_v45  ;;  %3047 = vrcp.f32 %v1558_v44  ;;  %vm2324_vm7 = vmor %vm2322_vm6, %vm2323_vm5  ;;  %v2342_v34 = vand.u32 2147483648, %v1558_v44  ;;  %v2340_v43 = vand.u32 2147483647, %v1558_v44  ;;  %v5402_v51 = vld [vmem:[#allocation7_spill] sm:$0xff] }
 0x438   :  { %v2509_v48 = vmul.f32 %v4944_v29, %v2316_v11  ;;  %v2319_v20 = vsub.f32 1.0, %v2318_v36  ;;  %v2329_v29 = vor.u32 1.1754944e-38, %v2328_v55  ;;  %vm2336_vm10 = vweird.f32 %v1558_v44 }
 0x439   :  { %vm2341_vm12 = vcmp.eq.f32.partialorder %v2340_v43, 8.507059e+37  ;;  %v2575_v6 = vsel %vm2520_vm4, %v5401_v50, 0.0  ;;  %v2576_v45 = vsel %vm2520_vm4, %v5402_v51, 0.0 }
 0x43a   :  { %v2636_v59 = vsel %vm1070_vm1, %v2509_v48, %v2573_v4  ;;  %v2320_v60 = vmul.f32 %v3046_v14, %v2319_v20 }
 0x43b   :  { %2699 = vst [vmem:[%s5283_s7 + $0x1a0] sm:$0xff] %v2636_v59 }
 0x43c   :  { %v2321_v47 = vadd.f32 %v3046_v14, %v2320_v60 }
 0x43d   :  { %v3048_v23 = vpop.eup %3047 }
 0x43e   :  { %v2325_v16 = vsel %vm2324_vm7, %v3046_v14, %v2321_v47  ;;  %v1560_v7 = vpop.xlane.xlu1 %1559  ;;  %v2332_v3 = vmul.f32 %v3048_v23, %v1558_v44  ;;  %vm2337_vm9 = vweird.f32 %v3048_v23  ;;  %v5403_v47 = vld [vmem:[#allocation8_spill] sm:$0xff] }
 0x43f   :  { %v2330_v31 = vsel %vm2327_vm8, %v2329_v29, %v2325_v16  ;;  %3049 = vrcp.f32 %v1560_v7  ;;  %vm2338_vm11 = vmor %vm2336_vm10, %vm2337_vm9  ;;  %v2356_v37 = vand.u32 2147483648, %v1560_v7  ;;  %v2354_v56 = vand.u32 2147483647, %v1560_v7 }
 0x440   :  { %v2510_v40 = vmul.f32 %v4957_v52, %v2330_v31  ;;  %v2333_v0 = vsub.f32 1.0, %v2332_v3  ;;  %v2343_v52 = vor.u32 1.1754944e-38, %v2342_v34  ;;  %vm2350_vm14 = vweird.f32 %v1560_v7 }
 0x441   :  { %vm2355_vm0 = vcmp.eq.f32.partialorder %v2354_v56, 8.507059e+37  ;;  %v2577_v29 = vsel %vm2520_vm4, %v5403_v47, 0.0 }
 0x442   :  { %v2637_v54 = vsel %vm1070_vm1, %v2510_v40, %v2574_v13  ;;  %v2334_v19 = vmul.f32 %v3048_v23, %v2333_v0 }
 0x443   :  { %2700 = vst [vmem:[%s5283_s7 + $0x1a8] sm:$0xff] %v2637_v54 }
 0x444   :  { %v2335_v1 = vadd.f32 %v3048_v23, %v2334_v19 }
 0x445   :  { %v3050_v17 = vpop.eup %3049 }
 0x446   :  { %v2346_v38 = vmul.f32 %v3050_v17, %v1560_v7  ;;  %v1562_v41 = vpop.xlane.xlu2 %1561  ;;  %v2339_v28 = vsel %vm2338_vm11, %v3048_v23, %v2335_v1  ;;  %vm2351_vm13 = vweird.f32 %v3050_v17  ;;  %v5404_v1 = vld [vmem:[#allocation9_spill] sm:$0xff] }
 0x447   :  { %3051 = vrcp.f32 %v1562_v41  ;;  %v2344_v27 = vsel %vm2341_vm12, %v2343_v52, %v2339_v28  ;;  %vm2352_vm15 = vmor %vm2350_vm14, %vm2351_vm13  ;;  %v2370_v36 = vand.u32 2147483648, %v1562_v41  ;;  %v2368_v48 = vand.u32 2147483647, %v1562_v41 }
 0x448   :  { %v2347_v61 = vsub.f32 1.0, %v2346_v38  ;;  %v2511_v57 = vmul.f32 %v4973_v10, %v2344_v27  ;;  %v2357_v10 = vor.u32 1.1754944e-38, %v2356_v37  ;;  %vm2364_vm3 = vweird.f32 %v1562_v41 }
 0x449   :  { %vm2369_vm6 = vcmp.eq.f32.partialorder %v2368_v48, 8.507059e+37  ;;  %v2578_v52 = vsel %vm2520_vm4, %v5404_v1, 0.0 }
 0x44a   :  { %v2348_v24 = vmul.f32 %v3050_v17, %v2347_v61  ;;  %v2638_v32 = vsel %vm1070_vm1, %v2511_v57, %v2575_v6 }
 0x44b   :  { %2701 = vst [vmem:[%s5283_s7 + $0x1b0] sm:$0xff] %v2638_v32  ;;  %v5405_v32 = vld [vmem:[#allocation10_spill] sm:$0xff] }
 0x44c   :  { %v2349_v5 = vadd.f32 %v3050_v17, %v2348_v24 }
 0x44d   :  { %v3052_v39 = vpop.eup %3051 }
 0x44e   :  { %v2353_v2 = vsel %vm2352_vm15, %v3050_v17, %v2349_v5  ;;  %v2360_v33 = vmul.f32 %v3052_v39, %v1562_v41  ;;  %v1564_v58 = vpop.xlane.xlu0 %1563  ;;  %vm2365_vm2 = vweird.f32 %v3052_v39  ;;  %v2579_v5 = vsel %vm2520_vm4, %v5405_v32, 0.0 }
 0x44f   :  { %v2358_v53 = vsel %vm2355_vm0, %v2357_v10, %v2353_v2  ;;  %3053 = vrcp.f32 %v1564_v58  ;;  %vm2366_vm5 = vmor %vm2364_vm3, %vm2365_vm2  ;;  %v2384_v7 = vand.u32 2147483648, %v1564_v58  ;;  %v2382_v3 = vand.u32 2147483647, %v1564_v58 }
 0x450   :  { %v2512_v12 = vmul.f32 %v4983_v35, %v2358_v53  ;;  %v2361_v14 = vsub.f32 1.0, %v2360_v33  ;;  %v2371_v35 = vor.u32 1.1754944e-38, %v2370_v36  ;;  %vm2378_vm8 = vweird.f32 %v1564_v58 }
 0x451   :  { %vm2383_vm10 = vcmp.eq.f32.partialorder %v2382_v3, 8.507059e+37 }
 0x452   :  { %v2639_v11 = vsel %vm1070_vm1, %v2512_v12, %v2576_v45  ;;  %v2362_v44 = vmul.f32 %v3052_v39, %v2361_v14 }
 0x453   :  { %2702 = vst [vmem:[%s5283_s7 + $0x1b8] sm:$0xff] %v2639_v11 }
 0x454   :  { %v2363_v20 = vadd.f32 %v3052_v39, %v2362_v44  ;;  %v5406_v44 = vld [vmem:[#allocation11_spill] sm:$0xff] }
 0x455   :  { %v3054_v63 = vpop.eup %3053  ;;  %v2580_v48 = vsel %vm2520_vm4, %v5406_v44, 0.0 }
 0x456   :  { %v2367_v4 = vsel %vm2366_vm5, %v3052_v39, %v2363_v20  ;;  %v1566_v55 = vpop.xlane.xlu1 %1565  ;;  %v2374_v60 = vmul.f32 %v3054_v63, %v1564_v58  ;;  %vm2379_vm7 = vweird.f32 %v3054_v63 }
 0x457   :  { %v2372_v59 = vsel %vm2369_vm6, %v2371_v35, %v2367_v4  ;;  %3055 = vrcp.f32 %v1566_v55  ;;  %vm2380_vm9 = vmor %vm2378_vm8, %vm2379_vm7  ;;  %v2398_v17 = vand.u32 2147483648, %v1566_v55  ;;  %v2396_v41 = vand.u32 2147483647, %v1566_v55 }
 0x458   :  { %v2513_v46 = vmul.f32 %v4996_v21, %v2372_v59  ;;  %v2375_v23 = vsub.f32 1.0, %v2374_v60  ;;  %v2385_v21 = vor.u32 1.1754944e-38, %v2384_v7  ;;  %vm2392_vm12 = vweird.f32 %v1566_v55 }
 0x459   :  { %vm2397_vm14 = vcmp.eq.f32.partialorder %v2396_v41, 8.507059e+37 }
 0x45a   :  { %v2640_v16 = vsel %vm1070_vm1, %v2513_v46, %v2577_v29  ;;  %v2376_v31 = vmul.f32 %v3054_v63, %v2375_v23 }
 0x45b   :  { %2703 = vst [vmem:[%s5283_s7 + $0x1c0] sm:$0xff] %v2640_v16 }
 0x45c   :  { %v2377_v22 = vadd.f32 %v3054_v63, %v2376_v31  ;;  %v2581_v31 = vsel %vm2520_vm4, %v4797_v15, 0.0 }
 0x45d   :  { %v3056_v40 = vpop.eup %3055 }
 0x45e   :  { %v2388_v13 = vmul.f32 %v3056_v40, %v1566_v55  ;;  %v1568_v0 = vpop.xlane.xlu2 %1567  ;;  %v2381_v54 = vsel %vm2380_vm9, %v3054_v63, %v2377_v22  ;;  %vm2393_vm11 = vweird.f32 %v3056_v40 }
 0x45f   :  { %3057 = vrcp.f32 %v1568_v0  ;;  %v2386_v34 = vsel %vm2383_vm10, %v2385_v21, %v2381_v54  ;;  %vm2394_vm13 = vmor %vm2392_vm12, %vm2393_vm11  ;;  %v2412_v39 = vand.u32 2147483648, %v1568_v0  ;;  %v2410_v33 = vand.u32 2147483647, %v1568_v0 }
 0x460   :  { %v2389_v19 = vsub.f32 1.0, %v2388_v13  ;;  %v2514_v43 = vmul.f32 %v5012_v9, %v2386_v34  ;;  %v2399_v9 = vor.u32 1.1754944e-38, %v2398_v17  ;;  %vm2406_vm0 = vweird.f32 %v1568_v0 }
 0x461   :  { %vm2411_vm3 = vcmp.eq.f32.partialorder %v2410_v33, 8.507059e+37  ;;  %v2582_v17 = vsel %vm2520_vm4, %v4821_v18, 0.0  ;;  %v2583_v18 = vsel %vm2520_vm4, %v4852_v62, 0.0 }
 0x462   :  { %v2390_v38 = vmul.f32 %v3056_v40, %v2389_v19  ;;  %v2641_v28 = vsel %vm1070_vm1, %v2514_v43, %v2578_v52 }
 0x463   :  { %2704 = vst [vmem:[%s5283_s7 + $0x1c8] sm:$0xff] %v2641_v28 }
 0x464   :  { %v2391_v27 = vadd.f32 %v3056_v40, %v2390_v38 }
 0x465   :  { %v3058_v61 = vpop.eup %3057 }
 0x466   :  { %v2395_v57 = vsel %vm2394_vm13, %v3056_v40, %v2391_v27  ;;  %v2402_v37 = vmul.f32 %v3058_v61, %v1568_v0  ;;  %v1570_v50 = vpop.xlane.xlu0 %1569  ;;  %vm2407_vm15 = vweird.f32 %v3058_v61 }
 0x467   :  { %v2400_v6 = vsel %vm2397_vm14, %v2399_v9, %v2395_v57  ;;  %3059 = vrcp.f32 %v1570_v50  ;;  %vm2408_vm2 = vmor %vm2406_vm0, %vm2407_vm15  ;;  %v2426_v20 = vand.u32 2147483648, %v1570_v50  ;;  %v2424_v4 = vand.u32 2147483647, %v1570_v50 }
 0x468   :  { %v2515_v24 = vmul.f32 %v5022_v30, %v2400_v6  ;;  %v2403_v56 = vsub.f32 1.0, %v2402_v37  ;;  %v2413_v30 = vor.u32 1.1754944e-38, %v2412_v39  ;;  %vm2420_vm6 = vweird.f32 %v1570_v50 }
 0x469   :  { %v2427_v60 = vor.u32 1.1754944e-38, %v2426_v20  ;;  %vm2425_vm8 = vcmp.eq.f32.partialorder %v2424_v4, 8.507059e+37 }
 0x46a   :  { %v2642_v10 = vsel %vm1070_vm1, %v2515_v24, %v2579_v5  ;;  %v2404_v2 = vmul.f32 %v3058_v61, %v2403_v56 }
 0x46b   :  { %2705 = vst [vmem:[%s5283_s7 + $0x1d0] sm:$0xff] %v2642_v10 }
 0x46c   :  { %v2405_v53 = vadd.f32 %v3058_v61, %v2404_v2 }
 0x46d   :  { %v3060_v58 = vpop.eup %3059 }
 0x46e   :  { %v1572_v12 = vpop.xlane.xlu1 %1571  ;;  %v2409_v14 = vsel %vm2408_vm2, %v3058_v61, %v2405_v53  ;;  %v2416_v51 = vmul.f32 %v3060_v58, %v1570_v50  ;;  %vm2421_vm5 = vweird.f32 %v3060_v58 }
 0x46f   :  { %3061 = vrcp.f32 %v1572_v12  ;;  %v2414_v45 = vsel %vm2411_vm3, %v2413_v30, %v2409_v14  ;;  %vm2422_vm7 = vmor %vm2420_vm6, %vm2421_vm5  ;;  %v2440_v7 = vand.u32 2147483648, %v1572_v12  ;;  %v2438_v40 = vand.u32 2147483647, %v1572_v12 }
 0x470   :  { %v2516_v36 = vmul.f32 %v5034_v25, %v2414_v45  ;;  %v2417_v11 = vsub.f32 1.0, %v2416_v51  ;;  %vm2434_vm10 = vweird.f32 %v1572_v12 }
 0x471   :  { %vm2439_vm12 = vcmp.eq.f32.partialorder %v2438_v40, 8.507059e+37 }
 0x472   :  { %v2643_v35 = vsel %vm1070_vm1, %v2516_v36, %v2580_v48  ;;  %v2418_v63 = vmul.f32 %v3060_v58, %v2417_v11 }
 0x473   :  { %2706 = vst [vmem:[%s5283_s7 + $0x1d8] sm:$0xff] %v2643_v35 }
 0x474   :  { %v2419_v59 = vadd.f32 %v3060_v58, %v2418_v63 }
 0x475   :  { %v3062_v55 = vpop.eup %3061 }
 0x476   :  { %v1574_v25 = vpop.xlane.xlu2 %1573  ;;  %v2430_v46 = vmul.f32 %v3062_v55, %v1572_v12  ;;  %v2423_v47 = vsel %vm2422_vm7, %v3060_v58, %v2419_v59  ;;  %vm2435_vm9 = vweird.f32 %v3062_v55 }
 0x477   :  { %3063 = vrcp.f32 %v1574_v25  ;;  %v2428_v29 = vsel %vm2425_vm8, %v2427_v60, %v2423_v47  ;;  %vm2436_vm11 = vmor %vm2434_vm10, %vm2435_vm9  ;;  %v2454_v43 = vand.u32 2147483648, %v1574_v25  ;;  %v2452_v52 = vand.u32 2147483647, %v1574_v25 }
 0x478   :  { %v2431_v23 = vsub.f32 1.0, %v2430_v46  ;;  %v2517_v16 = vmul.f32 %v5038_v49, %v2428_v29  ;;  %v2441_v49 = vor.u32 1.1754944e-38, %v2440_v7  ;;  %vm2448_vm14 = vweird.f32 %v1574_v25 }
 0x479   :  { %v2455_v28 = vor.u32 1.1754944e-38, %v2454_v43  ;;  %vm2453_vm0 = vcmp.eq.f32.partialorder %v2452_v52, 8.507059e+37 }
 0x47a   :  { %v2432_v3 = vmul.f32 %v3062_v55, %v2431_v23  ;;  %v2644_v22 = vsel %vm1070_vm1, %v2517_v16, %v2581_v31 }
 0x47b   :  { %2707 = vst [vmem:[%s5283_s7 + $0x1e0] sm:$0xff] %v2644_v22 }
 0x47c   :  { %v2433_v13 = vadd.f32 %v3062_v55, %v2432_v3 }
 0x47d   :  { %v3064_v21 = vpop.eup %3063 }
 0x47e   :  { %v2444_v0 = vmul.f32 %v3064_v21, %v1574_v25  ;;  %v2437_v54 = vsel %vm2436_vm11, %v3062_v55, %v2433_v13  ;;  %vm2449_vm13 = vweird.f32 %v3064_v21 }
 0x47f   :  { %v2442_v34 = vsel %vm2439_vm12, %v2441_v49, %v2437_v54  ;;  %vm2450_vm15 = vmor %vm2448_vm14, %vm2449_vm13 }
 0x480   :  { %v2445_v15 = vsub.f32 1.0, %v2444_v0  ;;  %v2518_v19 = vmul.f32 %v5042_v42, %v2442_v34 }
 0x482   :  { %v2446_v1 = vmul.f32 %v3064_v21, %v2445_v15  ;;  %v2645_v38 = vsel %vm1070_vm1, %v2518_v19, %v2582_v17 }
 0x483   :  { %2708 = vst [vmem:[%s5283_s7 + $0x1e8] sm:$0xff] %v2645_v38 }
 0x484   :  { %v2447_v41 = vadd.f32 %v3064_v21, %v2446_v1 }
 0x486   :  { %v2451_v42 = vsel %vm2450_vm15, %v3064_v21, %v2447_v41 }
 0x487   :  { %v2456_v27 = vsel %vm2453_vm0, %v2455_v28, %v2451_v42 }
 0x488   :  { %v2519_v61 = vmul.f32 %v5053_v8, %v2456_v27 }
 0x48a   :  { %v2646_v9 = vsel %vm1070_vm1, %v2519_v61, %v2583_v18 }
 0x48b   :  { %2709 = vst [vmem:[%s5283_s7 + $0x1f0] sm:$0xff] %v2646_v9 }

</bundles_post_ra>
